<compile_context>
chip_gen: v7x
topology: tpu7x:2x2x1
jax: 0.10.0
libtpu: 0.0.40
codegen_flags: <defaults>
</compile_context>

<pallas_src>
import numpy as np
import jax
import jax.numpy as jnp
from jax.experimental import pallas as pl
from jax.experimental.pallas import tpu as pltpu

# ---------------------------------------------------------------------------
# Configuration (small synthetic shapes consistent with the module)
# ---------------------------------------------------------------------------
BATCH = 2
IN_CH = 64            # backbone.out_features
PLANES = 256          # ADDneck bottleneck width (fixed by the module)
NUM_CLASSES = 10
H = W = 7             # AvgPool2d(7, stride=1) on a 7x7 map == global average
HW = H * W
TILE = 9              # zero-framed per-sample tile side (7 real + 1 frame each side)
TILE_ROWS = TILE * TILE          # 81 rows per sample before padding
SAMPLE_STRIDE = 88               # 81 -> 88 rows (multiple of 8)
HALO = 16             # zero halo above/below h1 scratch (covers |shift| <= 10)
CLS_PAD = 128         # lane-dense logits width
EPS = 1e-5


# ---------------------------------------------------------------------------
# Pallas kernel: one ADDneck branch + avgpool + Linear, whole batch at once.
# Grid = (2,) over the two branches (son1/cls_fc_son1, son2/cls_fc_son2).
# ---------------------------------------------------------------------------
def mfsan_branch_kernel(x_ref, pool_ref, rowmask_ref,
                        w1_ref, s1_ref, b1_ref,
                        w2_ref, s2_ref, b2_ref,
                        w3_ref, s3_ref, b3_ref,
                        wfc_ref, bfc_ref,
                        out_ref, h1_ref, slab_ref):
    nrows = x_ref.shape[0]                                 # N * SAMPLE_STRIDE

    # conv1 (1x1) + BN1 + ReLU, then zero frame/padding rows (they would
    # otherwise hold relu(bn1 bias), breaking zero-padding conv semantics).
    h1 = jnp.dot(x_ref[...], w1_ref[0], preferred_element_type=jnp.float32)
    h1 = jnp.maximum(h1 * s1_ref[0] + b1_ref[0], 0.0) * rowmask_ref[...]

    # Stage h1 (bf16) into a zero-haloed scratch so every 3x3 tap is a static
    # sublane-shifted slice.  Halo writes are unconditional (per-core scratch
    # under "parallel" megacore execution -- do NOT gate on program_id).
    h1_ref[pl.ds(0, HALO), :] = jnp.zeros((HALO, PLANES), jnp.bfloat16)
    h1_ref[pl.ds(HALO + nrows, HALO), :] = jnp.zeros((HALO, PLANES), jnp.bfloat16)
    h1_ref[pl.ds(HALO, nrows), :] = h1.astype(jnp.bfloat16)

    # conv2 (3x3, pad=1) + BN2 + ReLU as ONE K=2304 matmul: write the 9
    # shifted taps into a lane-concatenated slab (offsets k*256 are aligned).
    for k in range(9):
        dy, dx = k // 3 - 1, k % 3 - 1
        off = dy * TILE + dx                               # static, in [-10, 10]
        slab_ref[:, pl.ds(k * PLANES, PLANES)] = h1_ref[pl.ds(HALO + off, nrows), :]
    acc = jnp.dot(slab_ref[...], w2_ref[0], preferred_element_type=jnp.float32)
    h2 = jnp.maximum(acc * s2_ref[0] + b2_ref[0], 0.0)

    # conv3 (1x1) + BN3 + ReLU
    h3 = jnp.dot(h2.astype(jnp.bfloat16), w3_ref[0],
                 preferred_element_type=jnp.float32)
    h3 = jnp.maximum(h3 * s3_ref[0] + b3_ref[0], 0.0)

    # AvgPool2d(7) == per-sample mean over the 49 real rows, as one bf16
    # matmul, then the Linear classifier (classes zero-padded lane-dense 128).
    feat = jnp.dot(pool_ref[...], h3.astype(jnp.bfloat16),
                   preferred_element_type=jnp.float32)
    out_ref[0] = (jnp.dot(feat.astype(jnp.bfloat16), wfc_ref[0],
                          preferred_element_type=jnp.float32) + bfc_ref[0])


# ---------------------------------------------------------------------------
# Host-side constant builders (numpy; become jit-time constants)
# ---------------------------------------------------------------------------
def build_row_constants(n):
    """rowmask (n*88, 1) f32: 1 on real-pixel rows, 0 on frame/padding rows.
       pool    (n, n*88) bf16: 1/49 over each sample's real-pixel rows."""
    mask = np.zeros((n * SAMPLE_STRIDE, 1), np.float32)
    pool = np.zeros((n, n * SAMPLE_STRIDE), np.float32)
    for s in range(n):
        for y in range(H):
            for x in range(W):
                r = s * SAMPLE_STRIDE + (y + 1) * TILE + (x + 1)
                mask[r, 0] = 1.0
                pool[s, r] = 1.0 / HW
    return jnp.asarray(mask), jnp.asarray(pool).astype(jnp.bfloat16)


# ---------------------------------------------------------------------------
# Parameter construction (deterministic, BN folded into scale/bias, eval mode)
# ---------------------------------------------------------------------------
def _fold_bn(gamma, beta, mean, var):
    scale = gamma / jnp.sqrt(var + EPS)
    bias = beta - mean * scale
    return scale[None, :], bias[None, :]


def make_addneck_params(key, inplanes, planes):
    ks = jax.random.split(key, 9)
    w1 = 0.05 * jax.random.normal(ks[0], (inplanes, planes), jnp.float32)
    w2 = 0.05 * jax.random.normal(ks[1], (9, planes, planes), jnp.float32)
    w3 = 0.05 * jax.random.normal(ks[2], (planes, planes), jnp.float32)
    bn = {}
    for idx, kk in zip((1, 2, 3), (ks[3], ks[4], ks[5])):
        g = 1.0 + 0.1 * jax.random.normal(jax.random.fold_in(kk, 0), (planes,))
        b = 0.1 * jax.random.normal(jax.random.fold_in(kk, 1), (planes,))
        m = 0.1 * jax.random.normal(jax.random.fold_in(kk, 2), (planes,))
        v = jnp.abs(1.0 + 0.1 * jax.random.normal(jax.random.fold_in(kk, 3), (planes,)))
        bn[idx] = _fold_bn(g, b, m, v)
    return {"w1": w1, "s1": bn[1][0], "b1": bn[1][1],
            "w2": w2, "s2": bn[2][0], "b2": bn[2][1],
            "w3": w3, "s3": bn[3][0], "b3": bn[3][1]}


def make_fc_params(key, in_dim, out_dim):
    k1, k2 = jax.random.split(key)
    return {"wfc": 0.05 * jax.random.normal(k1, (in_dim, out_dim), jnp.float32),
            "bfc": 0.05 * jax.random.normal(k2, (1, out_dim), jnp.float32)}


def _pad_classes(a):
    return jnp.pad(a, ((0, 0), (0, CLS_PAD - a.shape[-1])))


def stack_branch_params(params):
    """Stack son1/son2 weights on a leading branch axis; matmul weights bf16
    (conv2 taps concatenated along K -> (2304, 256)), BN scale/bias + fc bias
    f32 (fc weights/bias zero-padded to CLS_PAD)."""
    s1, s2 = params["son1"], params["son2"]
    f1, f2 = params["fc1"], params["fc2"]
    st = lambda a, b: jnp.stack([a, b], axis=0)
    fuse_w2 = lambda w: w.reshape(9 * PLANES, PLANES)      # tap-major K order
    return {
        "w1": st(s1["w1"], s2["w1"]).astype(jnp.bfloat16),
        "s1": st(s1["s1"], s2["s1"]), "b1": st(s1["b1"], s2["b1"]),
        "w2": st(fuse_w2(s1["w2"]), fuse_w2(s2["w2"])).astype(jnp.bfloat16),
        "s2": st(s1["s2"], s2["s2"]), "b2": st(s1["b2"], s2["b2"]),
        "w3": st(s1["w3"], s2["w3"]).astype(jnp.bfloat16),
        "s3": st(s1["s3"], s2["s3"]), "b3": st(s1["b3"], s2["b3"]),
        "wfc": st(_pad_classes(f1["wfc"]),
                  _pad_classes(f2["wfc"])).astype(jnp.bfloat16),
        "bfc": st(_pad_classes(f1["bfc"]), _pad_classes(f2["bfc"])),
    }


# ---------------------------------------------------------------------------
# MFSAN eval forward (sharedNet == identity; see TODO above)
# ---------------------------------------------------------------------------
@jax.jit
def mfsan_forward(x_nchw, params):
    n, c, h, w = x_nchw.shape
    assert (h, w) == (H, W), "AvgPool2d(7, stride=1) global-pool path needs 7x7"
    nrows = n * SAMPLE_STRIDE

    # NCHW -> (N,7,7,C) -> zero-framed (N,9,9,C) -> 81 rows -> pad to 88 ->
    # flatten to a lane-dense (N*88, C) bf16 matrix (channels on lanes).
    x_nhwc = jnp.transpose(x_nchw, (0, 2, 3, 1))
    x_framed = jnp.pad(x_nhwc, ((0, 0), (1, 1), (1, 1), (0, 0)))
    x_rows = x_framed.reshape(n, TILE_ROWS, c)
    x_rows = jnp.pad(x_rows, ((0, 0), (0, SAMPLE_STRIDE - TILE_ROWS), (0, 0)))
    x_flat = x_rows.reshape(nrows, c).astype(jnp.bfloat16)

    rowmask, pool = build_row_constants(n)
    sp = stack_branch_params(params)

    full = lambda a: pl.BlockSpec(a.shape, lambda b: (0,) * a.ndim)
    branch = lambda a: pl.BlockSpec((1,) + a.shape[1:],
                                    lambda b: (b,) + (0,) * (a.ndim - 1))

    # Advisory cost estimate for the XLA scheduler.
    flops = 2 * (2 * nrows * PLANES * (c + 9 * PLANES + PLANES)
                 + 2 * n * nrows * PLANES + 2 * n * PLANES * CLS_PAD)
    operands = (x_flat, pool, rowmask) + tuple(sp.values())
    bytes_accessed = int(sum(int(np.prod(a.shape)) * a.dtype.itemsize
                             for a in operands)) + 2 * n * CLS_PAD * 4

    out = pl.pallas_call(
        mfsan_branch_kernel,
        out_shape=jax.ShapeDtypeStruct((2, n, CLS_PAD), jnp.float32),
        grid_spec=pltpu.PrefetchScalarGridSpec(
            num_scalar_prefetch=0,
            grid=(2,),                                   # one step per branch
            in_specs=[
                full(x_flat), full(pool), full(rowmask),
                branch(sp["w1"]), branch(sp["s1"]), branch(sp["b1"]),
                branch(sp["w2"]), branch(sp["s2"]), branch(sp["b2"]),
                branch(sp["w3"]), branch(sp["s3"]), branch(sp["b3"]),
                branch(sp["wfc"]), branch(sp["bfc"]),
            ],
            out_specs=pl.BlockSpec((1, n, CLS_PAD), lambda b: (b, 0, 0)),
            scratch_shapes=[
                pltpu.VMEM((nrows + 2 * HALO, PLANES), jnp.bfloat16),   # h1 + halo
                pltpu.VMEM((nrows, 9 * PLANES), jnp.bfloat16),          # conv2 slab
            ],
        ),
        compiler_params=pltpu.CompilerParams(
            dimension_semantics=("parallel",)),          # v7x: one branch per TC
        cost_estimate=pl.CostEstimate(flops=flops, transcendentals=0,
                                      bytes_accessed=bytes_accessed),
    )(x_flat, pool, rowmask,
      sp["w1"], sp["s1"], sp["b1"],
      sp["w2"], sp["s2"], sp["b2"],
      sp["w3"], sp["s3"], sp["b3"],
      sp["wfc"], sp["bfc"])

    pred1 = out[0, :, :NUM_CLASSES]
    pred2 = out[1, :, :NUM_CLASSES]
    return pred1, pred2


# ---------------------------------------------------------------------------
# Pure-JAX f32 reference (for verification)
# ---------------------------------------------------------------------------
def ref_branch(x_nhwc, son, fc):
    h1 = jnp.einsum("nhwc,cd->nhwd", x_nhwc, son["w1"])
    h1 = jnp.maximum(h1 * son["s1"][0] + son["b1"][0], 0.0)
    hp = jnp.pad(h1, ((0, 0), (1, 1), (1, 1), (0, 0)))
    acc = jnp.zeros_like(h1)
    for k in range(9):
        dy, dx = k // 3, k % 3
        acc = acc + jnp.einsum("nhwc,cd->nhwd",
                               hp[:, dy:dy + H, dx:dx + W, :], son["w2"][k])
    h2 = jnp.maximum(acc * son["s2"][0] + son["b2"][0], 0.0)
    h3 = jnp.einsum("nhwc,cd->nhwd", h2, son["w3"])
    h3 = jnp.maximum(h3 * son["s3"][0] + son["b3"][0], 0.0)
    feat = jnp.mean(h3, axis=(1, 2))
    return feat @ fc["wfc"] + fc["bfc"][0]


if __name__ == "__main__":
    key = jax.random.PRNGKey(0)
    kx, k1, k2, k3, k4 = jax.random.split(key, 5)

    x = jax.random.normal(kx, (BATCH, IN_CH, H, W), jnp.float32)   # NCHW input

    params = {
        "son1": make_addneck_params(k1, IN_CH, PLANES),
        "son2": make_addneck_params(k2, IN_CH, PLANES),
        "fc1": make_fc_params(k3, PLANES, NUM_CLASSES),
        "fc2": make_fc_params(k4, PLANES, NUM_CLASSES),
    }

    pred1, pred2 = mfsan_forward(x, params)
    pred1 = jax.block_until_ready(pred1)
    pred2 = jax.block_until_ready(pred2)

    # Verify against the pure-JAX f32 reference (kernel uses bf16 matmul
    # operands with f32 accumulation -> loose-ish tolerance).
    x_nhwc = jnp.transpose(x, (0, 2, 3, 1))
    ref1 = ref_branch(x_nhwc, params["son1"], params["fc1"])
    ref2 = ref_branch(x_nhwc, params["son2"], params["fc2"])
    np.testing.assert_allclose(np.asarray(pred1), np.asarray(ref1),
                               rtol=5e-2, atol=5e-2)
    np.testing.assert_allclose(np.asarray(pred2), np.asarray(ref2),
                               rtol=5e-2, atol=5e-2)

    print("KERNEL_OK")
</pallas_src>

<mosaic_0001>
module attributes {stable_mosaic.version = 11 : i64} {
  func.func @mfsan_branch_kernel(%arg0: i32, %arg1: memref<176x64xbf16, #tpu.memory_space<vmem>>, %arg2: memref<2x176xbf16, #tpu.memory_space<vmem>>, %arg3: memref<176x1xf32, #tpu.memory_space<vmem>>, %arg4: memref<1x64x256xbf16, #tpu.memory_space<vmem>>, %arg5: memref<1x1x256xf32, #tpu.memory_space<vmem>>, %arg6: memref<1x1x256xf32, #tpu.memory_space<vmem>>, %arg7: memref<1x2304x256xbf16, #tpu.memory_space<vmem>>, %arg8: memref<1x1x256xf32, #tpu.memory_space<vmem>>, %arg9: memref<1x1x256xf32, #tpu.memory_space<vmem>>, %arg10: memref<1x256x256xbf16, #tpu.memory_space<vmem>>, %arg11: memref<1x1x256xf32, #tpu.memory_space<vmem>>, %arg12: memref<1x1x256xf32, #tpu.memory_space<vmem>>, %arg13: memref<1x256x128xbf16, #tpu.memory_space<vmem>>, %arg14: memref<1x1x128xf32, #tpu.memory_space<vmem>>, %arg15: memref<1x2x128xf32, #tpu.memory_space<vmem>>, %arg16: memref<208x256xbf16, #tpu.memory_space<vmem>>, %arg17: memref<176x2304xbf16, #tpu.memory_space<vmem>>) attributes {dimension_semantics = [#tpu.dimension_semantics<parallel>], iteration_bounds = array<i64: 2>, scalar_prefetch = 0 : i64, scratch_operands = 2 : i64, tpu.core_type = #tpu.core_type<tc>, window_params = [{pipeline_mode = #tpu.pipeline_mode<synchronous>, transform_indices = @transform_0, window_bounds = array<i64: 176, 64>}, {pipeline_mode = #tpu.pipeline_mode<synchronous>, transform_indices = @transform_1, window_bounds = array<i64: 2, 176>}, {pipeline_mode = #tpu.pipeline_mode<synchronous>, transform_indices = @transform_2, window_bounds = array<i64: 176, 1>}, {transform_indices = @transform_3, window_bounds = array<i64: 1, 64, 256>}, {transform_indices = @transform_4, window_bounds = array<i64: 1, 1, 256>}, {transform_indices = @transform_5, window_bounds = array<i64: 1, 1, 256>}, {transform_indices = @transform_6, window_bounds = array<i64: 1, 2304, 256>}, {transform_indices = @transform_7, window_bounds = array<i64: 1, 1, 256>}, {transform_indices = @transform_8, window_bounds = array<i64: 1, 1, 256>}, {transform_indices = @transform_9, window_bounds = array<i64: 1, 256, 256>}, {transform_indices = @transform_10, window_bounds = array<i64: 1, 1, 256>}, {transform_indices = @transform_11, window_bounds = array<i64: 1, 1, 256>}, {transform_indices = @transform_12, window_bounds = array<i64: 1, 256, 128>}, {transform_indices = @transform_13, window_bounds = array<i64: 1, 1, 128>}, {transform_indices = @transform_14, window_bounds = array<i64: 1, 2, 128>}]} {
    %c0 = arith.constant 0 : index
    %c0_0 = arith.constant 0 : index
    %0 = vector.load %arg1[%c0, %c0_0] : memref<176x64xbf16, #tpu.memory_space<vmem>>, vector<176x64xbf16>
    %c0_1 = arith.constant 0 : index
    %c0_2 = arith.constant 0 : index
    %c0_3 = arith.constant 0 : index
    %1 = vector.load %arg4[%c0_1, %c0_2, %c0_3] : memref<1x64x256xbf16, #tpu.memory_space<vmem>>, vector<1x64x256xbf16>
    %2 = vector.shape_cast %1 : vector<1x64x256xbf16> to vector<64x256xbf16>
    %cst = arith.constant dense<0.000000e+00> : vector<176x256xf32>
    %3 = tpu.matmul %0, %2, %cst {dimension_numbers = #tpu.dot_dimension_numbers<[1], [0], [0], [1], [0, 0, 1, 1], [], []>} : vector<176x64xbf16>, vector<64x256xbf16>, vector<176x256xf32> -> vector<176x256xf32>
    %c0_4 = arith.constant 0 : index
    %c0_5 = arith.constant 0 : index
    %c0_6 = arith.constant 0 : index
    %4 = vector.load %arg5[%c0_4, %c0_5, %c0_6] : memref<1x1x256xf32, #tpu.memory_space<vmem>>, vector<1x1x256xf32>
    %5 = vector.shape_cast %4 : vector<1x1x256xf32> to vector<1x256xf32>
    %6 = vector.broadcast %5 : vector<1x256xf32> to vector<176x256xf32>
    %7 = arith.mulf %3, %6 : vector<176x256xf32>
    %c0_7 = arith.constant 0 : index
    %c0_8 = arith.constant 0 : index
    %c0_9 = arith.constant 0 : index
    %8 = vector.load %arg6[%c0_7, %c0_8, %c0_9] : memref<1x1x256xf32, #tpu.memory_space<vmem>>, vector<1x1x256xf32>
    %9 = vector.shape_cast %8 : vector<1x1x256xf32> to vector<1x256xf32>
    %10 = vector.broadcast %9 : vector<1x256xf32> to vector<176x256xf32>
    %11 = arith.addf %7, %10 : vector<176x256xf32>
    %cst_10 = arith.constant 0.000000e+00 : f32
    %12 = vector.broadcast %cst_10 : f32 to vector<176x256xf32>
    %13 = arith.maximumf %11, %12 : vector<176x256xf32>
    %c0_11 = arith.constant 0 : index
    %c0_12 = arith.constant 0 : index
    %14 = vector.load %arg3[%c0_11, %c0_12] : memref<176x1xf32, #tpu.memory_space<vmem>>, vector<176x1xf32>
    %15 = vector.broadcast %14 : vector<176x1xf32> to vector<176x256xf32>
    %16 = arith.mulf %13, %15 : vector<176x256xf32>
    %cst_13 = arith.constant 0.000000e+00 : bf16
    %17 = vector.broadcast %cst_13 : bf16 to vector<16x256xbf16>
    %c0_14 = arith.constant 0 : index
    %c0_15 = arith.constant 0 : index
    %18 = vector.load %arg16[%c0_14, %c0_15] : memref<208x256xbf16, #tpu.memory_space<vmem>>, vector<16x256xbf16>
    tpu.vector_store %arg16[%c0_14, %c0_15], %17 {strides = array<i32>} : memref<208x256xbf16, #tpu.memory_space<vmem>>, vector<16x256xbf16>,
    %cst_16 = arith.constant 0.000000e+00 : bf16
    %19 = vector.broadcast %cst_16 : bf16 to vector<16x256xbf16>
    %c192 = arith.constant 192 : index
    %c0_17 = arith.constant 0 : index
    %20 = vector.load %arg16[%c192, %c0_17] : memref<208x256xbf16, #tpu.memory_space<vmem>>, vector<16x256xbf16>
    tpu.vector_store %arg16[%c192, %c0_17], %19 {strides = array<i32>} : memref<208x256xbf16, #tpu.memory_space<vmem>>, vector<16x256xbf16>,
    %21 = arith.truncf %16 : vector<176x256xf32> to vector<176x256xbf16>
    %c16 = arith.constant 16 : index
    %c0_18 = arith.constant 0 : index
    %22 = vector.load %arg16[%c16, %c0_18] : memref<208x256xbf16, #tpu.memory_space<vmem>>, vector<176x256xbf16>
    tpu.vector_store %arg16[%c16, %c0_18], %21 {strides = array<i32>} : memref<208x256xbf16, #tpu.memory_space<vmem>>, vector<176x256xbf16>,
    %c6 = arith.constant 6 : index
    %c0_19 = arith.constant 0 : index
    %23 = vector.load %arg16[%c6, %c0_19] : memref<208x256xbf16, #tpu.memory_space<vmem>>, vector<176x256xbf16>
    %c0_20 = arith.constant 0 : index
    %c0_21 = arith.constant 0 : index
    %24 = vector.load %arg17[%c0_20, %c0_21] : memref<176x2304xbf16, #tpu.memory_space<vmem>>, vector<176x256xbf16>
    tpu.vector_store %arg17[%c0_20, %c0_21], %23 {strides = array<i32>} : memref<176x2304xbf16, #tpu.memory_space<vmem>>, vector<176x256xbf16>,
    %c7 = arith.constant 7 : index
    %c0_22 = arith.constant 0 : index
    %25 = vector.load %arg16[%c7, %c0_22] : memref<208x256xbf16, #tpu.memory_space<vmem>>, vector<176x256xbf16>
    %c0_23 = arith.constant 0 : index
    %c256 = arith.constant 256 : index
    %26 = vector.load %arg17[%c0_23, %c256] : memref<176x2304xbf16, #tpu.memory_space<vmem>>, vector<176x256xbf16>
    tpu.vector_store %arg17[%c0_23, %c256], %25 {strides = array<i32>} : memref<176x2304xbf16, #tpu.memory_space<vmem>>, vector<176x256xbf16>,
    %c8 = arith.constant 8 : index
    %c0_24 = arith.constant 0 : index
    %27 = vector.load %arg16[%c8, %c0_24] : memref<208x256xbf16, #tpu.memory_space<vmem>>, vector<176x256xbf16>
    %c0_25 = arith.constant 0 : index
    %c512 = arith.constant 512 : index
    %28 = vector.load %arg17[%c0_25, %c512] : memref<176x2304xbf16, #tpu.memory_space<vmem>>, vector<176x256xbf16>
    tpu.vector_store %arg17[%c0_25, %c512], %27 {strides = array<i32>} : memref<176x2304xbf16, #tpu.memory_space<vmem>>, vector<176x256xbf16>,
    %c15 = arith.constant 15 : index
    %c0_26 = arith.constant 0 : index
    %29 = vector.load %arg16[%c15, %c0_26] : memref<208x256xbf16, #tpu.memory_space<vmem>>, vector<176x256xbf16>
    %c0_27 = arith.constant 0 : index
    %c768 = arith.constant 768 : index
    %30 = vector.load %arg17[%c0_27, %c768] : memref<176x2304xbf16, #tpu.memory_space<vmem>>, vector<176x256xbf16>
    tpu.vector_store %arg17[%c0_27, %c768], %29 {strides = array<i32>} : memref<176x2304xbf16, #tpu.memory_space<vmem>>, vector<176x256xbf16>,
    %c16_28 = arith.constant 16 : index
    %c0_29 = arith.constant 0 : index
    %31 = vector.load %arg16[%c16_28, %c0_29] : memref<208x256xbf16, #tpu.memory_space<vmem>>, vector<176x256xbf16>
    %c0_30 = arith.constant 0 : index
    %c1024 = arith.constant 1024 : index
    %32 = vector.load %arg17[%c0_30, %c1024] : memref<176x2304xbf16, #tpu.memory_space<vmem>>, vector<176x256xbf16>
    tpu.vector_store %arg17[%c0_30, %c1024], %31 {strides = array<i32>} : memref<176x2304xbf16, #tpu.memory_space<vmem>>, vector<176x256xbf16>,
    %c17 = arith.constant 17 : index
    %c0_31 = arith.constant 0 : index
    %33 = vector.load %arg16[%c17, %c0_31] : memref<208x256xbf16, #tpu.memory_space<vmem>>, vector<176x256xbf16>
    %c0_32 = arith.constant 0 : index
    %c1280 = arith.constant 1280 : index
    %34 = vector.load %arg17[%c0_32, %c1280] : memref<176x2304xbf16, #tpu.memory_space<vmem>>, vector<176x256xbf16>
    tpu.vector_store %arg17[%c0_32, %c1280], %33 {strides = array<i32>} : memref<176x2304xbf16, #tpu.memory_space<vmem>>, vector<176x256xbf16>,
    %c24 = arith.constant 24 : index
    %c0_33 = arith.constant 0 : index
    %35 = vector.load %arg16[%c24, %c0_33] : memref<208x256xbf16, #tpu.memory_space<vmem>>, vector<176x256xbf16>
    %c0_34 = arith.constant 0 : index
    %c1536 = arith.constant 1536 : index
    %36 = vector.load %arg17[%c0_34, %c1536] : memref<176x2304xbf16, #tpu.memory_space<vmem>>, vector<176x256xbf16>
    tpu.vector_store %arg17[%c0_34, %c1536], %35 {strides = array<i32>} : memref<176x2304xbf16, #tpu.memory_space<vmem>>, vector<176x256xbf16>,
    %c25 = arith.constant 25 : index
    %c0_35 = arith.constant 0 : index
    %37 = vector.load %arg16[%c25, %c0_35] : memref<208x256xbf16, #tpu.memory_space<vmem>>, vector<176x256xbf16>
    %c0_36 = arith.constant 0 : index
    %c1792 = arith.constant 1792 : index
    %38 = vector.load %arg17[%c0_36, %c1792] : memref<176x2304xbf16, #tpu.memory_space<vmem>>, vector<176x256xbf16>
    tpu.vector_store %arg17[%c0_36, %c1792], %37 {strides = array<i32>} : memref<176x2304xbf16, #tpu.memory_space<vmem>>, vector<176x256xbf16>,
    %c26 = arith.constant 26 : index
    %c0_37 = arith.constant 0 : index
    %39 = vector.load %arg16[%c26, %c0_37] : memref<208x256xbf16, #tpu.memory_space<vmem>>, vector<176x256xbf16>
    %c0_38 = arith.constant 0 : index
    %c2048 = arith.constant 2048 : index
    %40 = vector.load %arg17[%c0_38, %c2048] : memref<176x2304xbf16, #tpu.memory_space<vmem>>, vector<176x256xbf16>
    tpu.vector_store %arg17[%c0_38, %c2048], %39 {strides = array<i32>} : memref<176x2304xbf16, #tpu.memory_space<vmem>>, vector<176x256xbf16>,
    %c0_39 = arith.constant 0 : index
    %c0_40 = arith.constant 0 : index
    %41 = vector.load %arg17[%c0_39, %c0_40] : memref<176x2304xbf16, #tpu.memory_space<vmem>>, vector<176x2304xbf16>
    %c0_41 = arith.constant 0 : index
    %c0_42 = arith.constant 0 : index
    %c0_43 = arith.constant 0 : index
    %42 = vector.load %arg7[%c0_41, %c0_42, %c0_43] : memref<1x2304x256xbf16, #tpu.memory_space<vmem>>, vector<1x2304x256xbf16>
    %43 = vector.shape_cast %42 : vector<1x2304x256xbf16> to vector<2304x256xbf16>
    %cst_44 = arith.constant dense<0.000000e+00> : vector<176x256xf32>
    %44 = tpu.matmul %41, %43, %cst_44 {dimension_numbers = #tpu.dot_dimension_numbers<[1], [0], [0], [1], [0, 0, 1, 1], [], []>} : vector<176x2304xbf16>, vector<2304x256xbf16>, vector<176x256xf32> -> vector<176x256xf32>
    %c0_45 = arith.constant 0 : index
    %c0_46 = arith.constant 0 : index
    %c0_47 = arith.constant 0 : index
    %45 = vector.load %arg8[%c0_45, %c0_46, %c0_47] : memref<1x1x256xf32, #tpu.memory_space<vmem>>, vector<1x1x256xf32>
    %46 = vector.shape_cast %45 : vector<1x1x256xf32> to vector<1x256xf32>
    %47 = vector.broadcast %46 : vector<1x256xf32> to vector<176x256xf32>
    %48 = arith.mulf %44, %47 : vector<176x256xf32>
    %c0_48 = arith.constant 0 : index
    %c0_49 = arith.constant 0 : index
    %c0_50 = arith.constant 0 : index
    %49 = vector.load %arg9[%c0_48, %c0_49, %c0_50] : memref<1x1x256xf32, #tpu.memory_space<vmem>>, vector<1x1x256xf32>
    %50 = vector.shape_cast %49 : vector<1x1x256xf32> to vector<1x256xf32>
    %51 = vector.broadcast %50 : vector<1x256xf32> to vector<176x256xf32>
    %52 = arith.addf %48, %51 : vector<176x256xf32>
    %cst_51 = arith.constant 0.000000e+00 : f32
    %53 = vector.broadcast %cst_51 : f32 to vector<176x256xf32>
    %54 = arith.maximumf %52, %53 : vector<176x256xf32>
    %55 = arith.truncf %54 : vector<176x256xf32> to vector<176x256xbf16>
    %c0_52 = arith.constant 0 : index
    %c0_53 = arith.constant 0 : index
    %c0_54 = arith.constant 0 : index
    %56 = vector.load %arg10[%c0_52, %c0_53, %c0_54] : memref<1x256x256xbf16, #tpu.memory_space<vmem>>, vector<1x256x256xbf16>
    %57 = vector.shape_cast %56 : vector<1x256x256xbf16> to vector<256x256xbf16>
    %cst_55 = arith.constant dense<0.000000e+00> : vector<176x256xf32>
    %58 = tpu.matmul %55, %57, %cst_55 {dimension_numbers = #tpu.dot_dimension_numbers<[1], [0], [0], [1], [0, 0, 1, 1], [], []>} : vector<176x256xbf16>, vector<256x256xbf16>, vector<176x256xf32> -> vector<176x256xf32>
    %c0_56 = arith.constant 0 : index
    %c0_57 = arith.constant 0 : index
    %c0_58 = arith.constant 0 : index
    %59 = vector.load %arg11[%c0_56, %c0_57, %c0_58] : memref<1x1x256xf32, #tpu.memory_space<vmem>>, vector<1x1x256xf32>
    %60 = vector.shape_cast %59 : vector<1x1x256xf32> to vector<1x256xf32>
    %61 = vector.broadcast %60 : vector<1x256xf32> to vector<176x256xf32>
    %62 = arith.mulf %58, %61 : vector<176x256xf32>
    %c0_59 = arith.constant 0 : index
    %c0_60 = arith.constant 0 : index
    %c0_61 = arith.constant 0 : index
    %63 = vector.load %arg12[%c0_59, %c0_60, %c0_61] : memref<1x1x256xf32, #tpu.memory_space<vmem>>, vector<1x1x256xf32>
    %64 = vector.shape_cast %63 : vector<1x1x256xf32> to vector<1x256xf32>
    %65 = vector.broadcast %64 : vector<1x256xf32> to vector<176x256xf32>
    %66 = arith.addf %62, %65 : vector<176x256xf32>
    %cst_62 = arith.constant 0.000000e+00 : f32
    %67 = vector.broadcast %cst_62 : f32 to vector<176x256xf32>
    %68 = arith.maximumf %66, %67 : vector<176x256xf32>
    %c0_63 = arith.constant 0 : index
    %c0_64 = arith.constant 0 : index
    %69 = vector.load %arg2[%c0_63, %c0_64] : memref<2x176xbf16, #tpu.memory_space<vmem>>, vector<2x176xbf16>
    %70 = arith.truncf %68 : vector<176x256xf32> to vector<176x256xbf16>
    %cst_65 = arith.constant dense<0.000000e+00> : vector<2x256xf32>
    %71 = tpu.matmul %69, %70, %cst_65 {dimension_numbers = #tpu.dot_dimension_numbers<[1], [0], [0], [1], [0, 0, 1, 1], [], []>} : vector<2x176xbf16>, vector<176x256xbf16>, vector<2x256xf32> -> vector<2x256xf32>
    %72 = arith.truncf %71 : vector<2x256xf32> to vector<2x256xbf16>
    %c0_66 = arith.constant 0 : index
    %c0_67 = arith.constant 0 : index
    %c0_68 = arith.constant 0 : index
    %73 = vector.load %arg13[%c0_66, %c0_67, %c0_68] : memref<1x256x128xbf16, #tpu.memory_space<vmem>>, vector<1x256x128xbf16>
    %74 = vector.shape_cast %73 : vector<1x256x128xbf16> to vector<256x128xbf16>
    %cst_69 = arith.constant dense<0.000000e+00> : vector<2x128xf32>
    %75 = tpu.matmul %72, %74, %cst_69 {dimension_numbers = #tpu.dot_dimension_numbers<[1], [0], [0], [1], [0, 0, 1, 1], [], []>} : vector<2x256xbf16>, vector<256x128xbf16>, vector<2x128xf32> -> vector<2x128xf32>
    %c0_70 = arith.constant 0 : index
    %c0_71 = arith.constant 0 : index
    %c0_72 = arith.constant 0 : index
    %76 = vector.load %arg14[%c0_70, %c0_71, %c0_72] : memref<1x1x128xf32, #tpu.memory_space<vmem>>, vector<1x1x128xf32>
    %77 = vector.shape_cast %76 : vector<1x1x128xf32> to vector<1x128xf32>
    %78 = vector.broadcast %77 : vector<1x128xf32> to vector<2x128xf32>
    %79 = arith.addf %75, %78 : vector<2x128xf32>
    %c0_73 = arith.constant 0 : index
    %c0_74 = arith.constant 0 : index
    %c0_75 = arith.constant 0 : index
    %80 = vector.load %arg15[%c0_73, %c0_74, %c0_75] : memref<1x2x128xf32, #tpu.memory_space<vmem>>, vector<1x2x128xf32>
    %81 = vector.shape_cast %80 : vector<1x2x128xf32> to vector<2x128xf32>
    %82 = vector.shape_cast %79 : vector<2x128xf32> to vector<1x2x128xf32>
    tpu.vector_store %arg15[%c0_73, %c0_74, %c0_75], %82 {strides = array<i32>} : memref<1x2x128xf32, #tpu.memory_space<vmem>>, vector<1x2x128xf32>,
    return
  }
  func.func @transform_0(%arg0: i32) -> (i32, i32) {
    %c0_i32 = arith.constant 0 : i32
    %c0_i32_0 = arith.constant 0 : i32
    %c0_i32_1 = arith.constant 0 : i32
    return %c0_i32, %c0_i32_0 : i32, i32
  }
  func.func @transform_1(%arg0: i32) -> (i32, i32) {
    %c0_i32 = arith.constant 0 : i32
    %c0_i32_0 = arith.constant 0 : i32
    %c0_i32_1 = arith.constant 0 : i32
    return %c0_i32, %c0_i32_0 : i32, i32
  }
  func.func @transform_2(%arg0: i32) -> (i32, i32) {
    %c0_i32 = arith.constant 0 : i32
    %c0_i32_0 = arith.constant 0 : i32
    %c0_i32_1 = arith.constant 0 : i32
    return %c0_i32, %c0_i32_0 : i32, i32
  }
  func.func @transform_3(%arg0: i32) -> (i32, i32, i32) {
    %c0_i32 = arith.constant 0 : i32
    %c0_i32_0 = arith.constant 0 : i32
    %c0_i32_1 = arith.constant 0 : i32
    return %arg0, %c0_i32, %c0_i32_0 : i32, i32, i32
  }
  func.func @transform_4(%arg0: i32) -> (i32, i32, i32) {
    %c0_i32 = arith.constant 0 : i32
    %c0_i32_0 = arith.constant 0 : i32
    %c0_i32_1 = arith.constant 0 : i32
    return %arg0, %c0_i32, %c0_i32_0 : i32, i32, i32
  }
  func.func @transform_5(%arg0: i32) -> (i32, i32, i32) {
    %c0_i32 = arith.constant 0 : i32
    %c0_i32_0 = arith.constant 0 : i32
    %c0_i32_1 = arith.constant 0 : i32
    return %arg0, %c0_i32, %c0_i32_0 : i32, i32, i32
  }
  func.func @transform_6(%arg0: i32) -> (i32, i32, i32) {
    %c0_i32 = arith.constant 0 : i32
    %c0_i32_0 = arith.constant 0 : i32
    %c0_i32_1 = arith.constant 0 : i32
    return %arg0, %c0_i32, %c0_i32_0 : i32, i32, i32
  }
  func.func @transform_7(%arg0: i32) -> (i32, i32, i32) {
    %c0_i32 = arith.constant 0 : i32
    %c0_i32_0 = arith.constant 0 : i32
    %c0_i32_1 = arith.constant 0 : i32
    return %arg0, %c0_i32, %c0_i32_0 : i32, i32, i32
  }
  func.func @transform_8(%arg0: i32) -> (i32, i32, i32) {
    %c0_i32 = arith.constant 0 : i32
    %c0_i32_0 = arith.constant 0 : i32
    %c0_i32_1 = arith.constant 0 : i32
    return %arg0, %c0_i32, %c0_i32_0 : i32, i32, i32
  }
  func.func @transform_9(%arg0: i32) -> (i32, i32, i32) {
    %c0_i32 = arith.constant 0 : i32
    %c0_i32_0 = arith.constant 0 : i32
    %c0_i32_1 = arith.constant 0 : i32
    return %arg0, %c0_i32, %c0_i32_0 : i32, i32, i32
  }
  func.func @transform_10(%arg0: i32) -> (i32, i32, i32) {
    %c0_i32 = arith.constant 0 : i32
    %c0_i32_0 = arith.constant 0 : i32
    %c0_i32_1 = arith.constant 0 : i32
    return %arg0, %c0_i32, %c0_i32_0 : i32, i32, i32
  }
  func.func @transform_11(%arg0: i32) -> (i32, i32, i32) {
    %c0_i32 = arith.constant 0 : i32
    %c0_i32_0 = arith.constant 0 : i32
    %c0_i32_1 = arith.constant 0 : i32
    return %arg0, %c0_i32, %c0_i32_0 : i32, i32, i32
  }
  func.func @transform_12(%arg0: i32) -> (i32, i32, i32) {
    %c0_i32 = arith.constant 0 : i32
    %c0_i32_0 = arith.constant 0 : i32
    %c0_i32_1 = arith.constant 0 : i32
    return %arg0, %c0_i32, %c0_i32_0 : i32, i32, i32
  }
  func.func @transform_13(%arg0: i32) -> (i32, i32, i32) {
    %c0_i32 = arith.constant 0 : i32
    %c0_i32_0 = arith.constant 0 : i32
    %c0_i32_1 = arith.constant 0 : i32
    return %arg0, %c0_i32, %c0_i32_0 : i32, i32, i32
  }
  func.func @transform_14(%arg0: i32) -> (i32, i32, i32) {
    %c0_i32 = arith.constant 0 : i32
    %c0_i32_0 = arith.constant 0 : i32
    %c0_i32_1 = arith.constant 0 : i32
    return %arg0, %c0_i32, %c0_i32_0 : i32, i32, i32
  }
}

</mosaic_0001>

<bundles_post_ra>
// kernel: mfsan_forward.1
= control target key start
LH: loop header
LB: loop body
LE: loop exit
PB: predicated region body
PF: predicated region fallthrough
CT: control target
= control target key end

     0   :  { %s8768_s29 = smov 0   ;;  %s10989_s0 = inlined_call_operand.vmem [shape: bf16[176,64], index: 0, kind: input, shape index: {}]   ;;  %s10990_s1 = inlined_call_operand.vmem [shape: bf16[2,176], index: 1, kind: input, shape index: {}]   ;;  %s10991_s2 = inlined_call_operand.vmem [shape: f32[176,1], index: 2, kind: input, shape index: {}]   ;;  %s10992_s3 = inlined_call_operand.vmem [shape: bf16[2,64,256], index: 3, kind: input, shape index: {}]   ;;  %s10993_s4 = inlined_call_operand.vmem [shape: f32[2,1,256], index: 4, kind: input, shape index: {}]   ;;  %s10994_s5 = inlined_call_operand.vmem [shape: f32[2,1,256], index: 5, kind: input, shape index: {}]   ;;  %s10995_s6 = inlined_call_operand.vmem [shape: bf16[2,2304,256], index: 6, kind: input, shape index: {}]   ;;  %s10996_s7 = inlined_call_operand.vmem [shape: f32[2,1,256], index: 7, kind: input, shape index: {}]   ;;  %s10997_s8 = inlined_call_operand.vmem [shape: f32[2,1,256], index: 8, kind: input, shape index: {}]   ;;  %s10998_s9 = inlined_call_operand.vmem [shape: bf16[2,256,256], index: 9, kind: input, shape index: {}]   ;;  %s10999_s10 = inlined_call_operand.vmem [shape: f32[2,1,256], index: 10, kind: input, shape index: {}]   ;;  %s11000_s11 = inlined_call_operand.vmem [shape: f32[2,1,256], index: 11, kind: input, shape index: {}]   ;;  %s11001_s12 = inlined_call_operand.vmem [shape: bf16[2,256,128], index: 12, kind: input, shape index: {}]   ;;  %s11002_s13 = inlined_call_operand.vmem [shape: f32[2,1,128], index: 13, kind: input, shape index: {}]   ;;  %s11003_s14 = inlined_call_operand.vmem [shape: f32[2,2,128], index: 14, kind: output, shape index: {}]  }
   0x1 LB: > { %s7318_s30 = sadd.s32 4294967295, %s8689_s29   ;;  %p7322_p0 = scmp.ge.s32.totalorder %s8689_s29, 1  ;;  %s8689_s29 = sphi %s8768_s29, %s24_s29  }
   0x2   : > { %p504_p1 = scmp.lt.s32.totalorder %s8689_s29, 3 }
   0x4   : > { %p505_p2 = pnand %p7322_p0, %p504_p1 }
   0x6   : > { %508 = sbr.rel (%p505_p2) target bundleno = 1680 (0x690), region = 76 }
   0xd   : > { %p591_p3 = scmp.lt.s32.totalorder %s7318_s30, 1  ;;  %v8691_v0 = vmov 0   ;;  %v1107_v8 = vld [vmem:[%s10991_s2 + $0x30] sm:$0xff]  ;;  %v1105_v9 = vld [vmem:[%s10991_s2 + $0x20] sm:$0xff]  ;;  %v1108_v11 = vld [vmem:[%s10991_s2 + $0x38] sm:$0xff]  ;;  %vm768_vm0 = vcmask 523264  }
   0xe   : > { %834 = vmatprep.mubr.bf16.mxu0 %v8691_v0  ;;  %1277 = vst [vmem:[#allocation2] sm:$0xff] %v8691_v0  ;;  %1278 = vst [vmem:[#allocation2 + $0x8] sm:$0xff] %v8691_v0  ;;  %8128 = vset.pattern.permute.xlu0 %v8691_v0  ;;  %v1106_v12 = vld [vmem:[%s10991_s2 + $0x28] sm:$0xff]  ;;  %v8142_v13 = vld [vmem:[%s10989_s0] sm:$0xff]   ;;  %vm1373_vm1 = vcmask 1044480   ;;  %vm1795_vm5 = vcmask 1043456  }
   0xf   : > { %1279 = vst [vmem:[#allocation2 + $0xc0] sm:$0xff] %v8691_v0  ;;  %1280 = vst [vmem:[#allocation2 + $0xc8] sm:$0xff] %v8691_v0  ;;  %s11193_s30 = smov (!%p591_p3, %s7318_s30), 1  ;;  %8129 = vset.pattern.permute.xlu1 %v8691_v0  ;;  %1155 = vperm.xlu0 %8128, %v1107_v8   ;;  %v1109_v14 = vld [vmem:[%s10991_s2 + $0x40] sm:$0xff]  ;;  %v1110_v15 = vld [vmem:[%s10991_s2 + $0x48] sm:$0xff]  ;;  %vm2905_vm7 = vcmask 1042432  }
  0x10   : > { %s7708_s15 = sshll.u32 %s11193_s30, 6  ;;  %1145 = vperm.xlu1 %8129, %v1105_v9   ;;  %s8117_s27 = smul.u32 2304, %s11193_s30  ;;  %v1111_v16 = vld [vmem:[%s10991_s2 + $0x50] sm:$0xff]  ;;  %v8143_v17 = vld [vmem:[%s10989_s0 + $0x8] sm:$0xff]   ;;  %v1112_v18 = vld [vmem:[%s10991_s2 + $0x58] sm:$0xff]  ;;  %vm6925_vm8 = vcmask 392192  }
  0x11   : > { %s595_s18 = scalar_lea.vmem %s10992_s3, %s7708_s15  ;;  %v1113_v21 = vld [vmem:[%s10991_s2 + $0x60] sm:$0xff]  ;;  %v1114_v23 = vld [vmem:[%s10991_s2 + $0x68] sm:$0xff]  ;;  %v1115_v26 = vld [vmem:[%s10991_s2 + $0x70] sm:$0xff]  ;;  %s7709_s23 = sshll.u32 %s11193_s30, 8  ;;  %vm1910_vm2 = vsmask.f32 256 }
  0x12   : > { %v8130_v1 = vld [vmem:[%s595_s18 + $0x4] ss:$8 sps:$4 sm:$0xff]   ;;  %v8132_v2 = vld [vmem:[%s595_s18] ss:$8 sps:$4 sm:$0xff]   ;;  %v8133_v3 = vld [vmem:[%s595_s18 + $0x14] ss:$8 sps:$4 sm:$0xff]   ;;  %s8814_s22 = scalar_lea.vmem %s10995_s6, %s8117_s27  ;;  %s8980_s26 = scalar_lea.vmem %s10998_s9, %s7709_s23 }
  0x13   : > { %802 = vmatprep.subr.bf16.mxu0 %v8130_v1  ;;  %v8135_v4 = vld [vmem:[%s595_s18 + $0x10] ss:$8 sps:$4 sm:$0xff]   ;;  %v8136_v5 = vld [vmem:[%s595_s18 + $0x24] ss:$8 sps:$4 sm:$0xff]   ;;  %v8138_v6 = vld [vmem:[%s595_s18 + $0x20] ss:$8 sps:$4 sm:$0xff]   ;;  %1160 = vperm.xlu0 %8128, %v1108_v11   ;;  %s637_s15 = scalar_lea.vmem %s11002_s13, %s11193_s30 }
  0x14   : > { %803 = vmatpush1.bf16.msra.mxu0 %v8132_v2  ;;  %v8139_v7 = vld [vmem:[%s595_s18 + $0x34] ss:$8 sps:$4 sm:$0xff]   ;;  %v8141_v10 = vld [vmem:[%s595_s18 + $0x30] ss:$8 sps:$4 sm:$0xff]   ;;  %1150 = vperm.xlu1 %8129, %v1106_v12   ;;  %v8153_v19 = vld [vmem:[%s8814_s22] ss:$8 sps:$4 sm:$0xff]  }
  0x15   : > { %804 = vmatprep.subr.bf16.mxu0 %v8133_v3  ;;  %v8155_v20 = vld [vmem:[%s8814_s22 + $0x4] ss:$8 sps:$4 sm:$0xff]   ;;  %v8158_v22 = vld [vmem:[%s8814_s22 + $0x14] ss:$8 sps:$4 sm:$0xff]   ;;  %v8156_v24 = vld [vmem:[%s8814_s22 + $0x10] ss:$8 sps:$4 sm:$0xff]  }
  0x16   : > { %v8161_v25 = vld [vmem:[%s8814_s22 + $0x24] ss:$8 sps:$4 sm:$0xff]   ;;  %v1116_v27 = vld [vmem:[%s10991_s2 + $0x78] sm:$0xff]  ;;  %v8144_v28 = vld [vmem:[%s10989_s0 + $0x10] sm:$0xff]   ;;  %s7710_s27 = sshll.u32 %s11193_s30, 7  ;;  %s9020_s17 = sshll.u32 %s11193_s30, 1 }
  0x17   : > { %1165 = vperm.xlu0 %8128, %v1109_v14   ;;  %v8159_v29 = vld [vmem:[%s8814_s22 + $0x20] ss:$8 sps:$4 sm:$0xff]   ;;  %v8164_v31 = vld [vmem:[%s8814_s22 + $0x34] ss:$8 sps:$4 sm:$0xff]   ;;  %v8162_v33 = vld [vmem:[%s8814_s22 + $0x30] ss:$8 sps:$4 sm:$0xff]   ;;  %s8991_s16 = scalar_lea.vmem %s11001_s12, %s7710_s27  ;;  %s599_s20 = scalar_lea.vmem %s10993_s4, %s9020_s17 }
  0x18   : > { %805 = vmatpush1.bf16.msra.mxu0 %v8135_v4  ;;  %1170 = vperm.xlu1 %8129, %v1110_v15   ;;  %v1117_v30 = vld [vmem:[%s10991_s2 + $0x80] sm:$0xff]  ;;  %v1118_v32 = vld [vmem:[%s10991_s2 + $0x88] sm:$0xff]  ;;  %v1119_v36 = vld [vmem:[%s10991_s2 + $0x90] sm:$0xff]  ;;  %s603_s24 = scalar_lea.vmem %s10994_s5, %s9020_s17  ;;  %vm1488_vm3 = vsmask.f32 4352  ;;  %s612_s27 = scalar_lea.vmem %s10996_s7, %s9020_s17 }
  0x19   : > { %806 = vmatprep.subr.bf16.mxu0 %v8136_v5  ;;  %v8177_v34 = vld [vmem:[%s8814_s22 + $0x304] ss:$8 sps:$4 sm:$0xff]   ;;  %v8179_v35 = vld [vmem:[%s8814_s22 + $0x300] ss:$8 sps:$4 sm:$0xff]   ;;  %v1120_v38 = vld [vmem:[%s10991_s2 + $0x98] sm:$0xff]  ;;  %s616_s18 = scalar_lea.vmem %s10997_s8, %s9020_s17  ;;  %s625_s23 = scalar_lea.vmem %s10999_s10, %s9020_s17 }
  0x1a   : > { %v8167_v37 = vld [vmem:[%s8814_s22 + $0x44] ss:$8 sps:$4 sm:$0xff]   ;;  %7733 = vmatprep.subr.bf16.mxu1 %v8177_v34  ;;  %v8165_v39 = vld [vmem:[%s8814_s22 + $0x40] ss:$8 sps:$4 sm:$0xff]   ;;  %v8183_v40 = vld [vmem:[%s8814_s22 + $0x314] ss:$8 sps:$4 sm:$0xff]   ;;  %s629_s25 = scalar_lea.vmem %s11000_s11, %s9020_s17 }
  0x1b   : > { %1175 = vperm.xlu0 %8128, %v1111_v16   ;;  %v8185_v41 = vld [vmem:[%s8814_s22 + $0x310] ss:$8 sps:$4 sm:$0xff]   ;;  %7749 = vmatpush1.bf16.msra.mxu1 %v8179_v35  ;;  %v1121_v43 = vld [vmem:[%s10991_s2 + $0xa0] sm:$0xff]  ;;  %v8170_v44 = vld [vmem:[%s8814_s22 + $0x54] ss:$8 sps:$4 sm:$0xff]  }
  0x1c   : > { %807 = vmatpush1.bf16.msra.mxu0 %v8138_v6  ;;  %1180 = vperm.xlu1 %8129, %v1112_v18   ;;  %v8145_v42 = vld [vmem:[%s10989_s0 + $0x18] sm:$0xff]   ;;  %v8189_v45 = vld [vmem:[%s8814_s22 + $0x324] ss:$8 sps:$4 sm:$0xff]   ;;  %v8191_v48 = vld [vmem:[%s8814_s22 + $0x320] ss:$8 sps:$4 sm:$0xff]  }
  0x1d   : > { %808 = vmatprep.subr.bf16.mxu0 %v8139_v7  ;;  %7734 = vmatprep.subr.bf16.mxu1 %v8183_v40  ;;  %v1122_v46 = vld [vmem:[%s10991_s2 + $0xa8] sm:$0xff]  ;;  %v8168_v47 = vld [vmem:[%s8814_s22 + $0x50] ss:$8 sps:$4 sm:$0xff]   ;;  %v1101_v50 = vld [vmem:[%s10991_s2] sm:$0xff]  ;;  %vm2207_vm4 = vsmask.f32 7424 }
  0x1e   : > { %v8173_v49 = vld [vmem:[%s8814_s22 + $0x64] ss:$8 sps:$4 sm:$0xff]   ;;  %v8171_v52 = vld [vmem:[%s8814_s22 + $0x60] ss:$8 sps:$4 sm:$0xff]   ;;  %v8176_v53 = vld [vmem:[%s8814_s22 + $0x74] ss:$8 sps:$4 sm:$0xff]  }
  0x1f   : > { %1185 = vperm.xlu0 %8128, %v1113_v21   ;;  %7750 = vmatpush1.bf16.msra.mxu1 %v8185_v41  ;;  %v1102_v51 = vld [vmem:[%s10991_s2 + $0x8] sm:$0xff]  ;;  %v8146_v54 = vld [vmem:[%s10989_s0 + $0x20] sm:$0xff]   ;;  %v1103_v55 = vld [vmem:[%s10991_s2 + $0x10] sm:$0xff]  ;;  %vm2598_vm6 = vsmask.f32 3328 }
  0x20   : > { %809 = vmatpush1.bf16.msra.mxu0 %v8141_v10  ;;  %1190 = vperm.xlu1 %8129, %v1114_v23   ;;  %v1104_v56 = vld [vmem:[%s10991_s2 + $0x18] sm:$0xff]  ;;  %v8182_v58 = vld [vmem:[%s8814_s22 + $0x84] ss:$8 sps:$4 sm:$0xff]   ;;  %v8180_v59 = vld [vmem:[%s8814_s22 + $0x80] ss:$8 sps:$4 sm:$0xff]  }
  0x21   : > { %4922 = vmatprep.subr.bf16.mxu0 %v8155_v20  ;;  %7735 = vmatprep.subr.bf16.mxu1 %v8189_v45  ;;  %v8174_v57 = vld [vmem:[%s8814_s22 + $0x70] ss:$8 sps:$4 sm:$0xff]   ;;  %v8188_v60 = vld [vmem:[%s8814_s22 + $0x94] ss:$8 sps:$4 sm:$0xff]   ;;  %v8147_v61 = vld [vmem:[%s10989_s0 + $0x28] sm:$0xff]  }
  0x22   : > { %v8186_v62 = vld [vmem:[%s8814_s22 + $0x90] ss:$8 sps:$4 sm:$0xff]   ;;  %v8150_v2 = vld [vmem:[%s10989_s0 + $0x40] sm:$0xff]   ;;  %v8151_v3 = vld [vmem:[%s10989_s0 + $0x48] sm:$0xff]  }
  0x23   : > { %7356 = vmatmul.mubr.msk.bf16.vlgmr.msra.gmra.mrb[0].mxu0 %vm768_vm0, %v8142_v13  ;;  %1195 = vperm.xlu0 %8128, %v1115_v26   ;;  %v8148_v63 = vld [vmem:[%s10989_s0 + $0x30] sm:$0xff]   ;;  %v8149_v1 = vld [vmem:[%s10989_s0 + $0x38] sm:$0xff]   ;;  %v8194_v5 = vld [vmem:[%s8814_s22 + $0xa4] ss:$8 sps:$4 sm:$0xff]  }
  0x24   : > { %844 = vmatprep.mubr.bf16.mxu0 %v8691_v0  ;;  %4923 = vmatpush1.bf16.msra.mxu0 %v8153_v19  ;;  %v8152_v4 = vld [vmem:[%s10989_s0 + $0x50] sm:$0xff]   ;;  %v8192_v7 = vld [vmem:[%s8814_s22 + $0xa0] ss:$8 sps:$4 sm:$0xff]   ;;  %v8201_v10 = vld [vmem:[%s8814_s22 + $0x344] ss:$8 sps:$4 sm:$0xff]  }
  0x25   : > { %4924 = vmatprep.subr.bf16.mxu0 %v8158_v22  ;;  %1200 = vperm.xlu1 %8129, %v1116_v27   ;;  %v8195_v6 = vld [vmem:[%s8814_s22 + $0x334] ss:$8 sps:$4 sm:$0xff]   ;;  %v8197_v8 = vld [vmem:[%s8814_s22 + $0x330] ss:$8 sps:$4 sm:$0xff]   ;;  %v8203_v11 = vld [vmem:[%s8814_s22 + $0x340] ss:$8 sps:$4 sm:$0xff]  }
  0x26   : > { %7751 = vmatpush1.bf16.msra.mxu1 %v8191_v48  ;;  %v8200_v9 = vld [vmem:[%s8814_s22 + $0xb4] ss:$8 sps:$4 sm:$0xff]   ;;  %v8206_v12 = vld [vmem:[%s8814_s22 + $0xc4] ss:$8 sps:$4 sm:$0xff]   ;;  %v8204_v14 = vld [vmem:[%s8814_s22 + $0xc0] ss:$8 sps:$4 sm:$0xff]  }
  0x27   : > { %1205 = vperm.xlu0 %8128, %v1117_v30   ;;  %7736 = vmatprep.subr.bf16.mxu1 %v8195_v6  ;;  %v8207_v13 = vld [vmem:[%s8814_s22 + $0x354] ss:$8 sps:$4 sm:$0xff]   ;;  %v8209_v15 = vld [vmem:[%s8814_s22 + $0x350] ss:$8 sps:$4 sm:$0xff]   ;;  %v8215_v19 = vld [vmem:[%s8814_s22 + $0x360] ss:$8 sps:$4 sm:$0xff]  }
  0x28   : > { %4925 = vmatpush1.bf16.msra.mxu0 %v8156_v24  ;;  %v8212_v16 = vld [vmem:[%s8814_s22 + $0xd4] ss:$8 sps:$4 sm:$0xff]   ;;  %v8210_v18 = vld [vmem:[%s8814_s22 + $0xd0] ss:$8 sps:$4 sm:$0xff]   ;;  %v8218_v20 = vld [vmem:[%s8814_s22 + $0xe4] ss:$8 sps:$4 sm:$0xff]  }
  0x29   : > { %4926 = vmatprep.subr.bf16.mxu0 %v8161_v25  ;;  %1210 = vperm.xlu1 %8129, %v1118_v32   ;;  %v8219_v21 = vld [vmem:[%s8814_s22 + $0x374] ss:$8 sps:$4 sm:$0xff]   ;;  %v8216_v22 = vld [vmem:[%s8814_s22 + $0xe0] ss:$8 sps:$4 sm:$0xff]   ;;  %v8221_v23 = vld [vmem:[%s8814_s22 + $0x370] ss:$8 sps:$4 sm:$0xff]  }
  0x2a   : > { %7752 = vmatpush1.bf16.msra.mxu1 %v8197_v8  ;;  %v8224_v24 = vld [vmem:[%s8814_s22 + $0xf4] ss:$8 sps:$4 sm:$0xff]   ;;  %v8225_v25 = vld [vmem:[%s8814_s22 + $0x384] ss:$8 sps:$4 sm:$0xff]   ;;  %v8222_v26 = vld [vmem:[%s8814_s22 + $0xf0] ss:$8 sps:$4 sm:$0xff]  }
  0x2b   : > { %7357 = vmatmul.mubr.msk.bf16.gmra.mrb[4].mxu0 %vm768_vm0, %v8143_v17  ;;  %1215 = vperm.xlu0 %8128, %v1119_v36   ;;  %v8213_v17 = vld [vmem:[%s8814_s22 + $0x364] ss:$8 sps:$4 sm:$0xff]   ;;  %v8227_v27 = vld [vmem:[%s8814_s22 + $0x380] ss:$8 sps:$4 sm:$0xff]   ;;  %v8234_v32 = vld [vmem:[%s8814_s22 + $0x3b4] ss:$8 sps:$4 sm:$0xff]  }
  0x2c   : > { %854 = vmatprep.mubr.bf16.mxu0 %v8691_v0  ;;  %4927 = vmatpush1.bf16.msra.mxu0 %v8159_v29  ;;  %v8230_v29 = vld [vmem:[%s8814_s22 + $0x390] ss:$8 sps:$4 sm:$0xff]   ;;  %v8231_v30 = vld [vmem:[%s8814_s22 + $0x3a4] ss:$8 sps:$4 sm:$0xff]   ;;  %v8239_v35 = vld [vmem:[%s8814_s22 + $0x3c0] ss:$8 sps:$4 sm:$0xff]  }
  0x2d   : > { %4928 = vmatprep.subr.bf16.mxu0 %v8164_v31  ;;  %1220 = vperm.xlu1 %8129, %v1120_v38   ;;  %v8233_v31 = vld [vmem:[%s8814_s22 + $0x3a0] ss:$8 sps:$4 sm:$0xff]   ;;  %v8237_v34 = vld [vmem:[%s8814_s22 + $0x3c4] ss:$8 sps:$4 sm:$0xff]   ;;  %v8240_v36 = vld [vmem:[%s8814_s22 + $0x3d4] ss:$8 sps:$4 sm:$0xff]  }
  0x2e   : > { %7737 = vmatprep.subr.bf16.mxu1 %v8201_v10  ;;  %v8243_v38 = vld [vmem:[%s8814_s22 + $0x3e4] ss:$8 sps:$4 sm:$0xff]   ;;  %v8249_v40 = vld [vmem:[%s8814_s22 + $0x3f4] ss:$8 sps:$4 sm:$0xff]   ;;  %v8251_v41 = vld [vmem:[%s8814_s22 + $0x3f0] ss:$8 sps:$4 sm:$0xff]  }
  0x2f   : > { %1225 = vperm.xlu0 %8128, %v1121_v43   ;;  %7753 = vmatpush1.bf16.msra.mxu1 %v8203_v11  ;;  %v8257_v43 = vld [vmem:[%s8814_s22 + $0x404] ss:$8 sps:$4 sm:$0xff]  }
  0x30   : > { %4929 = vmatpush1.bf16.msra.mxu0 %v8162_v33  ;;  %7738 = vmatprep.subr.bf16.mxu1 %v8207_v13  ;;  %v8236_v33 = vld [vmem:[%s8814_s22 + $0x3b0] ss:$8 sps:$4 sm:$0xff]  }
  0x31   : > { %4930 = vmatprep.subr.bf16.mxu0 %v8167_v37  ;;  %1230 = vperm.xlu1 %8129, %v1122_v46   ;;  %v8242_v37 = vld [vmem:[%s8814_s22 + $0x3d0] ss:$8 sps:$4 sm:$0xff]  }
  0x33   : > { %7358 = vmatmul.mubr.msk.bf16.gmra.mrb[8].mxu0 %vm768_vm0, %v8144_v28  ;;  %1125 = vperm.xlu0 %8128, %v1101_v50   ;;  %v8228_v28 = vld [vmem:[%s8814_s22 + $0x394] ss:$8 sps:$4 sm:$0xff]  }
  0x34   : > { %864 = vmatprep.mubr.bf16.mxu0 %v8691_v0  ;;  %4931 = vmatpush1.bf16.msra.mxu0 %v8165_v39  ;;  %v8245_v39 = vld [vmem:[%s8814_s22 + $0x3e0] ss:$8 sps:$4 sm:$0xff]  }
  0x35   : > { %4932 = vmatprep.subr.bf16.mxu0 %v8170_v44  ;;  %1130 = vperm.xlu1 %8129, %v1102_v51  }
  0x36   : > { %7754 = vmatpush1.bf16.msra.mxu1 %v8209_v15 }
  0x37   : > { %1135 = vperm.xlu0 %8128, %v1103_v55   ;;  %7739 = vmatprep.subr.bf16.mxu1 %v8213_v17 }
  0x38   : > { %4933 = vmatpush1.bf16.msra.mxu0 %v8168_v47 }
  0x39   : > { %4934 = vmatprep.subr.bf16.mxu0 %v8173_v49  ;;  %1140 = vperm.xlu1 %8129, %v1104_v56   ;;  %v947_v56 = vlaneseq }
  0x3a   : > { %7755 = vmatpush1.bf16.msra.mxu1 %v8215_v19 }
  0x3b   : > { %7359 = vmatmul.mubr.msk.bf16.gmra.mrb[12].mxu0 %vm768_vm0, %v8145_v42  ;;  %7740 = vmatprep.subr.bf16.mxu1 %v8219_v21  ;;  %v8248_v42 = vld [vmem:[%s8814_s22 + $0x104] ss:$8 sps:$4 sm:$0xff]  }
  0x3c   : > { %874 = vmatprep.mubr.bf16.mxu0 %v8691_v0  ;;  %4935 = vmatpush1.bf16.msra.mxu0 %v8171_v52 }
  0x3d   : > { %4936 = vmatprep.subr.bf16.mxu0 %v8176_v53 }
  0x3e   : > { %7756 = vmatpush1.bf16.msra.mxu1 %v8221_v23 }
  0x3f   : > { %7741 = vmatprep.subr.bf16.mxu1 %v8225_v25 }
  0x40   : > { %4937 = vmatpush1.bf16.msra.mxu0 %v8174_v57 }
  0x41   : > { %4938 = vmatprep.subr.bf16.mxu0 %v8182_v58 }
  0x42   : > { %7757 = vmatpush1.bf16.msra.mxu1 %v8227_v27 }
  0x43   : > { %7360 = vmatmul.mubr.msk.bf16.gmra.mrb[16].mxu0 %vm768_vm0, %v8146_v54  ;;  %7742 = vmatprep.subr.bf16.mxu1 %v8228_v28 }
  0x44   : > { %884 = vmatprep.mubr.bf16.mxu0 %v8691_v0  ;;  %4939 = vmatpush1.bf16.msra.mxu0 %v8180_v59  ;;  %v9024_v59 = vshrl.u32 %v947_v56, 7 }
  0x45   : > { %4940 = vmatprep.subr.bf16.mxu0 %v8188_v60 }
  0x46   : > { %7758 = vmatpush1.bf16.msra.mxu1 %v8230_v29  ;;  %11041 = vst [vmem:[#allocation4_spill] sm:$0xff] %v9024_v59  ;;  %v9035_v60 = vsub.s32 0, %v9024_v59 }
  0x47   : > { %7743 = vmatprep.subr.bf16.mxu1 %v8231_v30 }
  0x48   : > { %4941 = vmatpush1.bf16.msra.mxu0 %v8186_v62  ;;  %11042 = vst [vmem:[#allocation5_spill] sm:$0xff] %v9035_v60  ;;  %v945_v62 = vld [vmem:[%s599_s20] sm:$0x3] }
  0x49   : > { %4942 = vmatprep.subr.bf16.mxu0 %v8194_v5 }
  0x4a   : > { %7759 = vmatpush1.bf16.msra.mxu1 %v8233_v31  ;;  %v1326_v31 = vld [vmem:[#allocation2 + $0x8] sm:$0xf8] }
  0x4b   : > { %7361 = vmatmul.mubr.msk.bf16.gmra.mrb[20].mxu0 %vm768_vm0, %v8147_v61  ;;  %7744 = vmatprep.subr.bf16.mxu1 %v8234_v32  ;;  %v1377_v56 = vrot.slane %v1326_v31, 3 }
  0x4c   : > { %894 = vmatprep.mubr.bf16.mxu0 %v8691_v0  ;;  %4943 = vmatpush1.bf16.msra.mxu0 %v8192_v7 }
  0x4d   : > { %4944 = vmatprep.subr.bf16.mxu0 %v8200_v9 }
  0x4e   : > { %7760 = vmatpush1.bf16.msra.mxu1 %v8236_v33 }
  0x4f   : > { %7745 = vmatprep.subr.bf16.mxu1 %v8237_v34 }
  0x52   : > { %7761 = vmatpush1.bf16.msra.mxu1 %v8239_v35 }
  0x53   : > { %7362 = vmatmul.mubr.msk.bf16.gmra.mrb[24].mxu0 %vm768_vm0, %v8148_v63  ;;  %7746 = vmatprep.subr.bf16.mxu1 %v8240_v36  ;;  %v9040_v63 = vsub.s32 1, %v9024_v59  ;;  %v1325_v36 = vld [vmem:[#allocation2] sm:$0xf8] }
  0x54   : > { %904 = vmatprep.mubr.bf16.mxu0 %v8691_v0  ;;  %v8395_v59 = vld [vmem:[%s8814_s22 + $0x584] ss:$8 sps:$4 sm:$0xff]  }
  0x55   : > { %11043 = vst [vmem:[#allocation6_spill] sm:$0xff] %v9040_v63 }
  0x56   : > { %7762 = vmatpush1.bf16.msra.mxu1 %v8242_v37 }
  0x57   : > { %7747 = vmatprep.subr.bf16.mxu1 %v8243_v38 }
  0x5a   : > { %7763 = vmatpush1.bf16.msra.mxu1 %v8245_v39 }
  0x5b   : > { %7363 = vmatmul.mubr.msk.bf16.gmra.mrb[28].mxu0 %vm768_vm0, %v8149_v1  ;;  %7748 = vmatprep.subr.bf16.mxu1 %v8249_v40 }
  0x5c   : > { %914 = vmatprep.mubr.bf16.mxu0 %v8691_v0 }
  0x5e   : > { %7764 = vmatpush1.bf16.msra.mxu1 %v8251_v41 }
  0x5f   : > { %5494 = vmatprep.subr.bf16.mxu1 %v8257_v43 }
  0x63   : > { %7364 = vmatmul.mubr.msk.bf16.gmra.mrb[32].mxu0 %vm768_vm0, %v8150_v2  ;;  %v1001_v2 = vld [vmem:[%s603_s24] sm:$0x3] }
  0x64   : > { %924 = vmatprep.mubr.bf16.mxu0 %v8691_v0  ;;  %v9051_v5 = vrot.slane %v1001_v2, %v9035_v60  ;;  %v9056_v7 = vrot.slane %v1001_v2, %v9040_v63 }
  0x6b   : > { %7365 = vmatmul.mubr.msk.bf16.gmra.mrb[36].mxu0 %vm768_vm0, %v8151_v3  ;;  %v9045_v3 = vrot.slane %v945_v62, %v9035_v60 }
  0x6c   : > { %934 = vmatprep.mubr.bf16.mxu0 %v8691_v0  ;;  %v8198_v0 = vld [vmem:[%s8814_s22 + $0xb0] ss:$8 sps:$4 sm:$0xff]  }
  0x6d   : > { %4945 = vmatpush1.bf16.msra.mxu0 %v8198_v0 }
  0x6e   : > { %4946 = vmatprep.subr.bf16.mxu0 %v8206_v12 }
  0x71   : > { %4947 = vmatpush1.bf16.msra.mxu0 %v8204_v14 }
  0x72   : > { %4948 = vmatprep.subr.bf16.mxu0 %v8212_v16 }
  0x73   : > { %7366 = vmatmul.mubr.msk.bf16.gmra.mrb[40].mxu0 %vm768_vm0, %v8152_v4  ;;  %v9048_v4 = vrot.slane %v945_v62, %v9040_v63 }
  0x75   : > { %4949 = vmatpush1.bf16.msra.mxu0 %v8210_v18 }
  0x76   : > { %4950 = vmatprep.subr.bf16.mxu0 %v8218_v20 }
  0x79   : > { %4951 = vmatpush1.bf16.msra.mxu0 %v8216_v22 }
  0x7a   : > { %4952 = vmatprep.subr.bf16.mxu0 %v8224_v24 }
  0x7d   : > { %4953 = vmatpush1.bf16.msra.mxu0 %v8222_v26 }
  0x7e   : > { %5065 = vmatprep.subr.bf16.mxu0 %v8248_v42 }
  0x8e   : > { %v8993_v44 = vpop.permute.xlu0 %1155 }
  0x8f   : > { %v8995_v45 = vpop.permute.xlu1 %1145 }
  0x92   : > { %v8997_v46 = vpop.permute.xlu0 %1160 }
  0x93   : > { %v8999_v47 = vpop.permute.xlu1 %1150 }
  0x96   : > { %v9001_v48 = vpop.permute.xlu0 %1165 }
  0x97   : > { %v9003_v49 = vpop.permute.xlu1 %1170 }
  0x9a   : > { %v9005_v50 = vpop.permute.xlu0 %1175 }
  0x9b   : > { %v9007_v51 = vpop.permute.xlu1 %1180 }
  0x9e   : > { %v9009_v52 = vpop.permute.xlu0 %1185 }
  0x9f   : > { %v9011_v53 = vpop.permute.xlu1 %1190 }
  0xa2   : > { %v9013_v54 = vpop.permute.xlu0 %1195 }
  0xa4   : > { %v9015_v55 = vpop.permute.xlu1 %1200 }
  0xa6   : > { %v9017_v57 = vpop.permute.xlu0 %1205 }
  0xa8   : > { %v9022_v58 = vpop.permute.xlu1 %1210 }
  0xaa   : > { %v9037_v61 = vpop.permute.xlu0 %1215 }
  0xac   : > { %v9042_v1 = vpop.permute.xlu1 %1220 }
  0xae   : > { %v9053_v6 = vpop.permute.xlu0 %1225 }
  0xb0   : > { %v9058_v9 = vpop.permute.xlu1 %1230 }
  0xb2   : > { %v1126_v22 = vpop.permute.xlu0 %1125 }
  0xb4   : > { %v1131_v23 = vpop.permute.xlu1 %1130 }
  0xf6   : > { %v836_v8 = vpop.f32.mrb[0].mxu0 }
  0xf7   : > { %v957_v10 = vmul.f32 %v9045_v3, %v836_v8  ;;  %v838_v0 = vpop.f32.mrb[1].mxu0  ;;  %v1374_v8 = vrot.slane %v1325_v36, 3 }
  0xf8   : > { %v958_v11 = vmul.f32 %v9048_v4, %v838_v0  ;;  %v840_v12 = vpop.f32.mrb[2].mxu0 }
  0xf9   : > { %v1013_v13 = vadd.f32 %v9051_v5, %v957_v10  ;;  %v959_v14 = vmul.f32 %v9045_v3, %v840_v12  ;;  %v842_v15 = vpop.f32.mrb[3].mxu0 }
  0xfa   : > { %v1014_v16 = vadd.f32 %v9056_v7, %v958_v11  ;;  %v960_v17 = vmul.f32 %v9048_v4, %v842_v15  ;;  %v1136_v11 = vpop.permute.xlu0 %1135 }
  0xfb   : > { %v1057_v18 = vmax.f32 %v1013_v13, 0.0  ;;  %v1015_v19 = vadd.f32 %v9051_v5, %v959_v14  ;;  %v1141_v13 = vpop.permute.xlu1 %1140 }
  0xfc   : > { %v1058_v20 = vmax.f32 %v1014_v16, 0.0  ;;  %v1016_v21 = vadd.f32 %v9056_v7, %v960_v17  ;;  %v8246_v16 = vld [vmem:[%s8814_s22 + $0x100] ss:$8 sps:$4 sm:$0xff]  }
  0xfd   : > { %v1059_v24 = vmax.f32 %v1015_v19, 0.0  ;;  %v1233_v27 = vmul.f32 %v1126_v22, %v1057_v18 }
  0xfe   : > { %v1060_v25 = vmax.f32 %v1016_v21, 0.0  ;;  %v846_v26 = vpop.f32.mrb[4].mxu0  ;;  %v1234_v32 = vmul.f32 %v1126_v22, %v1058_v20  ;;  %v8254_v20 = vld [vmem:[%s8814_s22 + $0x114] ss:$8 sps:$4 sm:$0xff]  }
  0xff   : > { %v1235_v28 = vmul.f32 %v1131_v23, %v1059_v24  ;;  %v961_v29 = vmul.f32 %v9045_v3, %v846_v26  ;;  %v848_v30 = vpop.f32.mrb[5].mxu0 }
 0x100   : > { %v1236_v33 = vmul.f32 %v1131_v23, %v1060_v25  ;;  %v962_v34 = vmul.f32 %v9048_v4, %v848_v30  ;;  %v850_v35 = vpop.f32.mrb[6].mxu0 }
 0x101   : > { %v1281_v37 = vpack.c.bf16 %v1235_v28, %v1233_v27  ;;  %v1017_v38 = vadd.f32 %v9051_v5, %v961_v29  ;;  %v963_v39 = vmul.f32 %v9045_v3, %v850_v35  ;;  %v852_v40 = vpop.f32.mrb[7].mxu0 }
 0x102   : > { %v1282_v41 = vpack.c.bf16 %v1236_v33, %v1234_v32  ;;  %v1018_v42 = vadd.f32 %v9056_v7, %v962_v34  ;;  %v964_v43 = vmul.f32 %v9048_v4, %v852_v40  ;;  %v8252_v34 = vld [vmem:[%s8814_s22 + $0x110] ss:$8 sps:$4 sm:$0xff]  }
 0x103   : > { %1303 = vst [vmem:[#allocation2 + $0x10] sm:$0xff] %v1281_v37  ;;  %v1019_v62 = vadd.f32 %v9051_v5, %v963_v39  ;;  %v1061_v2 = vmax.f32 %v1017_v38, 0.0  ;;  %v1375_v10 = vrot.slane %v1281_v37, 3  ;;  %v8260_v38 = vld [vmem:[%s8814_s22 + $0x124] ss:$8 sps:$4 sm:$0xff]  }
 0x104   : > { %1304 = vst [vmem:[#allocation2 + $0x18] sm:$0xff] %v1282_v41  ;;  %v1020_v0 = vadd.f32 %v9056_v7, %v964_v43  ;;  %v1062_v12 = vmax.f32 %v1018_v42, 0.0  ;;  %v1378_v14 = vrot.slane %v1282_v41, 3 }
 0x105   : > { %v1063_v15 = vmax.f32 %v1019_v62, 0.0  ;;  %v1237_v21 = vmul.f32 %v1136_v11, %v1061_v2  ;;  %v1376_v25 = vsel %vm1373_vm1, %v1374_v8, %v1375_v10  ;;  %v8258_v8 = vld [vmem:[%s8814_s22 + $0x120] ss:$8 sps:$4 sm:$0xff]  }
 0x106   : > { %v1064_v17 = vmax.f32 %v1020_v0, 0.0  ;;  %v856_v18 = vpop.f32.mrb[8].mxu0  ;;  %v1379_v19 = vsel %vm1373_vm1, %v1377_v56, %v1378_v14  ;;  %v1238_v26 = vmul.f32 %v1136_v11, %v1062_v12 }
 0x107   : > { %v1239_v22 = vmul.f32 %v1141_v13, %v1063_v15  ;;  %v965_v23 = vmul.f32 %v9045_v3, %v856_v18  ;;  %v858_v24 = vpop.f32.mrb[9].mxu0  ;;  %4954 = vmatprep.mubr.bf16.mxu0 %v1379_v19 }
 0x108   : > { %v1240_v27 = vmul.f32 %v1141_v13, %v1064_v17  ;;  %v966_v28 = vmul.f32 %v9048_v4, %v858_v24  ;;  %v860_v29 = vpop.f32.mrb[10].mxu0  ;;  %4955 = vmatmul.mubr.bf16.vlgmr.msra.gmra.mrb[44].mxu0 %v1376_v25  ;;  %v8266_v13 = vld [vmem:[%s8814_s22 + $0x134] ss:$8 sps:$4 sm:$0xff]   ;;  %v8264_v25 = vld [vmem:[%s8814_s22 + $0x130] ss:$8 sps:$4 sm:$0xff]  }
 0x109   : > { %v9082_v30 = vpack.c.bf16 %v1239_v22, %v1237_v21  ;;  %v1021_v31 = vadd.f32 %v9051_v5, %v965_v23  ;;  %v967_v32 = vmul.f32 %v9045_v3, %v860_v29  ;;  %v862_v33 = vpop.f32.mrb[11].mxu0  ;;  %5066 = vmatpush1.bf16.msra.mxu0 %v8246_v16 }
 0x10a   : > { %v1284_v35 = vpack.c.bf16 %v1240_v27, %v1238_v26  ;;  %v1022_v36 = vadd.f32 %v9056_v7, %v966_v28  ;;  %v968_v37 = vmul.f32 %v9048_v4, %v862_v33  ;;  %5067 = vmatprep.subr.bf16.mxu0 %v8254_v20  ;;  %v8272_v27 = vld [vmem:[%s8814_s22 + $0x144] ss:$8 sps:$4 sm:$0xff]  }
 0x10b   : > { %1305 = vst [vmem:[#allocation2 + $0x20] sm:$0xff] %v9082_v30  ;;  %v1065_v39 = vmax.f32 %v1021_v31, 0.0  ;;  %v1023_v40 = vadd.f32 %v9051_v5, %v967_v32  ;;  %v1380_v41 = vrot.slane %v9082_v30, 3 }
 0x10c   : > { %1306 = vst [vmem:[#allocation2 + $0x28] sm:$0xff] %v1284_v35  ;;  %v1066_v42 = vmax.f32 %v1022_v36, 0.0  ;;  %v1024_v43 = vadd.f32 %v9056_v7, %v968_v37  ;;  %v1382_v56 = vrot.slane %v1284_v35, 3  ;;  %v8270_v35 = vld [vmem:[%s8814_s22 + $0x140] ss:$8 sps:$4 sm:$0xff]  }
 0x10d   : > { %v1067_v62 = vmax.f32 %v1023_v40, 0.0  ;;  %v1381_v2 = vsel %vm1373_vm1, %v1375_v10, %v1380_v41  ;;  %5068 = vmatpush1.bf16.msra.mxu0 %v8252_v34  ;;  %v1241_v15 = vmul.f32 %v8995_v45, %v1065_v39  ;;  %v8278_v40 = vld [vmem:[%s8814_s22 + $0x154] ss:$8 sps:$4 sm:$0xff]  }
 0x10e   : > { %v1068_v0 = vmax.f32 %v1024_v43, 0.0  ;;  %v866_v11 = vpop.f32.mrb[12].mxu0  ;;  %v1383_v12 = vsel %vm1373_vm1, %v1378_v14, %v1382_v56  ;;  %5069 = vmatprep.subr.bf16.mxu0 %v8260_v38  ;;  %v1242_v10 = vmul.f32 %v8995_v45, %v1066_v42 }
 0x10f   : > { %v1243_v16 = vmul.f32 %v8999_v47, %v1067_v62  ;;  %v969_v17 = vmul.f32 %v9045_v3, %v866_v11  ;;  %v868_v18 = vpop.f32.mrb[13].mxu0  ;;  %4964 = vmatprep.mubr.bf16.mxu0 %v1383_v12 }
 0x110   : > { %v1244_v19 = vmul.f32 %v8999_v47, %v1068_v0  ;;  %v970_v20 = vmul.f32 %v9048_v4, %v868_v18  ;;  %v870_v21 = vpop.f32.mrb[14].mxu0  ;;  %4965 = vmatmul.mubr.bf16.gmra.mrb[48].mxu0 %v1381_v2 }
 0x111   : > { %v9104_v14 = vpack.c.bf16 %v1243_v16, %v1241_v15  ;;  %v1025_v22 = vadd.f32 %v9051_v5, %v969_v17  ;;  %v971_v23 = vmul.f32 %v9045_v3, %v870_v21  ;;  %v872_v24 = vpop.f32.mrb[15].mxu0  ;;  %5070 = vmatpush1.bf16.msra.mxu0 %v8258_v8 }
 0x112   : > { %v9109_v26 = vpack.c.bf16 %v1244_v19, %v1242_v10  ;;  %v1026_v45 = vadd.f32 %v9056_v7, %v970_v20  ;;  %v972_v47 = vmul.f32 %v9048_v4, %v872_v24  ;;  %5071 = vmatprep.subr.bf16.mxu0 %v8266_v13  ;;  %v8284_v20 = vld [vmem:[%s8814_s22 + $0x164] ss:$8 sps:$4 sm:$0xff]  }
 0x113   : > { %1307 = vst [vmem:[#allocation2 + $0x30] sm:$0xff] %v9104_v14  ;;  %v1069_v28 = vmax.f32 %v1025_v22, 0.0  ;;  %v1027_v29 = vadd.f32 %v9051_v5, %v971_v23  ;;  %v1384_v30 = vrot.slane %v9104_v14, 3  ;;  %v1952_v18 = vshrl.u32 %v9104_v14, 16 }
 0x114   : > { %1308 = vst [vmem:[#allocation2 + $0x38] sm:$0xff] %v9109_v26  ;;  %v1070_v31 = vmax.f32 %v1026_v45, 0.0  ;;  %v1028_v32 = vadd.f32 %v9056_v7, %v972_v47  ;;  %v1386_v33 = vrot.slane %v9109_v26, 3  ;;  %v1960_v39 = vshrl.u32 %v9109_v26, 16 }
 0x115   : > { %v1071_v34 = vmax.f32 %v1027_v29, 0.0  ;;  %5072 = vmatpush1.bf16.msra.mxu0 %v8264_v25  ;;  %v1245_v42 = vmul.f32 %v8993_v44, %v1069_v28  ;;  %v1385_v8 = vsel %vm1373_vm1, %v1380_v41, %v1384_v30  ;;  %v8276_v41 = vld [vmem:[%s8814_s22 + $0x150] ss:$8 sps:$4 sm:$0xff]   ;;  %v9156_v29 = vrot.slane %v1952_v18, 7 }
 0x116   : > { %v1072_v36 = vmax.f32 %v1028_v32, 0.0  ;;  %v876_v37 = vpop.f32.mrb[16].mxu0  ;;  %v1387_v38 = vsel %vm1373_vm1, %v1382_v56, %v1386_v33  ;;  %5073 = vmatprep.subr.bf16.mxu0 %v8272_v27  ;;  %v1246_v0 = vmul.f32 %v8993_v44, %v1070_v31  ;;  %v9141_v19 = vrot.slane %v1960_v39, 7  ;;  %v8282_v31 = vld [vmem:[%s8814_s22 + $0x160] ss:$8 sps:$4 sm:$0xff]  }
 0x117   : > { %v1247_v43 = vmul.f32 %v8997_v46, %v1071_v34  ;;  %v973_v62 = vmul.f32 %v9045_v3, %v876_v37  ;;  %v878_v2 = vpop.f32.mrb[17].mxu0  ;;  %4974 = vmatprep.mubr.bf16.mxu0 %v1387_v38  ;;  %11045 = vst [vmem:[#allocation8_spill] sm:$0xff] %v9156_v29  ;;  %v8290_v38 = vld [vmem:[%s8814_s22 + $0x174] ss:$8 sps:$4 sm:$0xff]  }
 0x118   : > { %v1248_v11 = vmul.f32 %v8997_v46, %v1072_v36  ;;  %v974_v56 = vmul.f32 %v9048_v4, %v878_v2  ;;  %v880_v12 = vpop.f32.mrb[18].mxu0  ;;  %4975 = vmatmul.mubr.bf16.gmra.mrb[52].mxu0 %v1385_v8  ;;  %11044 = vst [vmem:[#allocation7_spill] sm:$0xff] %v9141_v19 }
 0x119   : > { %v9131_v13 = vpack.c.bf16 %v1247_v43, %v1245_v42  ;;  %v1029_v15 = vadd.f32 %v9051_v5, %v973_v62  ;;  %v975_v16 = vmul.f32 %v9045_v3, %v880_v12  ;;  %v882_v17 = vpop.f32.mrb[19].mxu0  ;;  %5074 = vmatpush1.bf16.msra.mxu0 %v8270_v35 }
 0x11a   : > { %v9137_v44 = vpack.c.bf16 %v1248_v11, %v1246_v0  ;;  %v1030_v46 = vadd.f32 %v9056_v7, %v974_v56  ;;  %v976_v10 = vmul.f32 %v9048_v4, %v882_v17  ;;  %5075 = vmatprep.subr.bf16.mxu0 %v8278_v40 }
 0x11b   : > { %1309 = vst [vmem:[#allocation2 + $0x40] sm:$0xff] %v9131_v13  ;;  %v1073_v21 = vmax.f32 %v1029_v15, 0.0  ;;  %v1031_v22 = vadd.f32 %v9051_v5, %v975_v16  ;;  %v1388_v14 = vrot.slane %v9131_v13, 3  ;;  %v1968_v23 = vshrl.u32 %v9131_v13, 16 }
 0x11c   : > { %1310 = vst [vmem:[#allocation2 + $0x48] sm:$0xff] %v9137_v44  ;;  %v1074_v24 = vmax.f32 %v1030_v46, 0.0  ;;  %v1032_v25 = vadd.f32 %v9056_v7, %v976_v10  ;;  %v1390_v26 = vrot.slane %v9137_v44, 3  ;;  %v1976_v45 = vshrl.u32 %v9137_v44, 16  ;;  %v8263_v10 = vld [vmem:[%s8814_s22 + $0x414] ss:$8 sps:$4 sm:$0xff]  }
 0x11d   : > { %v1249_v47 = vmul.f32 %v9001_v48, %v1073_v21  ;;  %v1075_v27 = vmax.f32 %v1031_v22, 0.0  ;;  %v1389_v28 = vsel %vm1373_vm1, %v1384_v30, %v1388_v14  ;;  %5076 = vmatpush1.bf16.msra.mxu0 %v8276_v41  ;;  %v1979_v37 = vshll.u32 %v9137_v44, 16 }
 0x11e   : > { %v1076_v32 = vmax.f32 %v1032_v25, 0.0  ;;  %v886_v34 = vpop.f32.mrb[20].mxu0  ;;  %v1391_v35 = vsel %vm1373_vm1, %v1386_v33, %v1390_v26  ;;  %v9162_v36 = vrot.slane %v1976_v45, 7  ;;  %5077 = vmatprep.subr.bf16.mxu0 %v8284_v20  ;;  %v9168_v42 = vrot.slane %v1968_v23, 7  ;;  %v8296_v20 = vld [vmem:[%s8814_s22 + $0x184] ss:$8 sps:$4 sm:$0xff]  }
 0x11f   : > { %v1251_v39 = vmul.f32 %v9003_v49, %v1075_v27  ;;  %v977_v30 = vmul.f32 %v9045_v3, %v886_v34  ;;  %v888_v40 = vpop.f32.mrb[21].mxu0  ;;  %4984 = vmatprep.mubr.bf16.mxu0 %v1391_v35  ;;  %v1971_v43 = vshll.u32 %v9131_v13, 16  ;;  %v1250_v33 = vmul.f32 %v9001_v48, %v1074_v24  ;;  %v8255_v48 = vld [vmem:[%s8814_s22 + $0x400] ss:$8 sps:$4 sm:$0xff]   ;;  %v8261_v34 = vld [vmem:[%s8814_s22 + $0x410] ss:$8 sps:$4 sm:$0xff]  }
 0x120   : > { %v1252_v62 = vmul.f32 %v9003_v49, %v1076_v32  ;;  %v978_v2 = vmul.f32 %v9048_v4, %v888_v40  ;;  %v890_v8 = vpop.f32.mrb[22].mxu0  ;;  %4985 = vmatmul.mubr.bf16.gmra.mrb[56].mxu0 %v1389_v28  ;;  %v1981_v0 = vor.u32 %v1979_v37, %v9162_v36  ;;  %v8288_v49 = vld [vmem:[%s8814_s22 + $0x170] ss:$8 sps:$4 sm:$0xff]   ;;  %v8294_v37 = vld [vmem:[%s8814_s22 + $0x180] ss:$8 sps:$4 sm:$0xff]  }
 0x121   : > { %v9175_v11 = vpack.c.bf16 %v1251_v39, %v1249_v47  ;;  %v1033_v56 = vadd.f32 %v9051_v5, %v977_v30  ;;  %v979_v12 = vmul.f32 %v9045_v3, %v890_v8  ;;  %v892_v15 = vpop.f32.mrb[23].mxu0  ;;  %v1973_v16 = vor.u32 %v1971_v43, %v9168_v42  ;;  %5078 = vmatpush1.bf16.msra.mxu0 %v8282_v31 }
 0x122   : > { %v9182_v17 = vpack.c.bf16 %v1252_v62, %v1250_v33  ;;  %v1034_v18 = vadd.f32 %v9056_v7, %v978_v2  ;;  %v980_v41 = vmul.f32 %v9048_v4, %v892_v15  ;;  %v1982_v46 = vsel %vm1910_vm2, %v9141_v19, %v1981_v0  ;;  %5079 = vmatprep.subr.bf16.mxu0 %v8290_v38  ;;  %v8302_v2 = vld [vmem:[%s8814_s22 + $0x194] ss:$8 sps:$4 sm:$0xff]   ;;  %v8393_v19 = vld [vmem:[%s8814_s22 + $0x580] ss:$8 sps:$4 sm:$0xff]  }
 0x123   : > { %1311 = vst [vmem:[#allocation2 + $0x50] sm:$0xff] %v9175_v11  ;;  %v1077_v21 = vmax.f32 %v1033_v56, 0.0  ;;  %v1035_v22 = vadd.f32 %v9051_v5, %v979_v12  ;;  %5413 = vmatprep.mubr.bf16.mxu1 %v1982_v46  ;;  %v1974_v23 = vsel %vm1910_vm2, %v9156_v29, %v1973_v16  ;;  %v1392_v24 = vrot.slane %v9175_v11, 3 }
 0x124   : > { %1312 = vst [vmem:[#allocation2 + $0x58] sm:$0xff] %v9182_v17  ;;  %v1078_v25 = vmax.f32 %v1034_v18, 0.0  ;;  %v1036_v45 = vadd.f32 %v9056_v7, %v980_v41  ;;  %5414 = vmatmul.mubr.bf16.vlgmr.msra.gmra.mrb[0].mxu1 %v1974_v23  ;;  %v1394_v47 = vrot.slane %v9182_v17, 3  ;;  %v1992_v27 = vshrl.u32 %v9182_v17, 16  ;;  %v8300_v18 = vld [vmem:[%s8814_s22 + $0x190] ss:$8 sps:$4 sm:$0xff]  }
 0x125   : > { %v1253_v28 = vmul.f32 %v9005_v50, %v1077_v21  ;;  %v1079_v31 = vmax.f32 %v1035_v22, 0.0  ;;  %5495 = vmatpush1.bf16.msra.mxu1 %v8255_v48  ;;  %v1393_v32 = vsel %vm1373_vm1, %v1388_v14, %v1392_v24  ;;  %v1995_v35 = vshll.u32 %v9182_v17, 16  ;;  %5080 = vmatpush1.bf16.msra.mxu0 %v8288_v49  ;;  %v8269_v14 = vld [vmem:[%s8814_s22 + $0x424] ss:$8 sps:$4 sm:$0xff]   ;;  %v8275_v21 = vld [vmem:[%s8814_s22 + $0x434] ss:$8 sps:$4 sm:$0xff]  }
 0x126   : > { %v1254_v38 = vmul.f32 %v9005_v50, %v1078_v25  ;;  %v1080_v39 = vmax.f32 %v1036_v45, 0.0  ;;  %v896_v30 = vpop.f32.mrb[24].mxu0  ;;  %v1395_v40 = vsel %vm1373_vm1, %v1390_v26, %v1394_v47  ;;  %5496 = vmatprep.subr.bf16.mxu1 %v8263_v10  ;;  %v9214_v13 = vrot.slane %v1992_v27, 7  ;;  %5081 = vmatprep.subr.bf16.mxu0 %v8296_v20  ;;  %v8308_v27 = vld [vmem:[%s8814_s22 + $0x1a4] ss:$8 sps:$4 sm:$0xff]  }
 0x127   : > { %v1255_v43 = vmul.f32 %v9007_v51, %v1079_v31  ;;  %v981_v33 = vmul.f32 %v9045_v3, %v896_v30  ;;  %v898_v62 = vpop.f32.mrb[25].mxu0  ;;  %4994 = vmatprep.mubr.bf16.mxu0 %v1395_v40  ;;  %v1984_v50 = vshrl.u32 %v9175_v11, 16  ;;  %v1987_v56 = vshll.u32 %v9175_v11, 16  ;;  %v8306_v11 = vld [vmem:[%s8814_s22 + $0x1a0] ss:$8 sps:$4 sm:$0xff]  }
 0x128   : > { %v1256_v44 = vmul.f32 %v9007_v51, %v1080_v39  ;;  %v982_v26 = vmul.f32 %v9048_v4, %v898_v62  ;;  %v900_v8 = vpop.f32.mrb[26].mxu0  ;;  %4995 = vmatmul.mubr.bf16.gmra.mrb[60].mxu0 %v1393_v32  ;;  %v1997_v0 = vor.u32 %v1995_v35, %v9214_v13  ;;  %v8267_v51 = vld [vmem:[%s8814_s22 + $0x420] ss:$8 sps:$4 sm:$0xff]   ;;  %v8281_v39 = vld [vmem:[%s8814_s22 + $0x444] ss:$8 sps:$4 sm:$0xff]  }
 0x129   : > { %v9225_v12 = vpack.c.bf16 %v1255_v43, %v1253_v28  ;;  %v1037_v15 = vadd.f32 %v9051_v5, %v981_v33  ;;  %v983_v16 = vmul.f32 %v9045_v3, %v900_v8  ;;  %v902_v48 = vpop.f32.mrb[27].mxu0  ;;  %5497 = vmatpush1.bf16.msra.mxu1 %v8261_v34  ;;  %v9229_v49 = vrot.slane %v1984_v50, 7  ;;  %5082 = vmatpush1.bf16.msra.mxu0 %v8294_v37 }
 0x12a   : > { %v9233_v41 = vpack.c.bf16 %v1256_v44, %v1254_v38  ;;  %v1038_v46 = vadd.f32 %v9056_v7, %v982_v26  ;;  %v984_v10 = vmul.f32 %v9048_v4, %v902_v48  ;;  %v1998_v20 = vsel %vm1910_vm2, %v9162_v36, %v1997_v0  ;;  %5498 = vmatprep.subr.bf16.mxu1 %v8269_v14  ;;  %v8273_v38 = vld [vmem:[%s8814_s22 + $0x430] ss:$8 sps:$4 sm:$0xff]   ;;  %v8314_v44 = vld [vmem:[%s8814_s22 + $0x1b4] ss:$8 sps:$4 sm:$0xff]  }
 0x12b   : > { %1313 = vst [vmem:[#allocation2 + $0x60] sm:$0xff] %v9225_v12  ;;  %v1081_v22 = vmax.f32 %v1037_v15, 0.0  ;;  %v1039_v23 = vadd.f32 %v9051_v5, %v983_v16  ;;  %5423 = vmatprep.mubr.bf16.mxu1 %v1998_v20  ;;  %v1989_v25 = vor.u32 %v1987_v56, %v9229_v49  ;;  %v1396_v45 = vrot.slane %v9225_v12, 3  ;;  %5083 = vmatprep.subr.bf16.mxu0 %v8302_v2  ;;  %v8287_v20 = vld [vmem:[%s8814_s22 + $0x454] ss:$8 sps:$4 sm:$0xff]  }
 0x12c   : > { %1314 = vst [vmem:[#allocation2 + $0x68] sm:$0xff] %v9233_v41  ;;  %v1082_v28 = vmax.f32 %v1038_v46, 0.0  ;;  %v1040_v36 = vadd.f32 %v9056_v7, %v984_v10  ;;  %v1398_v31 = vrot.slane %v9233_v41, 3  ;;  %v2008_v32 = vshrl.u32 %v9233_v41, 16 }
 0x12d   : > { %v1083_v34 = vmax.f32 %v1039_v23, 0.0  ;;  %v1990_v35 = vsel %vm1910_vm2, %v9168_v42, %v1989_v25  ;;  %5499 = vmatpush1.bf16.msra.mxu1 %v8267_v51  ;;  %v1397_v37 = vsel %vm1373_vm1, %v1392_v24, %v1396_v45  ;;  %5084 = vmatpush1.bf16.msra.mxu0 %v8300_v18  ;;  %v1257_v30 = vmul.f32 %v9009_v52, %v1081_v22  ;;  %v8279_v51 = vld [vmem:[%s8814_s22 + $0x440] ss:$8 sps:$4 sm:$0xff]  }
 0x12e   : > { %v1084_v40 = vmax.f32 %v1040_v36, 0.0  ;;  %v906_v14 = vpop.f32.mrb[28].mxu0  ;;  %5424 = vmatmul.mubr.bf16.gmra.mrb[4].mxu1 %v1990_v35  ;;  %v1399_v42 = vsel %vm1373_vm1, %v1394_v47, %v1398_v31  ;;  %5500 = vmatprep.subr.bf16.mxu1 %v8275_v21  ;;  %v9264_v43 = vrot.slane %v2008_v32, 7  ;;  %v2011_v50 = vshll.u32 %v9233_v41, 16  ;;  %v8312_v21 = vld [vmem:[%s8814_s22 + $0x1b0] ss:$8 sps:$4 sm:$0xff]  }
 0x12f   : > { %v1259_v24 = vmul.f32 %v9011_v53, %v1083_v34  ;;  %v985_v33 = vmul.f32 %v9045_v3, %v906_v14  ;;  %v908_v62 = vpop.f32.mrb[29].mxu0  ;;  %5004 = vmatprep.mubr.bf16.mxu0 %v1399_v42  ;;  %v2000_v2 = vshrl.u32 %v9225_v12, 16  ;;  %5085 = vmatprep.subr.bf16.mxu0 %v8308_v27  ;;  %v1258_v17 = vmul.f32 %v9009_v52, %v1082_v28  ;;  %v8320_v35 = vld [vmem:[%s8814_s22 + $0x1c4] ss:$8 sps:$4 sm:$0xff]  }
 0x130   : > { %v1260_v47 = vmul.f32 %v9011_v53, %v1084_v40  ;;  %v986_v26 = vmul.f32 %v9048_v4, %v908_v62  ;;  %v910_v8 = vpop.f32.mrb[30].mxu0  ;;  %5005 = vmatmul.mubr.bf16.gmra.mrb[64].mxu0 %v1397_v37  ;;  %v2003_v0 = vshll.u32 %v9225_v12, 16  ;;  %v2013_v52 = vor.u32 %v2011_v50, %v9264_v43  ;;  %v8293_v12 = vld [vmem:[%s8814_s22 + $0x464] ss:$8 sps:$4 sm:$0xff]  }
 0x131   : > { %v9276_v56 = vpack.c.bf16 %v1259_v24, %v1257_v30  ;;  %v1041_v15 = vadd.f32 %v9051_v5, %v985_v33  ;;  %v987_v16 = vmul.f32 %v9045_v3, %v910_v8  ;;  %v912_v48 = vpop.f32.mrb[31].mxu0  ;;  %5501 = vmatpush1.bf16.msra.mxu1 %v8273_v38  ;;  %v9286_v10 = vrot.slane %v2000_v2, 7  ;;  %5086 = vmatpush1.bf16.msra.mxu0 %v8306_v11  ;;  %v8326_v2 = vld [vmem:[%s8814_s22 + $0x1d4] ss:$8 sps:$4 sm:$0xff]  }
 0x132   : > { %v9282_v53 = vpack.c.bf16 %v1260_v47, %v1258_v17  ;;  %v1042_v18 = vadd.f32 %v9056_v7, %v986_v26  ;;  %v988_v46 = vmul.f32 %v9048_v4, %v912_v48  ;;  %5502 = vmatprep.subr.bf16.mxu1 %v8281_v39  ;;  %v2014_v25 = vsel %vm1910_vm2, %v9214_v13, %v2013_v52  ;;  %v8285_v39 = vld [vmem:[%s8814_s22 + $0x450] ss:$8 sps:$4 sm:$0xff]  }
 0x133   : > { %1315 = vst [vmem:[#allocation2 + $0x70] sm:$0xff] %v9276_v56  ;;  %v1085_v22 = vmax.f32 %v1041_v15, 0.0  ;;  %v1043_v23 = vadd.f32 %v9051_v5, %v987_v16  ;;  %v1400_v27 = vrot.slane %v9276_v56, 3  ;;  %5087 = vmatprep.subr.bf16.mxu0 %v8314_v44  ;;  %5433 = vmatprep.mubr.bf16.mxu1 %v2014_v25  ;;  %v2005_v32 = vor.u32 %v2003_v0, %v9286_v10  ;;  %v8291_v16 = vld [vmem:[%s8814_s22 + $0x460] ss:$8 sps:$4 sm:$0xff]  }
 0x134   : > { %1316 = vst [vmem:[#allocation2 + $0x78] sm:$0xff] %v9282_v53  ;;  %v1086_v28 = vmax.f32 %v1042_v18, 0.0  ;;  %v1044_v36 = vadd.f32 %v9056_v7, %v988_v46  ;;  %v1402_v34 = vrot.slane %v9282_v53, 3  ;;  %v2024_v30 = vshrl.u32 %v9282_v53, 16  ;;  %v8299_v46 = vld [vmem:[%s8814_s22 + $0x474] ss:$8 sps:$4 sm:$0xff]  }
 0x135   : > { %v1261_v37 = vmul.f32 %v9013_v54, %v1085_v22  ;;  %v1087_v38 = vmax.f32 %v1043_v23, 0.0  ;;  %5503 = vmatpush1.bf16.msra.mxu1 %v8279_v51  ;;  %v1401_v13 = vsel %vm1373_vm1, %v1396_v45, %v1400_v27  ;;  %v2006_v11 = vsel %vm1910_vm2, %v9229_v49, %v2005_v32  ;;  %5088 = vmatpush1.bf16.msra.mxu0 %v8312_v21  ;;  %v8318_v45 = vld [vmem:[%s8814_s22 + $0x1c0] ss:$8 sps:$4 sm:$0xff]  }
 0x136   : > { %v1262_v40 = vmul.f32 %v9013_v54, %v1086_v28  ;;  %v1088_v14 = vmax.f32 %v1044_v36, 0.0  ;;  %v916_v42 = vpop.f32.mrb[32].mxu0  ;;  %v1403_v24 = vsel %vm1373_vm1, %v1398_v31, %v1402_v34  ;;  %5504 = vmatprep.subr.bf16.mxu1 %v8287_v20  ;;  %5434 = vmatmul.mubr.bf16.gmra.mrb[8].mxu1 %v2006_v11  ;;  %v9320_v50 = vrot.slane %v2024_v30, 7  ;;  %v8324_v20 = vld [vmem:[%s8814_s22 + $0x1d0] ss:$8 sps:$4 sm:$0xff]  }
 0x137   : > { %v1263_v33 = vmul.f32 %v9015_v55, %v1087_v38  ;;  %v989_v54 = vmul.f32 %v9045_v3, %v916_v42  ;;  %v918_v62 = vpop.f32.mrb[33].mxu0  ;;  %5014 = vmatprep.mubr.bf16.mxu0 %v1403_v24  ;;  %v2027_v49 = vshll.u32 %v9282_v53, 16  ;;  %v2016_v17 = vshrl.u32 %v9276_v56, 16  ;;  %5089 = vmatprep.subr.bf16.mxu0 %v8320_v35 }
 0x138   : > { %v1264_v41 = vmul.f32 %v9015_v55, %v1088_v14  ;;  %v990_v31 = vmul.f32 %v9048_v4, %v918_v62  ;;  %v920_v44 = vpop.f32.mrb[34].mxu0  ;;  %5015 = vmatmul.mubr.bf16.gmra.mrb[68].mxu0 %v1401_v13  ;;  %v2019_v47 = vshll.u32 %v9276_v56, 16  ;;  %v8305_v56 = vld [vmem:[%s8814_s22 + $0x484] ss:$8 sps:$4 sm:$0xff]  }
 0x139   : > { %v9328_v26 = vpack.c.bf16 %v1263_v33, %v1261_v37  ;;  %v1045_v8 = vadd.f32 %v9051_v5, %v989_v54  ;;  %v991_v0 = vmul.f32 %v9045_v3, %v920_v44  ;;  %v922_v15 = vpop.f32.mrb[35].mxu0  ;;  %5505 = vmatpush1.bf16.msra.mxu1 %v8285_v39  ;;  %v2029_v55 = vor.u32 %v2027_v49, %v9320_v50  ;;  %v8332_v37 = vld [vmem:[%s8814_s22 + $0x1e4] ss:$8 sps:$4 sm:$0xff]   ;;  %v8297_v39 = vld [vmem:[%s8814_s22 + $0x470] ss:$8 sps:$4 sm:$0xff]  }
 0x13a   : > { %v9334_v48 = vpack.c.bf16 %v1264_v41, %v1262_v40  ;;  %v1046_v52 = vadd.f32 %v9056_v7, %v990_v31  ;;  %v992_v51 = vmul.f32 %v9048_v4, %v922_v15  ;;  %v9338_v18 = vrot.slane %v2016_v17, 7  ;;  %5506 = vmatprep.subr.bf16.mxu1 %v8293_v12  ;;  %5090 = vmatpush1.bf16.msra.mxu0 %v8318_v45  ;;  %v8338_v54 = vld [vmem:[%s8814_s22 + $0x1f4] ss:$8 sps:$4 sm:$0xff]  }
 0x13b   : > { %1317 = vst [vmem:[#allocation2 + $0x80] sm:$0xff] %v9328_v26  ;;  %v1089_v21 = vmax.f32 %v1045_v8, 0.0  ;;  %v1047_v22 = vadd.f32 %v9051_v5, %v991_v0  ;;  %v2030_v23 = vsel %vm1910_vm2, %v9264_v43, %v2029_v55  ;;  %v1404_v25 = vrot.slane %v9328_v26, 3  ;;  %5091 = vmatprep.subr.bf16.mxu0 %v8326_v2 }
 0x13c   : > { %1318 = vst [vmem:[#allocation2 + $0x88] sm:$0xff] %v9334_v48  ;;  %v1090_v28 = vmax.f32 %v1046_v52, 0.0  ;;  %v1048_v36 = vadd.f32 %v9056_v7, %v992_v51  ;;  %5443 = vmatprep.mubr.bf16.mxu1 %v2030_v23  ;;  %v2021_v32 = vor.u32 %v2019_v47, %v9338_v18  ;;  %v1406_v35 = vrot.slane %v9334_v48, 3  ;;  %v8303_v47 = vld [vmem:[%s8814_s22 + $0x480] ss:$8 sps:$4 sm:$0xff]  }
 0x13d   : > { %v1265_v38 = vmul.f32 %v9017_v57, %v1089_v21  ;;  %v1091_v13 = vmax.f32 %v1047_v22, 0.0  ;;  %5507 = vmatpush1.bf16.msra.mxu1 %v8291_v16  ;;  %v1405_v43 = vsel %vm1373_vm1, %v1400_v27, %v1404_v25  ;;  %v2040_v30 = vshrl.u32 %v9334_v48, 16  ;;  %v8330_v27 = vld [vmem:[%s8814_s22 + $0x1e0] ss:$8 sps:$4 sm:$0xff]   ;;  %v8311_v16 = vld [vmem:[%s8814_s22 + $0x494] ss:$8 sps:$4 sm:$0xff]  }
 0x13e   : > { %v1266_v40 = vmul.f32 %v9017_v57, %v1090_v28  ;;  %v1092_v14 = vmax.f32 %v1048_v36, 0.0  ;;  %v926_v42 = vpop.f32.mrb[36].mxu0  ;;  %v2022_v11 = vsel %vm1910_vm2, %v9286_v10, %v2021_v32  ;;  %v1407_v24 = vsel %vm1373_vm1, %v1402_v34, %v1406_v35  ;;  %5508 = vmatprep.subr.bf16.mxu1 %v8299_v46  ;;  %5092 = vmatpush1.bf16.msra.mxu0 %v8324_v20  ;;  %v8336_v52 = vld [vmem:[%s8814_s22 + $0x1f0] ss:$8 sps:$4 sm:$0xff]   ;;  %v8356_v32 = vld [vmem:[%s8814_s22 + $0x204] ss:$8 sps:$4 sm:$0xff]  }
 0x13f   : > { %v1267_v12 = vmul.f32 %v9022_v58, %v1091_v13  ;;  %v993_v57 = vmul.f32 %v9045_v3, %v926_v42  ;;  %v928_v45 = vpop.f32.mrb[37].mxu0  ;;  %5444 = vmatmul.mubr.bf16.gmra.mrb[12].mxu1 %v2022_v11  ;;  %5024 = vmatprep.mubr.bf16.mxu0 %v1407_v24  ;;  %v9372_v33 = vrot.slane %v2040_v30, 7  ;;  %v2043_v10 = vshll.u32 %v9334_v48, 16  ;;  %v8309_v13 = vld [vmem:[%s8814_s22 + $0x490] ss:$8 sps:$4 sm:$0xff]  }
 0x140   : > { %v1268_v53 = vmul.f32 %v9022_v58, %v1092_v14  ;;  %v994_v34 = vmul.f32 %v9048_v4, %v928_v45  ;;  %v930_v62 = vpop.f32.mrb[38].mxu0  ;;  %5025 = vmatmul.mubr.bf16.gmra.mrb[72].mxu0 %v1405_v43  ;;  %v2032_v49 = vshrl.u32 %v9328_v26, 16  ;;  %v2035_v2 = vshll.u32 %v9328_v26, 16  ;;  %5093 = vmatprep.subr.bf16.mxu0 %v8332_v37  ;;  %v8317_v26 = vld [vmem:[%s8814_s22 + $0x4a4] ss:$8 sps:$4 sm:$0xff]  }
 0x141   : > { %v9380_v41 = vpack.c.bf16 %v1267_v12, %v1265_v38  ;;  %v1049_v31 = vadd.f32 %v9051_v5, %v993_v57  ;;  %v995_v44 = vmul.f32 %v9045_v3, %v930_v62  ;;  %v932_v17 = vpop.f32.mrb[39].mxu0  ;;  %5509 = vmatpush1.bf16.msra.mxu1 %v8297_v39  ;;  %v2045_v58 = vor.u32 %v2043_v10, %v9372_v33 }
 0x142   : > { %v9386_v8 = vpack.c.bf16 %v1268_v53, %v1266_v40  ;;  %v1050_v0 = vadd.f32 %v9056_v7, %v994_v34  ;;  %v996_v15 = vmul.f32 %v9048_v4, %v932_v17  ;;  %v9390_v55 = vrot.slane %v2032_v49, 7  ;;  %5510 = vmatprep.subr.bf16.mxu1 %v8305_v56  ;;  %5094 = vmatpush1.bf16.msra.mxu0 %v8330_v27  ;;  %v8315_v53 = vld [vmem:[%s8814_s22 + $0x4a0] ss:$8 sps:$4 sm:$0xff]  }
 0x143   : > { %1319 = vst [vmem:[#allocation2 + $0x90] sm:$0xff] %v9380_v41  ;;  %v1093_v51 = vmax.f32 %v1049_v31, 0.0  ;;  %v1051_v46 = vadd.f32 %v9051_v5, %v995_v44  ;;  %v2046_v20 = vsel %vm1910_vm2, %v9320_v50, %v2045_v58  ;;  %v1408_v21 = vrot.slane %v9380_v41, 3  ;;  %5095 = vmatprep.subr.bf16.mxu0 %v8338_v54  ;;  %v8323_v31 = vld [vmem:[%s8814_s22 + $0x4b4] ss:$8 sps:$4 sm:$0xff]  }
 0x144   : > { %1320 = vst [vmem:[#allocation2 + $0x98] sm:$0xff] %v9386_v8  ;;  %v1094_v22 = vmax.f32 %v1050_v0, 0.0  ;;  %v1052_v23 = vadd.f32 %v9056_v7, %v996_v15  ;;  %5453 = vmatprep.mubr.bf16.mxu1 %v2046_v20  ;;  %v2037_v28 = vor.u32 %v2035_v2, %v9390_v55  ;;  %v1410_v36 = vrot.slane %v9386_v8, 3 }
 0x145   : > { %v1269_v37 = vmul.f32 %v9037_v61, %v1093_v51  ;;  %v1095_v38 = vmax.f32 %v1051_v46, 0.0  ;;  %5511 = vmatpush1.bf16.msra.mxu1 %v8303_v47  ;;  %v1409_v50 = vsel %vm1373_vm1, %v1404_v25, %v1408_v21  ;;  %v2056_v43 = vshrl.u32 %v9386_v8, 16 }
 0x146   : > { %v1270_v39 = vmul.f32 %v9037_v61, %v1094_v22  ;;  %v1096_v30 = vmax.f32 %v1052_v23, 0.0  ;;  %v936_v40 = vpop.f32.mrb[40].mxu0  ;;  %v2038_v14 = vsel %vm1910_vm2, %v9338_v18, %v2037_v28  ;;  %v1411_v42 = vsel %vm1373_vm1, %v1406_v35, %v1410_v36  ;;  %5512 = vmatprep.subr.bf16.mxu1 %v8311_v16  ;;  %5096 = vmatpush1.bf16.msra.mxu0 %v8336_v52  ;;  %v8329_v22 = vld [vmem:[%s8814_s22 + $0x4c4] ss:$8 sps:$4 sm:$0xff]  }
 0x147   : > { %v1271_v25 = vmul.f32 %v9042_v1, %v1095_v38  ;;  %v997_v11 = vmul.f32 %v9045_v3, %v936_v40  ;;  %v938_v24 = vpop.f32.mrb[41].mxu0  ;;  %5454 = vmatmul.mubr.bf16.gmra.mrb[16].mxu1 %v2038_v14  ;;  %5034 = vmatprep.mubr.bf16.mxu0 %v1411_v42  ;;  %v9423_v61 = vrot.slane %v2056_v43, 7  ;;  %v2059_v18 = vshll.u32 %v9386_v8, 16  ;;  %v8327_v43 = vld [vmem:[%s8814_s22 + $0x4c0] ss:$8 sps:$4 sm:$0xff]  }
 0x148   : > { %v1272_v56 = vmul.f32 %v9042_v1, %v1096_v30  ;;  %v998_v48 = vmul.f32 %v9048_v4, %v938_v24  ;;  %v940_v35 = vpop.f32.mrb[42].mxu0  ;;  %5035 = vmatmul.mubr.bf16.gmra.mrb[76].mxu0 %v1409_v50  ;;  %v2048_v27 = vshrl.u32 %v9380_v41, 16  ;;  %v2051_v12 = vshll.u32 %v9380_v41, 16  ;;  %5208 = vmatprep.subr.bf16.mxu0 %v8356_v32  ;;  %v8335_v40 = vld [vmem:[%s8814_s22 + $0x4d4] ss:$8 sps:$4 sm:$0xff]  }
 0x149   : > { %v9430_v57 = vpack.c.bf16 %v1271_v25, %v1269_v37  ;;  %v1053_v45 = vadd.f32 %v9051_v5, %v997_v11  ;;  %v999_v10 = vmul.f32 %v9045_v3, %v940_v35  ;;  %v942_v54 = vpop.f32.mrb[43].mxu0  ;;  %5513 = vmatpush1.bf16.msra.mxu1 %v8309_v13  ;;  %v2061_v1 = vor.u32 %v2059_v18, %v9423_v61 }
 0x14a   : > { %v9436_v34 = vpack.c.bf16 %v1272_v56, %v1270_v39  ;;  %v1054_v62 = vadd.f32 %v9056_v7, %v998_v48  ;;  %v1000_v49 = vmul.f32 %v9048_v4, %v942_v54  ;;  %v2050_v2 = vrot.slane %v2048_v27, 7  ;;  %5514 = vmatprep.subr.bf16.mxu1 %v8317_v26  ;;  %v9472_v39 = vld [vmem:[#allocation2 + $0x18] sm:$0xff]  ;;  %v9477_v26 = vld [vmem:[#allocation2 + $0x10] sm:$0xff]  ;;  %v9481_v48 = vld [vmem:[#allocation2 + $0x28] sm:$0xff] }
 0x14b   : > { %1321 = vst [vmem:[#allocation2 + $0xa0] sm:$0xff] %v9430_v57  ;;  %v1097_v44 = vmax.f32 %v1053_v45, 0.0  ;;  %v1055_v3 = vadd.f32 %v9051_v5, %v999_v10  ;;  %v2062_v17 = vsel %vm1910_vm2, %v9372_v33, %v2061_v1  ;;  %v1412_v58 = vrot.slane %v9430_v57, 3  ;;  %v8321_v33 = vld [vmem:[%s8814_s22 + $0x4b0] ss:$8 sps:$4 sm:$0xff]  }
 0x14c   : > { %1322 = vst [vmem:[#allocation2 + $0xa8] sm:$0xff] %v9436_v34  ;;  %v1098_v47 = vmax.f32 %v1054_v62, 0.0  ;;  %v1056_v4 = vadd.f32 %v9056_v7, %v1000_v49  ;;  %5463 = vmatprep.mubr.bf16.mxu1 %v2062_v17  ;;  %v2053_v0 = vor.u32 %v2051_v12, %v2050_v2  ;;  %v1414_v15 = vrot.slane %v9436_v34, 3 }
 0x14d   : > { %v1099_v16 = vmax.f32 %v1055_v3, 0.0  ;;  %5515 = vmatpush1.bf16.msra.mxu1 %v8315_v53  ;;  %v1413_v5 = vsel %vm1373_vm1, %v1408_v21, %v1412_v58  ;;  %v2072_v52 = vshrl.u32 %v9436_v34, 16  ;;  %v1273_v51 = vmul.f32 %v9053_v6, %v1097_v44  ;;  %v8341_v53 = vld [vmem:[%s8814_s22 + $0x4e4] ss:$8 sps:$4 sm:$0xff]  }
 0x14e   : > { %v1100_v46 = vmax.f32 %v1056_v4, 0.0  ;;  %v2054_v7 = vsel %vm1910_vm2, %v9390_v55, %v2053_v0  ;;  %v1415_v20 = vsel %vm1373_vm1, %v1410_v36, %v1414_v15  ;;  %5516 = vmatprep.subr.bf16.mxu1 %v8323_v31  ;;  %v2075_v23 = vshll.u32 %v9436_v34, 16  ;;  %v1465_v55 = vld [vmem:[#allocation2 + $0x8] sm:$0xf8]  ;;  %v1464_v36 = vld [vmem:[#allocation2] sm:$0xf8] }
 0x14f   : > { %v1275_v41 = vmul.f32 %v9058_v9, %v1099_v16  ;;  %5464 = vmatmul.mubr.bf16.gmra.mrb[20].mxu1 %v2054_v7  ;;  %5044 = vmatprep.mubr.bf16.mxu0 %v1415_v20  ;;  %v2074_v21 = vrot.slane %v2072_v52, 7  ;;  %v2064_v28 = vshrl.u32 %v9430_v57, 16  ;;  %v1274_v32 = vmul.f32 %v9053_v6, %v1098_v47  ;;  %v8339_v16 = vld [vmem:[%s8814_s22 + $0x4e0] ss:$8 sps:$4 sm:$0xff]   ;;  %v8344_v7 = vld [vmem:[%s8814_s22 + $0x4f4] ss:$8 sps:$4 sm:$0xff]  }
 0x150   : > { %v1276_v8 = vmul.f32 %v9058_v9, %v1100_v46  ;;  %5045 = vmatmul.mubr.bf16.gmra.mrb[80].mxu0 %v1413_v5  ;;  %v2067_v13 = vshll.u32 %v9430_v57, 16  ;;  %v1507_v14 = vshrl.u32 %v1465_v55, 16  ;;  %v1490_v25 = vshrl.u32 %v1464_v36, 16  ;;  %v9524_v57 = vld [vmem:[#allocation2 + $0x30] sm:$0xff] }
 0x151   : > { %v1301_v37 = vpack.c.bf16 %v1275_v41, %v1273_v51  ;;  %5517 = vmatpush1.bf16.msra.mxu1 %v8321_v33  ;;  %v2077_v38 = vor.u32 %v2075_v23, %v2074_v21  ;;  %v2066_v50 = vrot.slane %v2064_v28, 7  ;;  %v1510_v11 = vshll.u32 %v1465_v55, 16 }
 0x152   : > { %v1302_v30 = vpack.c.bf16 %v1276_v8, %v1274_v32  ;;  %5518 = vmatprep.subr.bf16.mxu1 %v8329_v22  ;;  %v11007_v24 = vshrl.u32 %v9472_v39, 16  ;;  %v11009_v18 = vshll.u32 %v9472_v39, 16  ;;  %v1493_v45 = vshll.u32 %v1464_v36, 16  ;;  %v8342_v8 = vld [vmem:[%s8814_s22 + $0x4f0] ss:$8 sps:$4 sm:$0xff]  }
 0x153   : > { %1323 = vst [vmem:[#allocation2 + $0xb0] sm:$0xff] %v1301_v37  ;;  %v2078_v6 = vsel %vm1910_vm2, %v9423_v61, %v2077_v38  ;;  %v2069_v9 = vor.u32 %v2067_v13, %v2066_v50  ;;  %v2080_v42 = vshrl.u32 %v1301_v37, 16  ;;  %v8333_v61 = vld [vmem:[%s8814_s22 + $0x4d0] ss:$8 sps:$4 sm:$0xff]   ;;  %v2083_v12 = vshll.u32 %v1301_v37, 16 }
 0x154   : > { %1324 = vst [vmem:[#allocation2 + $0xb8] sm:$0xff] %v1302_v30  ;;  %5473 = vmatprep.mubr.bf16.mxu1 %v2078_v6  ;;  %v2088_v56 = vshrl.u32 %v1302_v30, 16  ;;  %v1509_v10 = vrot.slane %v1507_v14, 3  ;;  %v2091_v1 = vshll.u32 %v1302_v30, 16  ;;  %v11004_v62 = vshrl.u32 %v9477_v26, 16  ;;  %v9518_v30 = vld [vmem:[#allocation2 + $0x20] sm:$0xff] }
 0x155   : > { %v2070_v35 = vsel %vm1910_vm2, %v2050_v2, %v2069_v9  ;;  %5519 = vmatpush1.bf16.msra.mxu1 %v8327_v43  ;;  %v2082_v27 = vrot.slane %v2080_v42, 7  ;;  %v11006_v31 = vshll.u32 %v9477_v26, 16  ;;  %v11005_v2 = vshrl.u32 %v9481_v48, 16  ;;  %v8347_v38 = vld [vmem:[%s8814_s22 + $0x504] ss:$8 sps:$4 sm:$0xff]   ;;  %v9533_v42 = vld [vmem:[#allocation2 + $0x58] sm:$0xff] }
 0x156   : > { %5520 = vmatprep.subr.bf16.mxu1 %v8335_v40  ;;  %v2090_v54 = vrot.slane %v2088_v56, 7  ;;  %v11008_v44 = vshll.u32 %v9481_v48, 16  ;;  %v1512_v3 = vrot.slane %v1510_v11, 4  ;;  %v1517_v17 = vrot.slane %v11007_v24, 3  ;;  %v9520_v40 = vld [vmem:[#allocation2 + $0x38] sm:$0xff]  ;;  %v9531_v9 = vld [vmem:[#allocation2 + $0x40] sm:$0xff] }
 0x157   : > { %5474 = vmatmul.mubr.bf16.gmra.mrb[24].mxu1 %v2070_v35  ;;  %v2085_v49 = vor.u32 %v2083_v12, %v2082_v27  ;;  %v1520_v47 = vrot.slane %v11009_v18, 4  ;;  %v1492_v5 = vrot.slane %v1490_v25, 3  ;;  %v1495_v51 = vrot.slane %v1493_v45, 4  ;;  %v8345_v56 = vld [vmem:[%s8814_s22 + $0x500] ss:$8 sps:$4 sm:$0xff]  }
 0x158   : > { %v2093_v4 = vor.u32 %v2091_v1, %v2090_v54  ;;  %v1500_v46 = vrot.slane %v11004_v62, 3  ;;  %v1503_v41 = vrot.slane %v11006_v31, 4  ;;  %v1535_v23 = vrot.slane %v11005_v2, 3  ;;  %v8350_v27 = vld [vmem:[%s8814_s22 + $0x514] ss:$8 sps:$4 sm:$0xff]   ;;  %v9548_v1 = vld [vmem:[#allocation2 + $0x68] sm:$0xff] }
 0x159   : > { %5521 = vmatpush1.bf16.msra.mxu1 %v8333_v61  ;;  %v2086_v0 = vsel %vm1910_vm2, %v2066_v50, %v2085_v49  ;;  %v1513_v55 = vor.u32 %v1512_v3, %v1509_v10  ;;  %v1521_v32 = vor.u32 %v1520_v47, %v1517_v17  ;;  %v1496_v37 = vor.u32 %v1495_v51, %v1492_v5  ;;  %v9541_v61 = vld [vmem:[#allocation2 + $0x50] sm:$0xff]  ;;  %v8354_v3 = vld [vmem:[%s8814_s22 + $0x200] ss:$8 sps:$4 sm:$0xff]  }
 0x15a   : > { %v1347_v33 = vld [vmem:[#allocation2 + $0xb0] sm:$0x7]  ;;  %v2094_v52 = vsel %vm1910_vm2, %v2074_v21, %v2093_v4  ;;  %5522 = vmatprep.subr.bf16.mxu1 %v8341_v53  ;;  %v1538_v21 = vrot.slane %v11008_v44, 4  ;;  %v9514_v13 = vor.u32 %v1503_v41, %v1500_v46  ;;  %v1527_v14 = vshll.u32 %v9518_v30, 16  ;;  %v8362_v5 = vld [vmem:[%s8814_s22 + $0x214] ss:$8 sps:$4 sm:$0xff]  }
 0x15b   : > { %v1348_v20 = vld [vmem:[#allocation2 + $0xb8] sm:$0x7]  ;;  %v1416_v22 = vrot.slane %v1347_v33, 3  ;;  %5483 = vmatprep.mubr.bf16.mxu1 %v2094_v52  ;;  %v1522_v34 = vsel %vm1488_vm3, %v1513_v55, %v1521_v32  ;;  %v1551_v6 = vshrl.u32 %v9520_v40, 16  ;;  %v1554_v35 = vshll.u32 %v9520_v40, 16 }
 0x15c   : > { %v1418_v28 = vrot.slane %v1348_v20, 3  ;;  %v9516_v43 = vor.u32 %v1538_v21, %v1535_v23  ;;  %v1505_v25 = vsel %vm1488_vm3, %v1496_v37, %v9514_v13  ;;  %v1542_v12 = vshrl.u32 %v9524_v57, 16  ;;  %v9569_v20 = vld [vmem:[#allocation2 + $0x60] sm:$0xff] }
 0x15d   : > { %5523 = vmatpush1.bf16.msra.mxu1 %v8339_v16  ;;  %v1417_v50 = vsel %vm1373_vm1, %v1412_v58, %v1416_v22  ;;  %v9526_v58 = vld [vmem:[#allocation2 + $0x48] sm:$0xff]  ;;  %v1545_v45 = vshll.u32 %v9524_v57, 16  ;;  %v1560_v53 = vshrl.u32 %v9531_v9, 16  ;;  %v1563_v49 = vshll.u32 %v9531_v9, 16  ;;  %v8348_v22 = vld [vmem:[%s8814_s22 + $0x510] ss:$8 sps:$4 sm:$0xff]  }
 0x15e   : > { %v1419_v36 = vsel %vm1373_vm1, %v1414_v15, %v1418_v28  ;;  %5524 = vmatprep.subr.bf16.mxu1 %v8344_v7  ;;  %v1524_v15 = vshrl.u32 %v9518_v30, 16  ;;  %v1540_v11 = vsel %vm1488_vm3, %v1521_v32, %v9516_v43  ;;  %v1569_v10 = vshrl.u32 %v9526_v58, 16  ;;  %v8353_v55 = vld [vmem:[%s8814_s22 + $0x524] ss:$8 sps:$4 sm:$0xff]  }
 0x15f   : > { %5054 = vmatprep.mubr.bf16.mxu0 %v1419_v36  ;;  %5484 = vmatmul.mubr.bf16.gmra.mrb[28].mxu1 %v2086_v0  ;;  %v1572_v54 = vshll.u32 %v9526_v58, 16  ;;  %v1587_v17 = vshrl.u32 %v9533_v42, 16  ;;  %v1590_v47 = vshll.u32 %v9533_v42, 16  ;;  %v1529_v0 = vrot.slane %v1527_v14, 4 }
 0x160   : > { %5055 = vmatmul.mubr.bf16.gmra.mrb[84].mxu0 %v1417_v50  ;;  %5526 = vmatprep.mubr.bf16.mxu1 %v9472_v39  ;;  %v1526_v4 = vrot.slane %v1524_v15, 3  ;;  %v1553_v16 = vrot.slane %v1551_v6, 3  ;;  %v11011_v33 = vshrl.u32 %v9541_v61, 16  ;;  %v1556_v52 = vrot.slane %v1554_v35, 4  ;;  %v8360_v50 = vld [vmem:[%s8814_s22 + $0x210] ss:$8 sps:$4 sm:$0xff]  }
 0x161   : > { %5097 = vmatprep.mubr.bf16.mxu0 %v1522_v34  ;;  %5525 = vmatpush1.bf16.msra.mxu1 %v8342_v8  ;;  %v1581_v51 = vshll.u32 %v9541_v61, 16  ;;  %v11010_v46 = vshrl.u32 %v9548_v1, 16  ;;  %v11012_v7 = vshll.u32 %v9548_v1, 16  ;;  %v1544_v41 = vrot.slane %v1542_v12, 3 }
 0x162   : > { %5637 = vmatprep.subr.bf16.mxu1 %v8347_v38  ;;  %v1547_v23 = vrot.slane %v1545_v45, 4  ;;  %v1571_v21 = vrot.slane %v1569_v10, 3  ;;  %v1574_v28 = vrot.slane %v1572_v54, 4  ;;  %v1562_v32 = vrot.slane %v1560_v53, 3 }
 0x163   : > { %v1565_v8 = vrot.slane %v1563_v49, 4  ;;  %v1589_v36 = vrot.slane %v1587_v17, 3  ;;  %v1592_v37 = vrot.slane %v1590_v47, 4  ;;  %v1530_v38 = vor.u32 %v1529_v0, %v1526_v4  ;;  %v9602_v4 = vld [vmem:[#allocation2 + $0x78] sm:$0xff] }
 0x164   : > { %v1580_v34 = vrot.slane %v11011_v33, 3  ;;  %v1607_v62 = vrot.slane %v11010_v46, 3  ;;  %v1557_v0 = vor.u32 %v1556_v52, %v1553_v16  ;;  %v1548_v2 = vor.u32 %v1547_v23, %v1544_v41  ;;  %v8359_v46 = vld [vmem:[%s8814_s22 + $0x534] ss:$8 sps:$4 sm:$0xff]   ;;  %v8366_v33 = vld [vmem:[%s8814_s22 + $0x220] ss:$8 sps:$4 sm:$0xff]  }
 0x165   : > { %v1575_v31 = vor.u32 %v1574_v28, %v1571_v21  ;;  %v1566_v24 = vor.u32 %v1565_v8, %v1562_v32  ;;  %v1593_v44 = vor.u32 %v1592_v37, %v1589_v36  ;;  %v1531_v18 = vsel %vm1488_vm3, %v9514_v13, %v1530_v38  ;;  %v8371_v41 = vld [vmem:[%s8814_s22 + $0x234] ss:$8 sps:$4 sm:$0xff]   ;;  %v9623_v28 = vld [vmem:[#allocation2 + $0x88] sm:$0xff]  ;;  %v8357_v32 = vld [vmem:[%s8814_s22 + $0x530] ss:$8 sps:$4 sm:$0xff]  }
 0x166   : > { %v11013_v16 = vshrl.u32 %v9602_v4, 16  ;;  %v11015_v23 = vshll.u32 %v9602_v4, 16  ;;  %v9621_v21 = vld [vmem:[#allocation2 + $0x70] sm:$0xff] }
 0x167   : > { %5527 = vmatmul.mubr.bf16.vlgmr.msra.gmra.mrb[32].mxu1 %v9477_v26  ;;  %v1576_v8 = vsel %vm1488_vm3, %v1557_v0, %v1575_v31  ;;  %v9632_v36 = vsel %vm1488_vm3, %v1548_v2, %v1566_v24  ;;  %v9635_v37 = vsel %vm1488_vm3, %v1575_v31, %v1593_v44  ;;  %v9668_v31 = vld [vmem:[#allocation2 + $0xa8] sm:$0xff] }
 0x168   : > { %5098 = vmatmul.mubr.bf16.vlgmr.msra.gmra.mrb[44].mxu0 %v1505_v25  ;;  %5536 = vmatprep.mubr.bf16.mxu1 %v9481_v48  ;;  %v8368_v25 = vld [vmem:[%s8814_s22 + $0x224] ss:$8 sps:$4 sm:$0xff]  }
 0x169   : > { %5107 = vmatprep.mubr.bf16.mxu0 %v1540_v11  ;;  %5638 = vmatpush1.bf16.msra.mxu1 %v8345_v56  ;;  %v11014_v11 = vshrl.u32 %v9569_v20, 16  ;;  %v1583_v56 = vrot.slane %v1581_v51, 4 }
 0x16a   : > { %5639 = vmatprep.subr.bf16.mxu1 %v8350_v27  ;;  %5209 = vmatpush1.bf16.msra.mxu0 %v8354_v3  ;;  %v1610_v27 = vrot.slane %v11012_v7, 4  ;;  %v1599_v3 = vshll.u32 %v9569_v20, 16 }
 0x16b   : > { %5210 = vmatprep.subr.bf16.mxu0 %v8362_v5  ;;  %v8351_v5 = vld [vmem:[%s8814_s22 + $0x520] ss:$8 sps:$4 sm:$0xff]   ;;  %v1598_v7 = vrot.slane %v11014_v11, 3  ;;  %v9613_v52 = vor.u32 %v1583_v56, %v1580_v34  ;;  %v9650_v56 = vld [vmem:[#allocation2 + $0x90] sm:$0xff]  ;;  %v1812_v11 = vrot.slane %v9526_v58, 4 }
 0x16c   : > { %v1601_v13 = vrot.slane %v1599_v3, 4  ;;  %v8374_v34 = vld [vmem:[%s8814_s22 + $0x554] ss:$8 sps:$4 sm:$0xff]  }
 0x16d   : > { %5640 = vmatpush1.bf16.msra.mxu1 %v8348_v22  ;;  %v9615_v22 = vor.u32 %v1610_v27, %v1607_v62  ;;  %v1549_v62 = vsel %vm1488_vm3, %v1530_v38, %v1548_v2  ;;  %v9643_v38 = vrot.slane %v11013_v16, 3  ;;  %v8363_v27 = vld [vmem:[%s8814_s22 + $0x540] ss:$8 sps:$4 sm:$0xff]   ;;  %v2262_v2 = vrot.slane %v1572_v54, 1 }
 0x16e   : > { %5641 = vmatprep.subr.bf16.mxu1 %v8353_v55  ;;  %5211 = vmatpush1.bf16.msra.mxu0 %v8360_v50  ;;  %v1558_v55 = vsel %vm1488_vm3, %v9516_v43, %v1557_v0  ;;  %v8369_v50 = vld [vmem:[%s8814_s22 + $0x230] ss:$8 sps:$4 sm:$0xff]   ;;  %v9639_v43 = vld [vmem:[#allocation2 + $0x80] sm:$0xff]  ;;  %v9661_v0 = vor.u32 %v1601_v13, %v1598_v7  ;;  %v8383_v13 = vld [vmem:[%s8814_s22 + $0x254] ss:$8 sps:$4 sm:$0xff]   ;;  %v11050_v16 = vshll.u32 %v9602_v4, 16 }
 0x16f   : > { %5537 = vmatmul.mubr.bf16.gmra.mrb[36].mxu1 %v9518_v30  ;;  %5212 = vmatprep.subr.bf16.mxu0 %v8368_v25  ;;  %v9648_v25 = vld [vmem:[#allocation2 + $0x98] sm:$0xff] }
 0x170   : > { %5108 = vmatmul.mubr.bf16.gmra.mrb[48].mxu0 %v1531_v18  ;;  %5546 = vmatprep.mubr.bf16.mxu1 %v9520_v40  ;;  %v8365_v18 = vld [vmem:[%s8814_s22 + $0x544] ss:$8 sps:$4 sm:$0xff]   ;;  %v11064_v60 = vshll.u32 %v9648_v25, 16 }
 0x171   : > { %5117 = vmatprep.mubr.bf16.mxu0 %v1558_v55  ;;  %5642 = vmatpush1.bf16.msra.mxu1 %v8351_v5  ;;  %v8377_v5 = vld [vmem:[%s8814_s22 + $0x244] ss:$8 sps:$4 sm:$0xff]   ;;  %v9666_v55 = vrot.slane %v11015_v23, 4 }
 0x172   : > { %5643 = vmatprep.subr.bf16.mxu1 %v8359_v46  ;;  %5213 = vmatpush1.bf16.msra.mxu0 %v8366_v33  ;;  %v9655_v46 = vsel %vm1488_vm3, %v1566_v24, %v9613_v52  ;;  %v9659_v33 = vsel %vm1488_vm3, %v1593_v44, %v9615_v22  ;;  %v9676_v44 = vrot.slane %v1527_v14, 1  ;;  %v9682_v23 = vld [vmem:[#allocation2 + $0xa0] sm:$0xff]  ;;  %v11017_v14 = vrot.slane %v9520_v40, 4 }
 0x173   : > { %5214 = vmatprep.subr.bf16.mxu0 %v8371_v41  ;;  %11046 = vst [vmem:[#allocation9_spill] sm:$0xff] %v9682_v23  ;;  %v8375_v24 = vld [vmem:[%s8814_s22 + $0x240] ss:$8 sps:$4 sm:$0xff]   ;;  %v2278_v41 = vrot.slane %v1590_v47, 1  ;;  %v2342_v29 = vrot.slane %v11064_v60, 1 }
 0x174   : > { %v2234_v7 = vor.u32 %v9676_v44, %v1524_v15 }
 0x175   : > { %5644 = vmatpush1.bf16.msra.mxu1 %v8357_v32  ;;  %v9689_v32 = vrot.slane %v1554_v35, 1  ;;  %v1806_v35 = vrot.slane %v9524_v57, 4  ;;  %v2290_v47 = vor.u32 %v2278_v41, %v1587_v17 }
 0x176   : > { %5645 = vmatprep.subr.bf16.mxu1 %v8365_v18  ;;  %5215 = vmatpush1.bf16.msra.mxu0 %v8369_v50  ;;  %v11016_v18 = vrot.slane %v9518_v30, 4  ;;  %v2238_v50 = vrot.slane %v1545_v45, 1  ;;  %v8372_v45 = vld [vmem:[%s8814_s22 + $0x550] ss:$8 sps:$4 sm:$0xff]  }
 0x177   : > { %5547 = vmatmul.mubr.bf16.gmra.mrb[40].mxu1 %v9524_v57  ;;  %5216 = vmatprep.subr.bf16.mxu0 %v8377_v5  ;;  %v2254_v5 = vrot.slane %v1563_v49, 1  ;;  %v8389_v49 = vld [vmem:[%s8814_s22 + $0x264] ss:$8 sps:$4 sm:$0xff]  }
 0x178   : > { %5118 = vmatmul.mubr.bf16.gmra.mrb[52].mxu0 %v1549_v62  ;;  %5556 = vmatprep.mubr.bf16.mxu1 %v9526_v58  ;;  %v9709_v54 = vsel %vm2207_vm4, %v2234_v7, %v2238_v50  ;;  %v2258_v62 = vor.u32 %v9689_v32, %v1551_v6  ;;  %v9717_v15 = vsel %vm1795_vm5, %v11016_v18, %v1806_v35 }
 0x179   : > { %5127 = vmatprep.mubr.bf16.mxu0 %v1576_v8  ;;  %5646 = vmatpush1.bf16.msra.mxu1 %v8363_v27  ;;  %v8380_v8 = vld [vmem:[%s8814_s22 + $0x564] ss:$8 sps:$4 sm:$0xff]   ;;  %v8381_v27 = vld [vmem:[%s8814_s22 + $0x250] ss:$8 sps:$4 sm:$0xff]   ;;  %v9726_v7 = vsel %vm1795_vm5, %v11017_v14, %v1812_v11  ;;  %v2250_v6 = vor.u32 %v2238_v50, %v1542_v12  ;;  %v2274_v18 = vor.u32 %v2262_v2, %v1569_v10  ;;  %v1816_v14 = vrot.slane %v9533_v42, 4 }
 0x17a   : > { %5647 = vmatprep.subr.bf16.mxu1 %v8374_v34  ;;  %5217 = vmatpush1.bf16.msra.mxu0 %v8375_v24  ;;  %v9736_v34 = vsel %vm2207_vm4, %v2258_v62, %v2262_v2  ;;  %v1810_v24 = vrot.slane %v9531_v9, 4  ;;  %v2266_v57 = vor.u32 %v2254_v5, %v1560_v53  ;;  %v2270_v10 = vrot.slane %v1581_v51, 1  ;;  %v8378_v2 = vld [vmem:[%s8814_s22 + $0x560] ss:$8 sps:$4 sm:$0xff]   ;;  %v8386_v51 = vld [vmem:[%s8814_s22 + $0x574] ss:$8 sps:$4 sm:$0xff]  }
 0x17b   : > { %5218 = vmatprep.subr.bf16.mxu0 %v8383_v13  ;;  %v9743_v58 = vsel %vm2207_vm4, %v2250_v6, %v2254_v5  ;;  %v9746_v12 = vsel %vm2207_vm4, %v2274_v18, %v2278_v41  ;;  %v9757_v53 = vsel %vm1795_vm5, %v1812_v11, %v1816_v14  ;;  %v11047_v50 = vshll.u32 %v9548_v1, 16  ;;  %v8387_v62 = vld [vmem:[%s8814_s22 + $0x260] ss:$8 sps:$4 sm:$0xff]   ;;  %v8392_v6 = vld [vmem:[%s8814_s22 + $0x274] ss:$8 sps:$4 sm:$0xff]  }
 0x17c   : > { %v9754_v13 = vsel %vm1795_vm5, %v1806_v35, %v1810_v24  ;;  %v1814_v18 = vrot.slane %v9541_v61, 4  ;;  %v9765_v17 = vsel %vm2207_vm4, %v2266_v57, %v2270_v10  ;;  %v1820_v41 = vrot.slane %v9548_v1, 4 }
 0x17d   : > { %5648 = vmatpush1.bf16.msra.mxu1 %v8372_v45  ;;  %v2294_v5 = vrot.slane %v11047_v50, 1  ;;  %v11048_v35 = vshrl.u32 %v9541_v61, 16  ;;  %v2286_v11 = vrot.slane %v1599_v3, 1  ;;  %v11049_v57 = vshrl.u32 %v9548_v1, 16 }
 0x17e   : > { %5649 = vmatprep.subr.bf16.mxu1 %v8380_v8  ;;  %5219 = vmatpush1.bf16.msra.mxu0 %v8381_v27  ;;  %v9778_v27 = vsel %vm1795_vm5, %v1810_v24, %v1814_v18  ;;  %v1824_v24 = vrot.slane %v9602_v4, 4 }
 0x17f   : > { %v2282_v45 = vor.u32 %v2270_v10, %v11048_v35  ;;  %5557 = vmatmul.mubr.bf16.gmra.mrb[0].mxu1 %v9531_v9  ;;  %5220 = vmatprep.subr.bf16.mxu0 %v8389_v49  ;;  %v9775_v8 = vsel %vm2207_vm4, %v2290_v47, %v2294_v5  ;;  %v2306_v50 = vor.u32 %v2294_v5, %v11049_v57  ;;  %v2310_v10 = vrot.slane %v11050_v16, 1  ;;  %v8384_v16 = vld [vmem:[%s8814_s22 + $0x570] ss:$8 sps:$4 sm:$0xff]  }
 0x180   : > { %5128 = vmatmul.mubr.bf16.gmra.mrb[56].mxu0 %v9632_v36  ;;  %5566 = vmatprep.mubr.bf16.mxu1 %v9533_v42  ;;  %v9787_v9 = vsel %vm1795_vm5, %v1816_v14, %v1820_v41  ;;  %v1818_v49 = vrot.slane %v9569_v20, 4  ;;  %v11052_v42 = vshrl.u32 %v9569_v20, 16  ;;  %v11053_v14 = vshll.u32 %v9621_v21, 16  ;;  %v8390_v57 = vld [vmem:[%s8814_s22 + $0x270] ss:$8 sps:$4 sm:$0xff]  }
 0x181   : > { %11051 = vst [vmem:[#allocation10_spill] sm:$0xff] %v9787_v9  ;;  %v9790_v3 = vsel %vm2207_vm4, %v2282_v45, %v2286_v11  ;;  %5137 = vmatprep.mubr.bf16.mxu0 %v9635_v37  ;;  %5650 = vmatpush1.bf16.msra.mxu1 %v8378_v2  ;;  %v9797_v36 = vsel %vm2207_vm4, %v2306_v50, %v2310_v10  ;;  %v11054_v35 = vshrl.u32 %v9602_v4, 16  ;;  %v11057_v50 = vshll.u32 %v9623_v28, 16 }
 0x182   : > { %v2298_v47 = vor.u32 %v2286_v11, %v11052_v42  ;;  %v2302_v5 = vrot.slane %v11053_v14, 1  ;;  %5651 = vmatprep.subr.bf16.mxu1 %v8386_v51  ;;  %5221 = vmatpush1.bf16.msra.mxu0 %v8387_v62  ;;  %v9808_v37 = vsel %vm1795_vm5, %v1814_v18, %v1818_v49  ;;  %v9811_v2 = vsel %vm1795_vm5, %v1820_v41, %v1824_v24  ;;  %v8398_v14 = vld [vmem:[%s8814_s22 + $0x284] ss:$8 sps:$4 sm:$0xff]  }
 0x183   : > { %v2322_v45 = vor.u32 %v2310_v10, %v11054_v35  ;;  %11055 = vst [vmem:[#allocation11_spill] sm:$0xff] %v9808_v37  ;;  %11056 = vst [vmem:[#allocation12_spill] sm:$0xff] %v9811_v2  ;;  %v2326_v11 = vrot.slane %v11057_v50, 1  ;;  %v1822_v42 = vrot.slane %v9621_v21, 4  ;;  %5222 = vmatprep.subr.bf16.mxu0 %v8392_v6  ;;  %v1828_v51 = vrot.slane %v9623_v28, 4 }
 0x184   : > { %v9818_v10 = vsel %vm2207_vm4, %v2298_v47, %v2302_v5  ;;  %v11059_v62 = vshrl.u32 %v9621_v21, 16  ;;  %v11060_v41 = vshll.u32 %v9639_v43, 16  ;;  %v11063_v6 = vshrl.u32 %v9623_v28, 16 }
 0x185   : > { %11058 = vst [vmem:[#allocation13_spill] sm:$0xff] %v9818_v10  ;;  %v9826_v63 = vsel %vm2207_vm4, %v2322_v45, %v2326_v11  ;;  %v9829_v50 = vsel %vm1795_vm5, %v1818_v49, %v1822_v42  ;;  %5652 = vmatpush1.bf16.msra.mxu1 %v8384_v16  ;;  %v1826_v45 = vrot.slane %v9639_v43, 4  ;;  %v1832_v49 = vrot.slane %v9648_v25, 4 }
 0x186   : > { %v2314_v18 = vor.u32 %v2302_v5, %v11059_v62  ;;  %v2318_v35 = vrot.slane %v11060_v41, 1  ;;  %11061 = vst [vmem:[#allocation14_spill] sm:$0xff] %v9826_v63  ;;  %11062 = vst [vmem:[#allocation15_spill] sm:$0xff] %v9829_v50  ;;  %v2338_v47 = vor.u32 %v2326_v11, %v11063_v6  ;;  %v9837_v5 = vsel %vm1795_vm5, %v1824_v24, %v1828_v51  ;;  %v8396_v41 = vld [vmem:[%s8814_s22 + $0x280] ss:$8 sps:$4 sm:$0xff]   ;;  %v9846_v6 = vld [vmem:[#allocation2 + $0xb8] sm:$0xff] }
 0x187   : > { %11065 = vst [vmem:[#allocation16_spill] sm:$0xff] %v9837_v5  ;;  %5653 = vmatprep.subr.bf16.mxu1 %v8395_v59  ;;  %5223 = vmatpush1.bf16.msra.mxu0 %v8390_v57  ;;  %v8401_v11 = vld [vmem:[%s8814_s22 + $0x594] ss:$8 sps:$4 sm:$0xff]   ;;  %v11068_v16 = vshrl.u32 %v9639_v43, 16  ;;  %v11069_v5 = vshll.u32 %v9650_v56, 16  ;;  %v11070_v50 = vshrl.u32 %v9648_v25, 16  ;;  %v9860_v57 = vsel %vm1795_vm5, %v1822_v42, %v1826_v45 }
 0x188   : > { %v9840_v62 = vsel %vm2207_vm4, %v2314_v18, %v2318_v35  ;;  %v9849_v60 = vsel %vm2207_vm4, %v2338_v47, %v2342_v29  ;;  %5567 = vmatmul.mubr.bf16.gmra.mrb[4].mxu1 %v9541_v61  ;;  %5224 = vmatprep.subr.bf16.mxu0 %v8398_v14  ;;  %v8404_v59 = vld [vmem:[%s8814_s22 + $0x294] ss:$8 sps:$4 sm:$0xff]   ;;  %11071 = vst [vmem:[#allocation19_spill] sm:$0xff] %v9860_v57  ;;  %v1836_v42 = vrot.slane %v9668_v31, 4  ;;  %v11075_v14 = vshrl.u32 %v9650_v56, 16 }
 0x189   : > { %11066 = vst [vmem:[#allocation17_spill] sm:$0xff] %v9840_v62  ;;  %11067 = vst [vmem:[#allocation18_spill] sm:$0xff] %v9849_v60  ;;  %v2330_v24 = vor.u32 %v2318_v35, %v11068_v16  ;;  %v2334_v18 = vrot.slane %v11069_v5, 1  ;;  %v2354_v62 = vor.u32 %v2342_v29, %v11070_v50  ;;  %v9863_v47 = vsel %vm1795_vm5, %v1828_v51, %v1832_v49  ;;  %v1770_v5 = vld [vmem:[#allocation2 + $0xb8] sm:$0xf]  ;;  %v9870_v29 = vld [vmem:[#allocation2 + $0xb0] sm:$0xff] }
 0x18a   : > { %11072 = vst [vmem:[#allocation20_spill] sm:$0xff] %v9863_v47  ;;  %v11073_v60 = vshll.u32 %v9668_v31, 16  ;;  %v1830_v16 = vrot.slane %v9650_v56, 4  ;;  %5138 = vmatmul.mubr.bf16.gmra.mrb[60].mxu0 %v9655_v46  ;;  %5576 = vmatprep.mubr.bf16.mxu1 %v9548_v1  ;;  %v11076_v50 = vshll.u32 %v9682_v23, 16  ;;  %v8399_v1 = vld [vmem:[%s8814_s22 + $0x590] ss:$8 sps:$4 sm:$0xff]  }
 0x18b   : > { %v9873_v61 = vsel %vm2207_vm4, %v2330_v24, %v2334_v18  ;;  %v2346_v51 = vor.u32 %v2334_v18, %v11075_v14  ;;  %5147 = vmatprep.mubr.bf16.mxu0 %v9659_v33  ;;  %5654 = vmatpush1.bf16.msra.mxu1 %v8393_v19  ;;  %v11079_v24 = vshrl.u32 %v9668_v31, 16  ;;  %v2206_v18 = vld [vmem:[#allocation2 + $0xc8] sm:$0x1]  ;;  %v8402_v14 = vld [vmem:[%s8814_s22 + $0x290] ss:$8 sps:$4 sm:$0xff]   ;;  %v9894_v19 = vsel %vm1795_vm5, %v1832_v49, %v1836_v42 }
 0x18c   : > { %v2358_v35 = vrot.slane %v11073_v60, 1  ;;  %11074 = vst [vmem:[#allocation21_spill] sm:$0xff] %v9873_v61  ;;  %v2350_v60 = vrot.slane %v11076_v50, 1  ;;  %v9886_v47 = vsel %vm1795_vm5, %v1826_v45, %v1830_v16  ;;  %v2372_v61 = vshll.u32 %v9846_v6, 16  ;;  %5225 = vmatpush1.bf16.msra.mxu0 %v8396_v41  ;;  %5655 = vmatprep.subr.bf16.mxu1 %v8401_v11  ;;  %v8407_v50 = vld [vmem:[%s8814_s22 + $0x5a4] ss:$8 sps:$4 sm:$0xff]  }
 0x18d   : > { %11078 = vst [vmem:[#allocation23_spill] sm:$0xff] %v9886_v47  ;;  %11080 = vst [vmem:[#allocation24_spill] sm:$0xff] %v9894_v19  ;;  %v1840_v45 = vrot.slane %v1770_v5, 4  ;;  %5226 = vmatprep.subr.bf16.mxu0 %v8404_v59  ;;  %v11082_v47 = vshrl.u32 %v9682_v23, 16  ;;  %v2364_v11 = vshll.u32 %v9870_v29, 16  ;;  %v1629_v49 = vor.u32 %v9666_v55, %v9643_v38 }
 0x18e   : > { %v9883_v46 = vsel %vm2207_vm4, %v2354_v62, %v2358_v35  ;;  %v2370_v57 = vor.u32 %v2358_v35, %v11079_v24  ;;  %v9897_v33 = vsel %vm2207_vm4, %v2346_v51, %v2350_v60  ;;  %v11025_v62 = vrot.slane %v9682_v23, 4  ;;  %v8410_v35 = vld [vmem:[%s8814_s22 + $0x2a4] ss:$8 sps:$4 sm:$0xff]  }
 0x18f   : > { %11077 = vst [vmem:[#allocation22_spill] sm:$0xff] %v9883_v46  ;;  %11081 = vst [vmem:[#allocation25_spill] sm:$0xff] %v9897_v33  ;;  %v2374_v24 = vrot.slane %v2372_v61, 1  ;;  %v2362_v41 = vor.u32 %v2350_v60, %v11082_v47  ;;  %v2384_v46 = vshrl.u32 %v9846_v6, 16  ;;  %v9913_v59 = vsel %vm1795_vm5, %v1836_v42, %v1840_v45  ;;  %v2205_v61 = vld [vmem:[#allocation2 + $0xc0] sm:$0x1]  ;;  %5656 = vmatpush1.bf16.msra.mxu1 %v8399_v1 }
 0x190   : > { %v9910_v51 = vsel %vm1795_vm5, %v1830_v16, %v11025_v62  ;;  %11084 = vst [vmem:[#allocation27_spill] sm:$0xff] %v9913_v59  ;;  %v2388_v5 = vshll.u32 %v2206_v18, 16  ;;  %v8405_v47 = vld [vmem:[%s8814_s22 + $0x5a0] ss:$8 sps:$4 sm:$0xff]   ;;  %v2366_v33 = vrot.slane %v2364_v11, 1  ;;  %v11086_v38 = vshrl.u32 %v9621_v21, 16  ;;  %5227 = vmatpush1.bf16.msra.mxu0 %v8402_v14  ;;  %5657 = vmatprep.subr.bf16.mxu1 %v8407_v50 }
 0x191   : > { %11083 = vst [vmem:[#allocation26_spill] sm:$0xff] %v9910_v51  ;;  %v8408_v60 = vld [vmem:[%s8814_s22 + $0x2a0] ss:$8 sps:$4 sm:$0xff]   ;;  %v9918_v19 = vsel %vm2207_vm4, %v2370_v57, %v2374_v24  ;;  %v2386_v2 = vor.u32 %v2384_v46, %v2374_v24  ;;  %v11087_v16 = vshll.u32 %v9621_v21, 16  ;;  %v8416_v42 = vld [vmem:[%s8814_s22 + $0x5b4] ss:$8 sps:$4 sm:$0xff]   ;;  %v1603_v57 = vsel %vm1488_vm3, %v9613_v52, %v9661_v0  ;;  %5577 = vmatmul.mubr.bf16.gmra.mrb[8].mxu1 %v9569_v20 }
 0x192   : > { %11085 = vst [vmem:[#allocation28_spill] sm:$0xff] %v9918_v19  ;;  %v1616_v55 = vrot.slane %v11086_v38, 3  ;;  %v2390_v18 = vrot.slane %v2388_v5, 1  ;;  %v2376_v1 = vshrl.u32 %v9870_v29, 16  ;;  %v11088_v46 = vshrl.u32 %v9623_v28, 16  ;;  %5228 = vmatprep.subr.bf16.mxu0 %v8410_v35  ;;  %5148 = vmatmul.mubr.bf16.gmra.mrb[64].mxu0 %v1603_v57 }
 0x193   : > { %v1619_v62 = vrot.slane %v11087_v16, 4  ;;  %v8413_v24 = vld [vmem:[%s8814_s22 + $0x2b4] ss:$8 sps:$4 sm:$0xff]   ;;  %v9934_v14 = vsel %vm2207_vm4, %v2362_v41, %v2366_v33  ;;  %v2380_v50 = vshll.u32 %v2205_v61, 16  ;;  %v1630_v11 = vsel %vm1488_vm3, %v9615_v22, %v1629_v49  ;;  %5586 = vmatprep.mubr.bf16.mxu1 %v9602_v4  ;;  %5658 = vmatpush1.bf16.msra.mxu1 %v8405_v47  ;;  %v8414_v41 = vld [vmem:[%s8814_s22 + $0x5b0] ss:$8 sps:$4 sm:$0xff]  }
 0x194   : > { %v1643_v45 = vrot.slane %v11088_v46, 3  ;;  %11089 = vst [vmem:[#allocation29_spill] sm:$0xff] %v9934_v14  ;;  %v11090_v20 = vshll.u32 %v9623_v28, 16  ;;  %v9942_v5 = vsel %vm2207_vm4, %v2386_v2, %v2390_v18  ;;  %v2378_v35 = vor.u32 %v2376_v1, %v2366_v33  ;;  %5157 = vmatprep.mubr.bf16.mxu0 %v1630_v11  ;;  %5229 = vmatpush1.bf16.msra.mxu0 %v8408_v60  ;;  %v8411_v38 = vld [vmem:[%s8814_s22 + $0x2b0] ss:$8 sps:$4 sm:$0xff]   ;;  %v9995_v14 = vld [vmem:[#allocation2 + $0x20] sm:$0xff] }
 0x195   : > { %11091 = vst [vmem:[#allocation30_spill] sm:$0xff] %v9942_v5  ;;  %v2382_v61 = vrot.slane %v2380_v50, 1  ;;  %5659 = vmatprep.subr.bf16.mxu1 %v8416_v42  ;;  %v8422_v22 = vld [vmem:[%s8814_s22 + $0x5c4] ss:$8 sps:$4 sm:$0xff]   ;;  %v1620_v16 = vor.u32 %v1619_v62, %v1616_v55  ;;  %5230 = vmatprep.subr.bf16.mxu0 %v8413_v24  ;;  %v8417_v33 = vld [vmem:[%s8814_s22 + $0x2c0] ss:$8 sps:$4 sm:$0xff]  }
 0x196   : > { %v1646_v52 = vrot.slane %v11090_v20, 4  ;;  %v8419_v4 = vld [vmem:[%s8814_s22 + $0x2c4] ss:$8 sps:$4 sm:$0xff]   ;;  %v8420_v18 = vld [vmem:[%s8814_s22 + $0x5c0] ss:$8 sps:$4 sm:$0xff]   ;;  %v11093_v47 = vshrl.u32 %v9639_v43, 16 }
 0x197   : > { %v9949_v57 = vsel %vm2207_vm4, %v2378_v35, %v2382_v61  ;;  %5660 = vmatpush1.bf16.msra.mxu1 %v8414_v41  ;;  %v11094_v60 = vshll.u32 %v9639_v43, 16  ;;  %v1487_v42 = vld [vmem:[#allocation2 + $0xb8] sm:$0xf]  ;;  %v8431_v62 = vld [vmem:[%s8814_s22 + $0x5d4] ss:$8 sps:$4 sm:$0xff]   ;;  %v1621_v55 = vsel %vm1488_vm3, %v9661_v0, %v1620_v16  ;;  %v11095_v50 = vshrl.u32 %v9648_v25, 16 }
 0x198   : > { %11092 = vst [vmem:[#allocation31_spill] sm:$0xff] %v9949_v57  ;;  %v9951_v2 = vor.u32 %v1646_v52, %v1643_v45  ;;  %v1634_v1 = vrot.slane %v11093_v47, 3  ;;  %5231 = vmatpush1.bf16.msra.mxu0 %v8411_v38  ;;  %5661 = vmatprep.subr.bf16.mxu1 %v8422_v22  ;;  %v8425_v45 = vld [vmem:[%s8814_s22 + $0x2d4] ss:$8 sps:$4 sm:$0xff]   ;;  %v11096_v20 = vshll.u32 %v9648_v25, 16  ;;  %v11098_v61 = vshll.u32 %v9650_v56, 16 }
 0x199   : > { %v1637_v46 = vrot.slane %v11094_v60, 4  ;;  %5587 = vmatmul.mubr.bf16.gmra.mrb[12].mxu1 %v9621_v21  ;;  %5232 = vmatprep.subr.bf16.mxu0 %v8419_v4  ;;  %v1661_v11 = vrot.slane %v11095_v50, 3  ;;  %v1486_v35 = vld [vmem:[#allocation2 + $0xb0] sm:$0xf]  ;;  %v9971_v0 = vld [vmem:[#allocation2 + $0x8] sm:$0xf0] }
 0x19a   : > { %5158 = vmatmul.mubr.bf16.gmra.mrb[68].mxu0 %v1621_v55  ;;  %v1648_v24 = vsel %vm1488_vm3, %v1629_v49, %v9951_v2  ;;  %5596 = vmatprep.mubr.bf16.mxu1 %v9623_v28  ;;  %v1664_v52 = vrot.slane %v11096_v20, 4  ;;  %v11097_v21 = vshrl.u32 %v9650_v56, 16  ;;  %v1655_v49 = vrot.slane %v11098_v61, 4  ;;  %v8429_v22 = vld [vmem:[%s8814_s22 + $0x5d0] ss:$8 sps:$4 sm:$0xff]   ;;  %v9978_v4 = vld [vmem:[#allocation2 + $0x28] sm:$0xff] }
 0x19b   : > { %5167 = vmatprep.mubr.bf16.mxu0 %v1648_v24  ;;  %v1695_v38 = vshrl.u32 %v1487_v42, 16  ;;  %v1698_v28 = vshll.u32 %v1487_v42, 16  ;;  %5662 = vmatpush1.bf16.msra.mxu1 %v8420_v18  ;;  %11099 = vst [vmem:[#allocation32_spill] sm:$0xff] %v9978_v4  ;;  %v1638_v47 = vor.u32 %v1637_v46, %v1634_v1  ;;  %v11100_v60 = vshrl.u32 %v9668_v31, 16  ;;  %v8423_v20 = vld [vmem:[%s8814_s22 + $0x2d0] ss:$8 sps:$4 sm:$0xff]  }
 0x19c   : > { %v1652_v41 = vrot.slane %v11097_v21, 3  ;;  %v11101_v50 = vshll.u32 %v9668_v31, 16  ;;  %5233 = vmatpush1.bf16.msra.mxu0 %v8417_v33  ;;  %5663 = vmatprep.subr.bf16.mxu1 %v8431_v62  ;;  %v8437_v21 = vld [vmem:[%s8814_s22 + $0x5e4] ss:$8 sps:$4 sm:$0xff]   ;;  %v11102_v61 = vshrl.u32 %v9682_v23, 16  ;;  %v11103_v18 = vshll.u32 %v9682_v23, 16 }
 0x19d   : > { %v1679_v55 = vrot.slane %v11100_v60, 3  ;;  %5234 = vmatprep.subr.bf16.mxu0 %v8425_v45  ;;  %v1686_v1 = vshrl.u32 %v1486_v35, 16  ;;  %v1689_v46 = vshll.u32 %v1486_v35, 16  ;;  %v8428_v59 = vld [vmem:[%s8814_s22 + $0x2e4] ss:$8 sps:$4 sm:$0xff]   ;;  %v1665_v60 = vor.u32 %v1664_v52, %v1661_v11 }
 0x19e   : > { %v1682_v24 = vrot.slane %v11101_v50, 4  ;;  %v1670_v42 = vrot.slane %v11102_v61, 3  ;;  %v1673_v57 = vrot.slane %v11103_v18, 4  ;;  %v9991_v5 = vld [vmem:[#allocation2] sm:$0xf0]  ;;  %v1656_v33 = vor.u32 %v1655_v49, %v1652_v41 }
 0x19f   : > { %v1697_v50 = vrot.slane %v1695_v38, 3  ;;  %v1700_v51 = vrot.slane %v1698_v28, 4  ;;  %v1799_v62 = vrot.slane %v9971_v0, 4  ;;  %5664 = vmatpush1.bf16.msra.mxu1 %v8429_v22  ;;  %v8435_v61 = vld [vmem:[%s8814_s22 + $0x5e0] ss:$8 sps:$4 sm:$0xff]   ;;  %v1639_v45 = vsel %vm1488_vm3, %v1620_v16, %v1638_v47 }
 0x1a0   : > { %v1683_v18 = vor.u32 %v1682_v24, %v1679_v55  ;;  %5235 = vmatpush1.bf16.msra.mxu0 %v8423_v20  ;;  %v8426_v35 = vld [vmem:[%s8814_s22 + $0x2e0] ss:$8 sps:$4 sm:$0xff]   ;;  %v11031_v19 = vrot.slane %v9472_v39, 4  ;;  %5665 = vmatprep.subr.bf16.mxu1 %v8437_v21  ;;  %v8440_v11 = vld [vmem:[%s8814_s22 + $0x5f4] ss:$8 sps:$4 sm:$0xff]   ;;  %v11029_v52 = vshrl.u32 %v9978_v4, 16  ;;  %v1674_v0 = vor.u32 %v1673_v57, %v1670_v42 }
 0x1a1   : > { %5597 = vmatmul.mubr.bf16.gmra.mrb[16].mxu1 %v9639_v43  ;;  %v1688_v41 = vrot.slane %v1686_v1, 3  ;;  %v1691_v49 = vrot.slane %v1689_v46, 4  ;;  %5236 = vmatprep.subr.bf16.mxu0 %v8428_v59  ;;  %v8434_v38 = vld [vmem:[%s8814_s22 + $0x2f4] ss:$8 sps:$4 sm:$0xff]   ;;  %v11027_v16 = vshll.u32 %v9978_v4, 16  ;;  %v1666_v28 = vsel %vm1488_vm3, %v9951_v2, %v1665_v60 }
 0x1a2   : > { %5168 = vmatmul.mubr.bf16.gmra.mrb[72].mxu0 %v1639_v45  ;;  %5606 = vmatprep.mubr.bf16.mxu1 %v9648_v25  ;;  %v11104_v22 = vshll.u32 %v9472_v39, 16  ;;  %v11026_v43 = vshrl.u32 %v9995_v14, 16  ;;  %v11028_v57 = vshll.u32 %v9995_v14, 16  ;;  %v1657_v59 = vsel %vm1488_vm3, %v1638_v47, %v1656_v33  ;;  %v8432_v20 = vld [vmem:[%s8814_s22 + $0x2f0] ss:$8 sps:$4 sm:$0xff]  }
 0x1a3   : > { %5177 = vmatprep.mubr.bf16.mxu0 %v1666_v28  ;;  %v1701_v24 = vor.u32 %v1700_v51, %v1697_v50  ;;  %5666 = vmatpush1.bf16.msra.mxu1 %v8435_v61  ;;  %v1796_v21 = vrot.slane %v9991_v5, 4  ;;  %v8438_v42 = vld [vmem:[%s8814_s22 + $0x5f0] ss:$8 sps:$4 sm:$0xff]   ;;  %v1684_v2 = vsel %vm1488_vm3, %v1665_v60, %v1683_v18  ;;  %v11105_v25 = vshll.u32 %v9481_v48, 16  ;;  %v8443_v45 = vld [vmem:[%s8814_s22 + $0x604] ss:$8 sps:$4 sm:$0xff]  }
 0x1a4   : > { %v2225_v55 = vrot.slane %v11104_v22, 1  ;;  %5237 = vmatpush1.bf16.msra.mxu0 %v8426_v35  ;;  %v11030_v46 = vrot.slane %v9477_v26, 4  ;;  %5667 = vmatprep.subr.bf16.mxu1 %v8440_v11  ;;  %v10021_v22 = vld [vmem:[#allocation2 + $0x38] sm:$0xff]  ;;  %v2627_v51 = vrot.slane %v11029_v52, 4  ;;  %v10026_v47 = vsel %vm1488_vm3, %v1656_v33, %v1674_v0  ;;  %v10033_v50 = vld [vmem:[#allocation2 + $0x30] sm:$0xff]  ;;  %v10041_v33 = vld [vmem:[#allocation2 + $0x48] sm:$0xff] }
 0x1a5   : > { %v2230_v1 = vrot.slane %v11105_v25, 1  ;;  %v1692_v5 = vor.u32 %v1691_v49, %v1688_v41  ;;  %v10031_v60 = vsel %vm1795_vm5, %v1799_v62, %v11031_v19  ;;  %5238 = vmatprep.subr.bf16.mxu0 %v8434_v38  ;;  %v2630_v61 = vrot.slane %v11027_v16, 5  ;;  %v10091_v52 = vld [vmem:[#allocation2 + $0x68] sm:$0xff] }
 0x1a6   : > { %v11106_v35 = vshrl.u32 %v9472_v39, 16  ;;  %v11107_v28 = vshll.u32 %v9477_v26, 16  ;;  %v2610_v41 = vrot.slane %v11026_v43, 4  ;;  %v2613_v62 = vrot.slane %v11028_v57, 5 }
 0x1a7   : > { %v10048_v49 = vsel %vm1488_vm3, %v1683_v18, %v1701_v24  ;;  %5668 = vmatpush1.bf16.msra.mxu1 %v8438_v42  ;;  %v10050_v38 = vor.u32 %v2630_v61, %v2627_v51  ;;  %v11109_v43 = vshrl.u32 %v9481_v48, 16  ;;  %v2634_v24 = vshrl.u32 %v10033_v50, 16  ;;  %v8649_v42 = vld [vmem:[%s8814_s22 + $0x304] ss:$8 sps:$4 sm:$0xff]  }
 0x1a8   : > { %v2226_v11 = vor.u32 %v2225_v55, %v11106_v35  ;;  %v2213_v25 = vrot.slane %v11107_v28, 1  ;;  %v2643_v55 = vshrl.u32 %v10021_v22, 16  ;;  %v2646_v35 = vshll.u32 %v10021_v22, 16  ;;  %5239 = vmatpush1.bf16.msra.mxu0 %v8432_v20  ;;  %5780 = vmatprep.subr.bf16.mxu1 %v8443_v45  ;;  %v10068_v51 = vld [vmem:[#allocation2 + $0x40] sm:$0xff] }
 0x1a9   : > { %11108 = vst [vmem:[#allocation33_spill] sm:$0xff] %v10050_v38  ;;  %v10057_v28 = vsel %vm1795_vm5, %v1796_v21, %v11030_v46  ;;  %v10061_v16 = vor.u32 %v2230_v1, %v11109_v43  ;;  %v10063_v18 = vor.u32 %v2613_v62, %v2610_v41  ;;  %5607 = vmatmul.mubr.bf16.gmra.mrb[20].mxu1 %v9650_v56  ;;  %v2637_v21 = vshll.u32 %v10033_v50, 16 }
 0x1aa   : > { %5351 = vmatprep.subr.bf16.mxu0 %v8649_v42  ;;  %v2645_v20 = vrot.slane %v2643_v55, 4  ;;  %v2648_v61 = vrot.slane %v2646_v35, 5  ;;  %v2661_v57 = vshrl.u32 %v10041_v33, 16  ;;  %5178 = vmatmul.mubr.bf16.gmra.mrb[76].mxu0 %v1657_v59  ;;  %v10074_v43 = vsel %vm1488_vm3, %v1674_v0, %v1692_v5  ;;  %v10084_v55 = vld [vmem:[#allocation2 + $0x58] sm:$0xff]  ;;  %v10086_v35 = vld [vmem:[#allocation2 + $0x50] sm:$0xff] }
 0x1ab   : > { %11110 = vst [vmem:[#allocation34_spill] sm:$0xff] %v10063_v18  ;;  %5616 = vmatprep.mubr.bf16.mxu1 %v9668_v31  ;;  %v10077_v45 = vsel %vm2207_vm4, %v2226_v11, %v2230_v1  ;;  %v11111_v41 = vshrl.u32 %v9477_v26, 16  ;;  %5187 = vmatprep.mubr.bf16.mxu0 %v1684_v2  ;;  %v2636_v31 = vrot.slane %v2634_v24, 4  ;;  %v2639_v42 = vrot.slane %v2637_v21, 5  ;;  %v10099_v24 = vld [vmem:[#allocation2 + $0x60] sm:$0xff] }
 0x1ac   : > { %v2649_v59 = vor.u32 %v2648_v61, %v2645_v20  ;;  %v2663_v0 = vrot.slane %v2661_v57, 4  ;;  %v2664_v5 = vshll.u32 %v10041_v33, 16  ;;  %v2652_v1 = vshrl.u32 %v10068_v51, 16 }
 0x1ad   : > { %v10082_v62 = vor.u32 %v2213_v25, %v11111_v41  ;;  %v2655_v11 = vshll.u32 %v10068_v51, 16  ;;  %v2640_v2 = vor.u32 %v2639_v42, %v2636_v31  ;;  %v2679_v41 = vshrl.u32 %v10084_v55, 16 }
 0x1ae   : > { %v10095_v25 = vsel %vm2598_vm6, %v10050_v38, %v2649_v59  ;;  %v2682_v20 = vshll.u32 %v10084_v55, 16  ;;  %v2666_v57 = vrot.slane %v2664_v5, 5  ;;  %v2654_v61 = vrot.slane %v2652_v1, 4  ;;  %v10109_v5 = vld [vmem:[#allocation2 + $0x78] sm:$0xff]  ;;  %v10111_v1 = vld [vmem:[#allocation2 + $0x70] sm:$0xff] }
 0x1af   : > { %11112 = vst [vmem:[#allocation35_spill] sm:$0xff] %v10095_v25  ;;  %v2657_v21 = vrot.slane %v2655_v11, 5  ;;  %v2670_v46 = vshrl.u32 %v10086_v35, 16  ;;  %v10104_v19 = vsel %vm2598_vm6, %v10063_v18, %v2640_v2  ;;  %v2681_v56 = vrot.slane %v2679_v41, 4 }
 0x1b0   : > { %11113 = vst [vmem:[#allocation36_spill] sm:$0xff] %v10104_v19  ;;  %v2684_v4 = vrot.slane %v2682_v20, 5  ;;  %v2673_v25 = vshll.u32 %v10086_v35, 16  ;;  %v2667_v31 = vor.u32 %v2666_v57, %v2663_v0  ;;  %v2697_v63 = vshrl.u32 %v10091_v52, 16  ;;  %v10117_v0 = vld [vmem:[#allocation2 + $0x88] sm:$0xff] }
 0x1b1   : > { %v2658_v42 = vor.u32 %v2657_v21, %v2654_v61  ;;  %v2672_v38 = vrot.slane %v2670_v46, 4  ;;  %5617 = vmatmul.mubr.bf16.gmra.mrb[24].mxu1 %v9682_v23  ;;  %v2700_v18 = vshll.u32 %v10091_v52, 16  ;;  %v2688_v41 = vshrl.u32 %v10099_v24, 16 }
 0x1b2   : > { %v2685_v11 = vor.u32 %v2684_v4, %v2681_v56  ;;  %v2675_v37 = vrot.slane %v2673_v25, 5  ;;  %5188 = vmatmul.mubr.bf16.gmra.mrb[80].mxu0 %v10026_v47  ;;  %5626 = vmatprep.mubr.bf16.mxu1 %v9846_v6  ;;  %v10120_v46 = vsel %vm2598_vm6, %v2649_v59, %v2667_v31  ;;  %v2699_v57 = vrot.slane %v2697_v63, 4 }
 0x1b3   : > { %11114 = vst [vmem:[#allocation37_spill] sm:$0xff] %v10120_v46  ;;  %v10123_v20 = vsel %vm2598_vm6, %v2640_v2, %v2658_v42  ;;  %v2691_v4 = vshll.u32 %v10099_v24, 16  ;;  %5197 = vmatprep.mubr.bf16.mxu0 %v10048_v49  ;;  %v2702_v47 = vrot.slane %v2700_v18, 5  ;;  %v2690_v61 = vrot.slane %v2688_v41, 4  ;;  %v10133_v2 = vld [vmem:[#allocation2 + $0x80] sm:$0xff] }
 0x1b4   : > { %11115 = vst [vmem:[#allocation38_spill] sm:$0xff] %v10123_v20  ;;  %v10128_v56 = vsel %vm2598_vm6, %v2667_v31, %v2685_v11  ;;  %v2676_v25 = vor.u32 %v2675_v37, %v2672_v38  ;;  %v2715_v21 = vshrl.u32 %v10109_v5, 16  ;;  %v2718_v59 = vshll.u32 %v10109_v5, 16  ;;  %v10140_v37 = vld [vmem:[#allocation2 + $0x98] sm:$0xff] }
 0x1b5   : > { %11116 = vst [vmem:[#allocation39_spill] sm:$0xff] %v10128_v56  ;;  %v2693_v6 = vrot.slane %v2691_v4, 5  ;;  %v2706_v46 = vshrl.u32 %v10111_v1, 16  ;;  %v2703_v20 = vor.u32 %v2702_v47, %v2699_v57  ;;  %v2709_v49 = vshll.u32 %v10111_v1, 16 }
 0x1b6   : > { %v10136_v63 = vsel %vm2598_vm6, %v2658_v42, %v2676_v25  ;;  %v2733_v31 = vshrl.u32 %v10117_v0, 16  ;;  %v2717_v18 = vrot.slane %v2715_v21, 4  ;;  %v2720_v41 = vrot.slane %v2718_v59, 5  ;;  %v10165_v59 = vld [vmem:[#allocation2 + $0xa0] sm:$0xff] }
 0x1b7   : > { %11117 = vst [vmem:[#allocation40_spill] sm:$0xff] %v10136_v63  ;;  %v2694_v38 = vor.u32 %v2693_v6, %v2690_v61  ;;  %v2708_v4 = vrot.slane %v2706_v46, 4  ;;  %v10143_v56 = vsel %vm2598_vm6, %v2685_v11, %v2703_v20  ;;  %v2711_v19 = vrot.slane %v2709_v49, 5  ;;  %v10155_v11 = vld [vmem:[#allocation2 + $0x90] sm:$0xff]  ;;  %v10157_v61 = vld [vmem:[#allocation2 + $0xa8] sm:$0xff] }
 0x1b8   : > { %11118 = vst [vmem:[#allocation41_spill] sm:$0xff] %v10143_v56  ;;  %v2735_v23 = vrot.slane %v2733_v31, 4  ;;  %v2736_v10 = vshll.u32 %v10117_v0, 16  ;;  %v2721_v57 = vor.u32 %v2720_v41, %v2717_v18  ;;  %v2724_v47 = vshrl.u32 %v10133_v2, 16  ;;  %v10178_v18 = vld [vmem:[#allocation2 + $0xb8] sm:$0xff] }
 0x1b9   : > { %v10147_v42 = vsel %vm2598_vm6, %v2676_v25, %v2694_v38  ;;  %v2727_v63 = vshll.u32 %v10133_v2, 16  ;;  %5627 = vmatmul.mubr.bf16.gmra.mrb[28].mxu1 %v9870_v29  ;;  %v2219_v46 = vsel %vm2207_vm4, %v10082_v62, %v9676_v44  ;;  %v2712_v6 = vor.u32 %v2711_v19, %v2708_v4  ;;  %v8446_v56 = vld [vmem:[%s8814_s22 + $0x614] ss:$8 sps:$4 sm:$0xff]  }
 0x1ba   : > { %11119 = vst [vmem:[#allocation42_spill] sm:$0xff] %v10147_v42  ;;  %v2738_v21 = vrot.slane %v2736_v10, 5  ;;  %v2751_v25 = vshrl.u32 %v10140_v37, 16  ;;  %5198 = vmatmul.mubr.bf16.gmra.mrb[84].mxu0 %v10074_v43  ;;  %5669 = vmatprep.mubr.bf16.mxu1 %v10077_v45  ;;  %v2247_v29 = vsel %vm2207_vm4, %v10061_v16, %v9689_v32  ;;  %v10168_v44 = vsel %vm2598_vm6, %v2703_v20, %v2721_v57 }
 0x1bb   : > { %11120 = vst [vmem:[#allocation43_spill] sm:$0xff] %v10168_v44  ;;  %v2726_v62 = vrot.slane %v2724_v47, 4  ;;  %v2729_v49 = vrot.slane %v2727_v63, 5  ;;  %5240 = vmatprep.mubr.bf16.mxu0 %v10031_v60  ;;  %v10172_v10 = vsel %vm2598_vm6, %v2694_v38, %v2712_v6  ;;  %v2754_v45 = vshll.u32 %v10140_v37, 16  ;;  %v10180_v63 = vld [vmem:[#allocation2 + $0xb0] sm:$0xff] }
 0x1bc   : > { %11121 = vst [vmem:[#allocation44_spill] sm:$0xff] %v10172_v10  ;;  %v2739_v19 = vor.u32 %v2738_v21, %v2735_v23  ;;  %v2753_v43 = vrot.slane %v2751_v25, 4  ;;  %v2742_v32 = vshrl.u32 %v10155_v11, 16  ;;  %v2745_v16 = vshll.u32 %v10155_v11, 16 }
 0x1bd   : > { %v2730_v31 = vor.u32 %v2729_v49, %v2726_v62  ;;  %v2769_v20 = vshrl.u32 %v10157_v61, 16  ;;  %v2756_v23 = vrot.slane %v2754_v45, 5  ;;  %v2772_v38 = vshll.u32 %v10157_v61, 16  ;;  %v8441_v62 = vld [vmem:[%s8814_s22 + $0x600] ss:$8 sps:$4 sm:$0xff]  }
 0x1be   : > { %v10183_v60 = vsel %vm2598_vm6, %v2721_v57, %v2739_v19  ;;  %v2760_v41 = vshrl.u32 %v10165_v59, 16  ;;  %v2744_v47 = vrot.slane %v2742_v32, 4  ;;  %v2747_v21 = vrot.slane %v2745_v16, 5 }
 0x1bf   : > { %11122 = vst [vmem:[#allocation45_spill] sm:$0xff] %v10183_v60  ;;  %v10188_v4 = vsel %vm2598_vm6, %v2712_v6, %v2730_v31  ;;  %v2771_v25 = vrot.slane %v2769_v20, 4  ;;  %v2757_v49 = vor.u32 %v2756_v23, %v2753_v43  ;;  %v2774_v10 = vrot.slane %v2772_v38, 5  ;;  %v2597_v20 = vld [vmem:[#allocation2 + $0xc8] sm:$0x1f] }
 0x1c0   : > { %11123 = vst [vmem:[#allocation46_spill] sm:$0xff] %v10188_v4  ;;  %v2762_v44 = vrot.slane %v2760_v41, 4  ;;  %v2763_v42 = vshll.u32 %v10165_v59, 16  ;;  %v2748_v57 = vor.u32 %v2747_v21, %v2744_v47  ;;  %v2787_v45 = vshrl.u32 %v10178_v18, 16  ;;  %v2596_v23 = vld [vmem:[#allocation2 + $0xc0] sm:$0x1f] }
 0x1c1   : > { %v2790_v60 = vshll.u32 %v10178_v18, 16  ;;  %v2778_v9 = vshrl.u32 %v10180_v63, 16  ;;  %5670 = vmatmul.mubr.bf16.vlgmr.msra.gmra.mrb[32].mxu1 %v2219_v46  ;;  %v10197_v6 = vsel %vm2598_vm6, %v2739_v19, %v2757_v49  ;;  %v2775_v32 = vor.u32 %v2774_v10, %v2771_v25  ;;  %v8444_v19 = vld [vmem:[%s8814_s22 + $0x610] ss:$8 sps:$4 sm:$0xff]   ;;  %v8650_v4 = vld [vmem:[%s8814_s22 + $0x300] ss:$8 sps:$4 sm:$0xff]  }
 0x1c2   : > { %11124 = vst [vmem:[#allocation47_spill] sm:$0xff] %v10197_v6  ;;  %v2765_v16 = vrot.slane %v2763_v42, 5  ;;  %v2781_v43 = vshll.u32 %v10180_v63, 16  ;;  %5241 = vmatmul.mubr.bf16.vlgmr.msra.gmra.mrb[44].mxu0 %v10057_v28  ;;  %v11125_v38 = vrot.slane %v9481_v48, 4  ;;  %v11126_v41 = vrot.slane %v9472_v39, 4  ;;  %5679 = vmatprep.mubr.bf16.mxu1 %v2247_v29 }
 0x1c3   : > { %v10207_v46 = vsel %vm2598_vm6, %v2730_v31, %v2748_v57  ;;  %v2789_v10 = vrot.slane %v2787_v45, 4  ;;  %v2792_v42 = vrot.slane %v2790_v60, 5  ;;  %5781 = vmatpush1.bf16.msra.mxu1 %v8441_v62  ;;  %v10211_v21 = vsel %vm2598_vm6, %v2757_v49, %v2775_v32  ;;  %v8449_v39 = vld [vmem:[%s8814_s22 + $0x624] ss:$8 sps:$4 sm:$0xff]   ;;  %5352 = vmatpush1.bf16.msra.mxu0 %v8650_v4  ;;  %v8651_v60 = vld [vmem:[%s8814_s22 + $0x314] ss:$8 sps:$4 sm:$0xff]  }
 0x1c4   : > { %v1805_v47 = vsel %vm1795_vm5, %v11126_v41, %v11125_v38  ;;  %v2766_v28 = vor.u32 %v2765_v16, %v2762_v44  ;;  %v2780_v25 = vrot.slane %v2778_v9, 4  ;;  %v2783_v6 = vrot.slane %v2781_v43, 5  ;;  %5782 = vmatprep.subr.bf16.mxu1 %v8446_v56  ;;  %5353 = vmatprep.subr.bf16.mxu0 %v8651_v60  ;;  %v8447_v43 = vld [vmem:[%s8814_s22 + $0x620] ss:$8 sps:$4 sm:$0xff]   ;;  %v8450_v60 = vld [vmem:[%s8814_s22 + $0x630] ss:$8 sps:$4 sm:$0xff]  }
 0x1c5   : > { %5250 = vmatprep.mubr.bf16.mxu0 %v1805_v47  ;;  %v2793_v29 = vor.u32 %v2792_v42, %v2789_v10  ;;  %v2805_v31 = vshrl.u32 %v2597_v20, 16  ;;  %v2808_v38 = vshll.u32 %v2597_v20, 16  ;;  %v2796_v45 = vshrl.u32 %v2596_v23, 16 }
 0x1c6   : > { %v10217_v62 = vsel %vm2598_vm6, %v2748_v57, %v2766_v28  ;;  %v2784_v49 = vor.u32 %v2783_v6, %v2780_v25  ;;  %v2799_v44 = vshll.u32 %v2596_v23, 16  ;;  %v11127_v47 = vrot.slane %v9518_v30, 4  ;;  %v8452_v23 = vld [vmem:[%s8814_s22 + $0x634] ss:$8 sps:$4 sm:$0xff]  }
 0x1c7   : > { %v10220_v9 = vsel %vm2598_vm6, %v2775_v32, %v2793_v29  ;;  %v2807_v56 = vrot.slane %v2805_v31, 4  ;;  %v2810_v16 = vrot.slane %v2808_v38, 5  ;;  %v2798_v4 = vrot.slane %v2796_v45, 4  ;;  %5783 = vmatpush1.bf16.msra.mxu1 %v8444_v19  ;;  %v8652_v32 = vld [vmem:[%s8814_s22 + $0x310] ss:$8 sps:$4 sm:$0xff]  }
 0x1c8   : > { %v10224_v20 = vsel %vm2598_vm6, %v2766_v28, %v2784_v49  ;;  %v2801_v41 = vrot.slane %v2799_v44, 5  ;;  %v11128_v57 = vrot.slane %v9477_v26, 4  ;;  %5784 = vmatprep.subr.bf16.mxu1 %v8449_v39  ;;  %5354 = vmatpush1.bf16.msra.mxu0 %v8652_v32  ;;  %v11038_v42 = vrot.slane %v9995_v14, 5  ;;  %v8653_v19 = vld [vmem:[%s8814_s22 + $0x324] ss:$8 sps:$4 sm:$0xff]  }
 0x1c9   : > { %v2811_v10 = vor.u32 %v2810_v16, %v2807_v56  ;;  %5680 = vmatmul.mubr.bf16.gmra.mrb[36].mxu1 %v9709_v54  ;;  %5355 = vmatprep.subr.bf16.mxu0 %v8653_v19  ;;  %v11037_v25 = vrot.slane %v10021_v22, 5  ;;  %v2912_v30 = vrot.slane %v10033_v50, 5  ;;  %v2918_v26 = vrot.slane %v10041_v33, 5  ;;  %v8654_v56 = vld [vmem:[%s8814_s22 + $0x320] ss:$8 sps:$4 sm:$0xff]  }
 0x1ca   : > { %v1803_v6 = vsel %vm1795_vm5, %v11128_v57, %v11127_v47  ;;  %v2802_v28 = vor.u32 %v2801_v41, %v2798_v4  ;;  %v11129_v39 = vrot.slane %v9520_v40, 4  ;;  %v11130_v31 = vrot.slane %v9481_v48, 4  ;;  %5689 = vmatprep.mubr.bf16.mxu1 %v9736_v34  ;;  %v8655_v41 = vld [vmem:[%s8814_s22 + $0x334] ss:$8 sps:$4 sm:$0xff]  }
 0x1cb   : > { %5251 = vmatmul.mubr.bf16.gmra.mrb[48].mxu0 %v1803_v6  ;;  %v10246_v54 = vsel %vm2598_vm6, %v2793_v29, %v2811_v10  ;;  %v2916_v45 = vrot.slane %v10068_v51, 5  ;;  %5785 = vmatpush1.bf16.msra.mxu1 %v8447_v43  ;;  %v10256_v48 = vsel %vm2905_vm7, %v11038_v42, %v2912_v30  ;;  %v10261_v40 = vsel %vm2905_vm7, %v11037_v25, %v2918_v26  ;;  %v8455_v29 = vld [vmem:[%s8814_s22 + $0x644] ss:$8 sps:$4 sm:$0xff]  }
 0x1cc   : > { %v1809_v38 = vsel %vm1795_vm5, %v11130_v31, %v11129_v39  ;;  %v10251_v44 = vsel %vm2598_vm6, %v2784_v49, %v2802_v28  ;;  %v2922_v34 = vrot.slane %v10084_v55, 5  ;;  %5786 = vmatprep.subr.bf16.mxu1 %v8452_v23  ;;  %5356 = vmatpush1.bf16.msra.mxu0 %v8654_v56  ;;  %v2920_v49 = vrot.slane %v10086_v35, 5  ;;  %v8458_v56 = vld [vmem:[%s8814_s22 + $0x654] ss:$8 sps:$4 sm:$0xff]  }
 0x1cd   : > { %5260 = vmatprep.mubr.bf16.mxu0 %v1809_v38  ;;  %v10267_v16 = vsel %vm2905_vm7, %v2912_v30, %v2916_v45  ;;  %v2926_v4 = vrot.slane %v10091_v52, 5  ;;  %v2924_v43 = vrot.slane %v10099_v24, 5  ;;  %5357 = vmatprep.subr.bf16.mxu0 %v8655_v41  ;;  %v2930_v57 = vrot.slane %v10109_v5, 5  ;;  %v2880_v30 = vld [vmem:[#allocation2 + $0xc8] sm:$0x1f] }
 0x1ce   : > { %v10274_v47 = vsel %vm2905_vm7, %v2918_v26, %v2922_v34  ;;  %v2928_v6 = vrot.slane %v10111_v1, 5  ;;  %v2934_v23 = vrot.slane %v10117_v0, 5  ;;  %v10280_v32 = vsel %vm2905_vm7, %v2916_v45, %v2920_v49  ;;  %v8453_v26 = vld [vmem:[%s8814_s22 + $0x640] ss:$8 sps:$4 sm:$0xff]  }
 0x1cf   : > { %v10283_v10 = vsel %vm2905_vm7, %v2922_v34, %v2926_v4  ;;  %v10286_v19 = vsel %vm2905_vm7, %v2920_v49, %v2924_v43  ;;  %v2932_v28 = vrot.slane %v10133_v2, 5  ;;  %5787 = vmatpush1.bf16.msra.mxu1 %v8450_v60  ;;  %v10291_v39 = vsel %vm2905_vm7, %v2926_v4, %v2930_v57  ;;  %v2879_v34 = vld [vmem:[#allocation2 + $0xc0] sm:$0x1f]  ;;  %v8656_v49 = vld [vmem:[%s8814_s22 + $0x330] ss:$8 sps:$4 sm:$0xff]  }
 0x1d0   : > { %v10294_v31 = vsel %vm2905_vm7, %v2924_v43, %v2928_v6  ;;  %v10297_v38 = vsel %vm2905_vm7, %v2930_v57, %v2934_v23  ;;  %v2938_v45 = vrot.slane %v10140_v37, 5  ;;  %5788 = vmatprep.subr.bf16.mxu1 %v8455_v29  ;;  %5358 = vmatpush1.bf16.msra.mxu0 %v8656_v49  ;;  %v2936_v41 = vrot.slane %v10155_v11, 5  ;;  %v8657_v57 = vld [vmem:[%s8814_s22 + $0x344] ss:$8 sps:$4 sm:$0xff]  }
 0x1d1   : > { %v10303_v60 = vsel %vm2905_vm7, %v2928_v6, %v2932_v28  ;;  %v2942_v4 = vrot.slane %v10157_v61, 5  ;;  %v2940_v43 = vrot.slane %v10165_v59, 5  ;;  %5690 = vmatmul.mubr.bf16.gmra.mrb[40].mxu1 %v9743_v58  ;;  %5359 = vmatprep.subr.bf16.mxu0 %v8657_v57  ;;  %v2946_v29 = vrot.slane %v10178_v18, 5 }
 0x1d2   : > { %v10311_v25 = vsel %vm2905_vm7, %v2934_v23, %v2938_v45  ;;  %v2944_v6 = vrot.slane %v10180_v63, 5  ;;  %v2950_v49 = vrot.slane %v2880_v30, 5  ;;  %5699 = vmatprep.mubr.bf16.mxu1 %v9746_v12  ;;  %v10318_v42 = vsel %vm2905_vm7, %v2932_v28, %v2936_v41  ;;  %v8456_v30 = vld [vmem:[%s8814_s22 + $0x650] ss:$8 sps:$4 sm:$0xff]  }
 0x1d3   : > { %5261 = vmatmul.mubr.bf16.gmra.mrb[52].mxu0 %v9717_v15  ;;  %v10321_v58 = vsel %vm2905_vm7, %v2938_v45, %v2942_v4  ;;  %v10324_v23 = vsel %vm2905_vm7, %v2936_v41, %v2940_v43  ;;  %v2948_v57 = vrot.slane %v2879_v34, 5  ;;  %5789 = vmatpush1.bf16.msra.mxu1 %v8453_v26  ;;  %v10329_v15 = vsel %vm2905_vm7, %v2942_v4, %v2946_v29  ;;  %v8658_v45 = vld [vmem:[%s8814_s22 + $0x340] ss:$8 sps:$4 sm:$0xff]   ;;  %v8461_v34 = vld [vmem:[%s8814_s22 + $0x664] ss:$8 sps:$4 sm:$0xff]  }
 0x1d4   : > { %5270 = vmatprep.mubr.bf16.mxu0 %v9726_v7  ;;  %v10332_v12 = vsel %vm2905_vm7, %v2940_v43, %v2944_v6  ;;  %v10335_v28 = vsel %vm2905_vm7, %v2946_v29, %v2950_v49  ;;  %5790 = vmatprep.subr.bf16.mxu1 %v8458_v56  ;;  %v8659_v26 = vld [vmem:[%s8814_s22 + $0x354] ss:$8 sps:$4 sm:$0xff]   ;;  %v8459_v41 = vld [vmem:[%s8814_s22 + $0x660] ss:$8 sps:$4 sm:$0xff]   ;;  %v8660_v4 = vld [vmem:[%s8814_s22 + $0x350] ss:$8 sps:$4 sm:$0xff]  }
 0x1d5   : > { %11131 = vst [vmem:[#allocation48_spill] sm:$0xff] %v10332_v12  ;;  %11132 = vst [vmem:[#allocation49_spill] sm:$0xff] %v10335_v28  ;;  %5360 = vmatpush1.bf16.msra.mxu0 %v8658_v45  ;;  %v10340_v7 = vsel %vm2905_vm7, %v2944_v6, %v2948_v57  ;;  %v8464_v43 = vld [vmem:[%s8814_s22 + $0x674] ss:$8 sps:$4 sm:$0xff]   ;;  %v8661_v56 = vld [vmem:[%s8814_s22 + $0x364] ss:$8 sps:$4 sm:$0xff]  }
 0x1d6   : > { %11133 = vst [vmem:[#allocation50_spill] sm:$0xff] %v10340_v7  ;;  %5361 = vmatprep.subr.bf16.mxu0 %v8659_v26  ;;  %v8462_v29 = vld [vmem:[%s8814_s22 + $0x670] ss:$8 sps:$4 sm:$0xff]   ;;  %v8662_v6 = vld [vmem:[%s8814_s22 + $0x360] ss:$8 sps:$4 sm:$0xff]  }
 0x1d7   : > { %5791 = vmatpush1.bf16.msra.mxu1 %v8456_v30  ;;  %v8467_v49 = vld [vmem:[%s8814_s22 + $0x684] ss:$8 sps:$4 sm:$0xff]   ;;  %v8663_v57 = vld [vmem:[%s8814_s22 + $0x374] ss:$8 sps:$4 sm:$0xff]   ;;  %v8468_v45 = vld [vmem:[%s8814_s22 + $0x690] ss:$8 sps:$4 sm:$0xff]  }
 0x1d8   : > { %5792 = vmatprep.subr.bf16.mxu1 %v8461_v34  ;;  %v11134_v30 = vld [vmem:[#allocation10_spill] sm:$0xff]  ;;  %v11156_v28 = vld [vmem:[#allocation9_spill] sm:$0xff]  ;;  %v11158_v12 = vld [vmem:[#allocation31_spill] sm:$0xff] }
 0x1d9   : > { %5362 = vmatpush1.bf16.msra.mxu0 %v8660_v4  ;;  %5700 = vmatmul.mubr.bf16.gmra.mrb[0].mxu1 %v9765_v17  ;;  %v8465_v17 = vld [vmem:[%s8814_s22 + $0x680] ss:$8 sps:$4 sm:$0xff]   ;;  %v8473_v26 = vld [vmem:[%s8814_s22 + $0x6a4] ss:$8 sps:$4 sm:$0xff]   ;;  %v11135_v4 = vld [vmem:[#allocation13_spill] sm:$0xff] }
 0x1da   : > { %5363 = vmatprep.subr.bf16.mxu0 %v8661_v56  ;;  %5709 = vmatprep.mubr.bf16.mxu1 %v9775_v8  ;;  %v8470_v8 = vld [vmem:[%s8814_s22 + $0x694] ss:$8 sps:$4 sm:$0xff]   ;;  %v8666_v34 = vld [vmem:[%s8814_s22 + $0x380] ss:$8 sps:$4 sm:$0xff]   ;;  %v1886_v7 = vld [vmem:[#allocation2] sm:$0x80] }
 0x1db   : > { %5271 = vmatmul.mubr.bf16.gmra.mrb[56].mxu0 %v9754_v13  ;;  %5793 = vmatpush1.bf16.msra.mxu1 %v8459_v41  ;;  %v8664_v13 = vld [vmem:[%s8814_s22 + $0x370] ss:$8 sps:$4 sm:$0xff]   ;;  %v8667_v41 = vld [vmem:[%s8814_s22 + $0x394] ss:$8 sps:$4 sm:$0xff]   ;;  %v11136_v56 = vld [vmem:[#allocation11_spill] sm:$0xff] }
 0x1dc   : > { %5280 = vmatprep.mubr.bf16.mxu0 %v9757_v53  ;;  %5794 = vmatprep.subr.bf16.mxu1 %v8464_v43  ;;  %v8665_v53 = vld [vmem:[%s8814_s22 + $0x384] ss:$8 sps:$4 sm:$0xff]  }
 0x1dd   : > { %5364 = vmatpush1.bf16.msra.mxu0 %v8662_v6  ;;  %v8669_v43 = vld [vmem:[%s8814_s22 + $0x3a4] ss:$8 sps:$4 sm:$0xff]   ;;  %v11138_v6 = vld [vmem:[#allocation12_spill] sm:$0xff] }
 0x1de   : > { %5365 = vmatprep.subr.bf16.mxu0 %v8663_v57  ;;  %v8670_v57 = vld [vmem:[%s8814_s22 + $0x3a0] ss:$8 sps:$4 sm:$0xff]  }
 0x1df   : > { %5795 = vmatpush1.bf16.msra.mxu1 %v8462_v29  ;;  %v11137_v29 = vld [vmem:[#allocation14_spill] sm:$0xff] }
 0x1e0   : > { %5796 = vmatprep.subr.bf16.mxu1 %v8467_v49  ;;  %v8474_v49 = vld [vmem:[%s8814_s22 + $0x6b0] ss:$8 sps:$4 sm:$0xff]  }
 0x1e1   : > { %5366 = vmatpush1.bf16.msra.mxu0 %v8664_v13  ;;  %5710 = vmatmul.mubr.bf16.gmra.mrb[4].mxu1 %v9790_v3  ;;  %v8471_v3 = vld [vmem:[%s8814_s22 + $0x6a0] ss:$8 sps:$4 sm:$0xff]   ;;  %v8671_v13 = vld [vmem:[%s8814_s22 + $0x3b4] ss:$8 sps:$4 sm:$0xff]  }
 0x1e2   : > { %5367 = vmatprep.subr.bf16.mxu0 %v8665_v53  ;;  %5719 = vmatprep.mubr.bf16.mxu1 %v9797_v36  ;;  %v8476_v36 = vld [vmem:[%s8814_s22 + $0x6b4] ss:$8 sps:$4 sm:$0xff]   ;;  %v8672_v53 = vld [vmem:[%s8814_s22 + $0x3b0] ss:$8 sps:$4 sm:$0xff]  }
 0x1e3   : > { %5281 = vmatmul.mubr.bf16.gmra.mrb[60].mxu0 %v9778_v27  ;;  %5797 = vmatpush1.bf16.msra.mxu1 %v8465_v17  ;;  %v8668_v27 = vld [vmem:[%s8814_s22 + $0x390] ss:$8 sps:$4 sm:$0xff]   ;;  %v8479_v17 = vld [vmem:[%s8814_s22 + $0x6c4] ss:$8 sps:$4 sm:$0xff]  }
 0x1e4   : > { %5290 = vmatprep.mubr.bf16.mxu0 %v11134_v30  ;;  %5798 = vmatprep.subr.bf16.mxu1 %v8470_v8  ;;  %v8477_v8 = vld [vmem:[%s8814_s22 + $0x6c0] ss:$8 sps:$4 sm:$0xff]   ;;  %v8482_v30 = vld [vmem:[%s8814_s22 + $0x6d4] ss:$8 sps:$4 sm:$0xff]  }
 0x1e5   : > { %5368 = vmatpush1.bf16.msra.mxu0 %v8666_v34  ;;  %v8673_v34 = vld [vmem:[%s8814_s22 + $0x3c4] ss:$8 sps:$4 sm:$0xff]  }
 0x1e6   : > { %5369 = vmatprep.subr.bf16.mxu0 %v8667_v41  ;;  %v11141_v41 = vld [vmem:[#allocation18_spill] sm:$0xff] }
 0x1e7   : > { %5799 = vmatpush1.bf16.msra.mxu1 %v8468_v45  ;;  %v11139_v45 = vld [vmem:[#allocation17_spill] sm:$0xff] }
 0x1e8   : > { %5800 = vmatprep.subr.bf16.mxu1 %v8473_v26  ;;  %v11140_v26 = vld [vmem:[#allocation15_spill] sm:$0xff] }
 0x1e9   : > { %5370 = vmatpush1.bf16.msra.mxu0 %v8668_v27  ;;  %5720 = vmatmul.mubr.bf16.gmra.mrb[8].mxu1 %v11135_v4  ;;  %v8480_v27 = vld [vmem:[%s8814_s22 + $0x6d0] ss:$8 sps:$4 sm:$0xff]   ;;  %v8485_v4 = vld [vmem:[%s8814_s22 + $0x6e4] ss:$8 sps:$4 sm:$0xff]  }
 0x1ea   : > { %5371 = vmatprep.subr.bf16.mxu0 %v8669_v43  ;;  %5729 = vmatprep.mubr.bf16.mxu1 %v11137_v29  ;;  %v8675_v43 = vld [vmem:[%s8814_s22 + $0x3d4] ss:$8 sps:$4 sm:$0xff]   ;;  %v8676_v29 = vld [vmem:[%s8814_s22 + $0x3d0] ss:$8 sps:$4 sm:$0xff]  }
 0x1eb   : > { %5291 = vmatmul.mubr.bf16.gmra.mrb[64].mxu0 %v11136_v56  ;;  %5801 = vmatpush1.bf16.msra.mxu1 %v8471_v3  ;;  %v11142_v3 = vld [vmem:[#allocation16_spill] sm:$0xff]  ;;  %v8483_v56 = vld [vmem:[%s8814_s22 + $0x6e0] ss:$8 sps:$4 sm:$0xff]  }
 0x1ec   : > { %5300 = vmatprep.mubr.bf16.mxu0 %v11138_v6  ;;  %5802 = vmatprep.subr.bf16.mxu1 %v8476_v36  ;;  %v8674_v36 = vld [vmem:[%s8814_s22 + $0x3c0] ss:$8 sps:$4 sm:$0xff]   ;;  %v8488_v6 = vld [vmem:[%s8814_s22 + $0x6f4] ss:$8 sps:$4 sm:$0xff]  }
 0x1ed   : > { %5372 = vmatpush1.bf16.msra.mxu0 %v8670_v57  ;;  %v8677_v57 = vld [vmem:[%s8814_s22 + $0x3e4] ss:$8 sps:$4 sm:$0xff]  }
 0x1ee   : > { %5373 = vmatprep.subr.bf16.mxu0 %v8671_v13  ;;  %v11145_v13 = vld [vmem:[#allocation22_spill] sm:$0xff] }
 0x1ef   : > { %5803 = vmatpush1.bf16.msra.mxu1 %v8474_v49  ;;  %v11143_v49 = vld [vmem:[#allocation21_spill] sm:$0xff] }
 0x1f0   : > { %5804 = vmatprep.subr.bf16.mxu1 %v8479_v17  ;;  %v11144_v17 = vld [vmem:[#allocation19_spill] sm:$0xff] }
 0x1f1   : > { %5374 = vmatpush1.bf16.msra.mxu0 %v8672_v53  ;;  %5730 = vmatmul.mubr.bf16.gmra.mrb[12].mxu1 %v11139_v45  ;;  %v8486_v53 = vld [vmem:[%s8814_s22 + $0x6f0] ss:$8 sps:$4 sm:$0xff]   ;;  %v8491_v45 = vld [vmem:[%s8814_s22 + $0x704] ss:$8 sps:$4 sm:$0xff]  }
 0x1f2   : > { %5375 = vmatprep.subr.bf16.mxu0 %v8673_v34  ;;  %5739 = vmatprep.mubr.bf16.mxu1 %v11141_v41  ;;  %v8679_v34 = vld [vmem:[%s8814_s22 + $0x3f4] ss:$8 sps:$4 sm:$0xff]  }
 0x1f3   : > { %5301 = vmatmul.mubr.bf16.gmra.mrb[68].mxu0 %v11140_v26  ;;  %5805 = vmatpush1.bf16.msra.mxu1 %v8477_v8  ;;  %v11146_v8 = vld [vmem:[#allocation20_spill] sm:$0xff]  ;;  %v11147_v41 = vld [vmem:[#allocation25_spill] sm:$0xff] }
 0x1f4   : > { %5310 = vmatprep.mubr.bf16.mxu0 %v11142_v3  ;;  %5806 = vmatprep.subr.bf16.mxu1 %v8482_v30  ;;  %v8678_v30 = vld [vmem:[%s8814_s22 + $0x3e0] ss:$8 sps:$4 sm:$0xff]   ;;  %v8680_v26 = vld [vmem:[%s8814_s22 + $0x3f0] ss:$8 sps:$4 sm:$0xff]  }
 0x1f5   : > { %5376 = vmatpush1.bf16.msra.mxu0 %v8674_v36  ;;  %v11148_v3 = vld [vmem:[#allocation23_spill] sm:$0xff]  ;;  %v11150_v36 = vld [vmem:[#allocation24_spill] sm:$0xff] }
 0x1f6   : > { %5377 = vmatprep.subr.bf16.mxu0 %v8675_v43 }
 0x1f7   : > { %5807 = vmatpush1.bf16.msra.mxu1 %v8480_v27  ;;  %v11149_v27 = vld [vmem:[#allocation28_spill] sm:$0xff] }
 0x1f8   : > { %5808 = vmatprep.subr.bf16.mxu1 %v8485_v4  ;;  %v1889_v4 = vld [vmem:[#allocation2 + $0x18] sm:$0xff] }
 0x1f9   : > { %5378 = vmatpush1.bf16.msra.mxu0 %v8676_v29  ;;  %5740 = vmatmul.mubr.bf16.gmra.mrb[16].mxu1 %v11143_v49  ;;  %v1928_v43 = vshrl.u32 %v1889_v4, 16  ;;  %v11151_v29 = vld [vmem:[#allocation29_spill] sm:$0xff]  ;;  %v11153_v49 = vld [vmem:[#allocation30_spill] sm:$0xff] }
 0x1fa   : > { %5379 = vmatprep.subr.bf16.mxu0 %v8677_v57  ;;  %5749 = vmatprep.mubr.bf16.mxu1 %v11145_v13  ;;  %v1769_v57 = vld [vmem:[#allocation2 + $0xb0] sm:$0xf] }
 0x1fb   : > { %5311 = vmatmul.mubr.bf16.gmra.mrb[72].mxu0 %v11144_v17  ;;  %5809 = vmatpush1.bf16.msra.mxu1 %v8483_v56  ;;  %v1887_v56 = vld [vmem:[#allocation2 + $0x8] sm:$0x80]  ;;  %v1930_v13 = vrot.slane %v1928_v43, 7 }
 0x1fc   : > { %5320 = vmatprep.mubr.bf16.mxu0 %v11146_v8  ;;  %5810 = vmatprep.subr.bf16.mxu1 %v8488_v6  ;;  %v11152_v6 = vld [vmem:[#allocation26_spill] sm:$0xff]  ;;  %v1924_v17 = vshrl.u32 %v1887_v56, 16  ;;  %v1888_v8 = vld [vmem:[#allocation2 + $0x10] sm:$0xff]  ;;  %v1912_v56 = vshrl.u32 %v1886_v7, 16 }
 0x1fd   : > { %5380 = vmatpush1.bf16.msra.mxu0 %v8678_v30  ;;  %v1931_v30 = vshll.u32 %v1889_v4, 16 }
 0x1fe   : > { %5381 = vmatprep.subr.bf16.mxu0 %v8679_v34  ;;  %v1838_v34 = vrot.slane %v1769_v57, 4 }
 0x1ff   : > { %5811 = vmatpush1.bf16.msra.mxu1 %v8486_v53  ;;  %v11154_v53 = vld [vmem:[#allocation27_spill] sm:$0xff] }
 0x200   : > { %5923 = vmatprep.subr.bf16.mxu1 %v8491_v45  ;;  %v2437_v45 = vld [vmem:[#allocation2 + $0x18] sm:$0xf0] }
 0x201   : > { %5382 = vmatpush1.bf16.msra.mxu0 %v8680_v26  ;;  %5750 = vmatmul.mubr.bf16.gmra.mrb[20].mxu1 %v11147_v41  ;;  %v11155_v26 = vld [vmem:[#allocation32_spill] sm:$0xff] }
 0x202   : > { %5759 = vmatprep.mubr.bf16.mxu1 %v11149_v27  ;;  %v2488_v41 = vrot.slane %v11155_v26, 4  ;;  %v1926_v27 = vrot.slane %v1924_v17, 7  ;;  %v11159_v17 = vshrl.u32 %v11155_v26, 16  ;;  %v11160_v7 = vshll.u32 %v11155_v26, 16  ;;  %v8492_v26 = vld [vmem:[%s8814_s22 + $0x710] ss:$8 sps:$4 sm:$0xff]  }
 0x203   : > { %5321 = vmatmul.mubr.bf16.gmra.mrb[76].mxu0 %v11148_v3  ;;  %v1916_v3 = vshrl.u32 %v1888_v8, 16 }
 0x204   : > { %5330 = vmatprep.mubr.bf16.mxu0 %v11150_v36  ;;  %v1933_v36 = vor.u32 %v1931_v30, %v1930_v13  ;;  %v1919_v30 = vshll.u32 %v1888_v8, 16 }
 0x205   : > { %v1918_v4 = vrot.slane %v1916_v3, 7 }
 0x206   : > { %v1934_v57 = vsel %vm1910_vm2, %v1926_v27, %v1933_v36  ;;  %v8494_v36 = vld [vmem:[%s8814_s22 + $0x714] ss:$8 sps:$4 sm:$0xff]  }
 0x209   : > { %5760 = vmatmul.mubr.bf16.gmra.mrb[24].mxu1 %v11151_v29  ;;  %v2487_v29 = vrot.slane %v2437_v45, 4  ;;  %v2485_v45 = vrot.slane %v9995_v14, 4 }
 0x20a   : > { %5769 = vmatprep.mubr.bf16.mxu1 %v11153_v49 }
 0x20b   : > { %5331 = vmatmul.mubr.bf16.gmra.mrb[80].mxu0 %v11152_v6  ;;  %v11157_v6 = vrot.slane %v11156_v28, 4  ;;  %v2489_v43 = vsel %vm1795_vm5, %v2487_v29, %v2488_v41  ;;  %v2436_v28 = vld [vmem:[#allocation2 + $0x10] sm:$0xf0]  ;;  %v2492_v29 = vrot.slane %v10021_v22, 4 }
 0x20c   : > { %5340 = vmatprep.mubr.bf16.mxu0 %v11154_v53  ;;  %v1946_v53 = vrot.slane %v11159_v17, 7 }
 0x20d   : > { %v1839_v49 = vsel %vm1795_vm5, %v11157_v6, %v1838_v34  ;;  %v1914_v34 = vrot.slane %v1912_v56, 7  ;;  %v2484_v6 = vrot.slane %v2436_v28, 4  ;;  %v2493_v8 = vsel %vm1795_vm5, %v2488_v41, %v2492_v29 }
 0x20e   : > { %v1949_v3 = vor.u32 %v11160_v7, %v1946_v53  ;;  %v11161_v56 = vshrl.u32 %v9995_v14, 16  ;;  %v2490_v7 = vrot.slane %v10033_v50, 4  ;;  %v11162_v41 = vshll.u32 %v9995_v14, 16 }
 0x20f   : > { %v2486_v27 = vsel %vm1795_vm5, %v2484_v6, %v2485_v45  ;;  %v2496_v6 = vrot.slane %v10041_v33, 4  ;;  %v8682_v33 = vld [vmem:[#allocation2 + $0x30] sm:$0xff] }
 0x210   : > { %v1950_v17 = vsel %vm1910_vm2, %v1930_v13, %v1949_v3  ;;  %v8495_v13 = vld [vmem:[%s8814_s22 + $0x720] ss:$8 sps:$4 sm:$0xff]   ;;  %v2491_v3 = vsel %vm1795_vm5, %v2485_v45, %v2490_v7  ;;  %v2494_v45 = vrot.slane %v10068_v51, 4 }
 0x211   : > { %5770 = vmatmul.mubr.bf16.gmra.mrb[28].mxu1 %v11158_v12  ;;  %v1921_v12 = vor.u32 %v1919_v30, %v1918_v4  ;;  %v8681_v30 = vld [vmem:[#allocation2 + $0x38] sm:$0xff]  ;;  %v2497_v50 = vsel %vm1795_vm5, %v2492_v29, %v2496_v6  ;;  %v2500_v29 = vrot.slane %v10084_v55, 4  ;;  %v2498_v55 = vrot.slane %v10086_v35, 4 }
 0x212   : > { %5812 = vmatprep.mubr.bf16.mxu1 %v2489_v43  ;;  %v1963_v28 = vshll.u32 %v8681_v30, 16  ;;  %v8510_v35 = vld [vmem:[%s8814_s22 + $0x770] ss:$8 sps:$4 sm:$0xff]  }
 0x213   : > { %5341 = vmatmul.mubr.bf16.gmra.mrb[84].mxu0 %v1839_v49  ;;  %v8489_v49 = vld [vmem:[%s8814_s22 + $0x700] ss:$8 sps:$4 sm:$0xff]   ;;  %v1922_v43 = vsel %vm1910_vm2, %v1914_v34, %v1921_v12  ;;  %v8497_v34 = vld [vmem:[%s8814_s22 + $0x724] ss:$8 sps:$4 sm:$0xff]   ;;  %v2501_v51 = vsel %vm1795_vm5, %v2496_v6, %v2500_v29  ;;  %v8512_v6 = vld [vmem:[%s8814_s22 + $0x774] ss:$8 sps:$4 sm:$0xff]  }
 0x214   : > { %5383 = vmatprep.mubr.bf16.mxu0 %v1934_v57  ;;  %v1938_v57 = vrot.slane %v11161_v56, 7  ;;  %v1955_v56 = vshll.u32 %v8682_v33, 16 }
 0x216   : > { %v1941_v12 = vor.u32 %v11162_v41, %v1938_v57 }
 0x219   : > { %5813 = vmatmul.mubr.bf16.vlgmr.msra.gmra.mrb[32].mxu1 %v2486_v27  ;;  %v11163_v27 = vld [vmem:[#allocation7_spill] sm:$0xff] }
 0x21a   : > { %5822 = vmatprep.mubr.bf16.mxu1 %v2493_v8  ;;  %5924 = vmatpush1.bf16.msra.mxu1 %v8489_v49  ;;  %v8500_v49 = vld [vmem:[%s8814_s22 + $0x734] ss:$8 sps:$4 sm:$0xff]   ;;  %v1942_v8 = vsel %vm1910_vm2, %v1918_v4, %v1941_v12  ;;  %v8504_v12 = vld [vmem:[%s8814_s22 + $0x750] ss:$8 sps:$4 sm:$0xff]  }
 0x21b   : > { %5384 = vmatmul.mubr.bf16.vlgmr.msra.gmra.mrb[44].mxu0 %v1922_v43  ;;  %5925 = vmatprep.subr.bf16.mxu1 %v8494_v36  ;;  %v1965_v43 = vor.u32 %v1963_v28, %v11163_v27  ;;  %v11164_v4 = vld [vmem:[#allocation8_spill] sm:$0xff]  ;;  %v8501_v28 = vld [vmem:[%s8814_s22 + $0x740] ss:$8 sps:$4 sm:$0xff]   ;;  %v8509_v27 = vld [vmem:[%s8814_s22 + $0x764] ss:$8 sps:$4 sm:$0xff]  }
 0x21c   : > { %5393 = vmatprep.mubr.bf16.mxu0 %v1950_v17  ;;  %v8498_v17 = vld [vmem:[%s8814_s22 + $0x730] ss:$8 sps:$4 sm:$0xff]   ;;  %v1957_v30 = vor.u32 %v1955_v56, %v11164_v4  ;;  %v2506_v56 = vrot.slane %v10111_v1, 4  ;;  %v8524_v4 = vld [vmem:[%s8814_s22 + $0x7b4] ss:$8 sps:$4 sm:$0xff]  }
 0x21d   : > { %v1966_v36 = vsel %vm1910_vm2, %v1946_v53, %v1965_v43  ;;  %v2495_v53 = vsel %vm1795_vm5, %v2490_v7, %v2494_v45  ;;  %v2504_v7 = vrot.slane %v10091_v52, 4  ;;  %v8507_v43 = vld [vmem:[%s8814_s22 + $0x760] ss:$8 sps:$4 sm:$0xff]   ;;  %v8515_v52 = vld [vmem:[%s8814_s22 + $0x784] ss:$8 sps:$4 sm:$0xff]  }
 0x21e   : > { %5926 = vmatpush1.bf16.msra.mxu1 %v8492_v26  ;;  %v8503_v26 = vld [vmem:[%s8814_s22 + $0x744] ss:$8 sps:$4 sm:$0xff]   ;;  %v1958_v41 = vsel %vm1910_vm2, %v1938_v57, %v1957_v30  ;;  %v2499_v57 = vsel %vm1795_vm5, %v2494_v45, %v2498_v55  ;;  %v8519_v45 = vld [vmem:[%s8814_s22 + $0x7a0] ss:$8 sps:$4 sm:$0xff]   ;;  %v8522_v1 = vld [vmem:[%s8814_s22 + $0x7b0] ss:$8 sps:$4 sm:$0xff]  }
 0x21f   : > { %5927 = vmatprep.subr.bf16.mxu1 %v8497_v34  ;;  %v8506_v34 = vld [vmem:[%s8814_s22 + $0x754] ss:$8 sps:$4 sm:$0xff]  }
 0x221   : > { %5823 = vmatmul.mubr.bf16.gmra.mrb[36].mxu1 %v2491_v3  ;;  %v2502_v3 = vrot.slane %v10099_v24, 4  ;;  %v8516_v24 = vld [vmem:[%s8814_s22 + $0x790] ss:$8 sps:$4 sm:$0xff]  }
 0x222   : > { %5832 = vmatprep.mubr.bf16.mxu1 %v2497_v50  ;;  %5928 = vmatpush1.bf16.msra.mxu1 %v8495_v13  ;;  %v2505_v13 = vsel %vm1795_vm5, %v2500_v29, %v2504_v7  ;;  %v2510_v29 = vrot.slane %v10133_v2, 4  ;;  %v8528_v2 = vld [vmem:[%s8814_s22 + $0x7d0] ss:$8 sps:$4 sm:$0xff]  }
 0x223   : > { %5394 = vmatmul.mubr.bf16.gmra.mrb[48].mxu0 %v1942_v8  ;;  %5929 = vmatprep.subr.bf16.mxu1 %v8500_v49  ;;  %v2508_v49 = vrot.slane %v10109_v5, 4  ;;  %v8513_v8 = vld [vmem:[%s8814_s22 + $0x780] ss:$8 sps:$4 sm:$0xff]   ;;  %v2503_v50 = vsel %vm1795_vm5, %v2498_v55, %v2502_v3  ;;  %v8521_v5 = vld [vmem:[%s8814_s22 + $0x7a4] ss:$8 sps:$4 sm:$0xff]   ;;  %v2520_v55 = vrot.slane %v10157_v61, 4 }
 0x224   : > { %5403 = vmatprep.mubr.bf16.mxu0 %v1966_v36  ;;  %v8518_v36 = vld [vmem:[%s8814_s22 + $0x794] ss:$8 sps:$4 sm:$0xff]  }
 0x225   : > { %v2509_v33 = vsel %vm1795_vm5, %v2504_v7, %v2508_v49 }
 0x226   : > { %5930 = vmatpush1.bf16.msra.mxu1 %v8498_v17  ;;  %v2512_v17 = vrot.slane %v10117_v0, 4  ;;  %v8527_v0 = vld [vmem:[%s8814_s22 + $0x7c4] ss:$8 sps:$4 sm:$0xff]  }
 0x227   : > { %5931 = vmatprep.subr.bf16.mxu1 %v8503_v26  ;;  %v2507_v26 = vsel %vm1795_vm5, %v2502_v3, %v2506_v56 }
 0x228   : > { %v2513_v30 = vsel %vm1795_vm5, %v2508_v49, %v2512_v17  ;;  %v2522_v49 = vrot.slane %v10180_v63, 4 }
 0x229   : > { %5833 = vmatmul.mubr.bf16.gmra.mrb[40].mxu1 %v2495_v53  ;;  %v8525_v53 = vld [vmem:[%s8814_s22 + $0x7c0] ss:$8 sps:$4 sm:$0xff]  }
 0x22a   : > { %5842 = vmatprep.mubr.bf16.mxu1 %v2501_v51  ;;  %5932 = vmatpush1.bf16.msra.mxu1 %v8501_v28  ;;  %v2516_v28 = vrot.slane %v10140_v37, 4  ;;  %v8533_v37 = vld [vmem:[%s8814_s22 + $0x7e4] ss:$8 sps:$4 sm:$0xff]  }
 0x22b   : > { %5404 = vmatmul.mubr.bf16.gmra.mrb[52].mxu0 %v1958_v41  ;;  %5933 = vmatprep.subr.bf16.mxu1 %v8506_v34  ;;  %v2511_v34 = vsel %vm1795_vm5, %v2506_v56, %v2510_v29  ;;  %v8530_v41 = vld [vmem:[%s8814_s22 + $0x7d4] ss:$8 sps:$4 sm:$0xff]  }
 0x22c   : > { %v2517_v51 = vsel %vm1795_vm5, %v2512_v17, %v2516_v28  ;;  %v2574_v17 = vld [vmem:[#allocation2 + $0x10] sm:$0xf0] }
 0x22d   : > { %v2603_v63 = vshll.u32 %v2574_v17, 16 }
 0x22e   : > { %5934 = vmatpush1.bf16.msra.mxu1 %v8504_v12  ;;  %v2514_v12 = vrot.slane %v10155_v11, 4  ;;  %v8539_v11 = vld [vmem:[%s8814_s22 + $0x804] ss:$8 sps:$4 sm:$0xff]  }
 0x22f   : > { %5935 = vmatprep.subr.bf16.mxu1 %v8509_v27  ;;  %v8531_v27 = vld [vmem:[%s8814_s22 + $0x7e0] ss:$8 sps:$4 sm:$0xff]  }
 0x230   : > { %v2515_v7 = vsel %vm1795_vm5, %v2510_v29, %v2514_v12 }
 0x231   : > { %5843 = vmatmul.mubr.bf16.gmra.mrb[0].mxu1 %v2499_v57  ;;  %v2521_v57 = vsel %vm1795_vm5, %v2516_v28, %v2520_v55  ;;  %v2605_v28 = vrot.slane %v2603_v63, 5  ;;  %v8567_v63 = vld [vmem:[%s8814_s22 + $0x8a0] ss:$8 sps:$4 sm:$0xff]  }
 0x232   : > { %5852 = vmatprep.mubr.bf16.mxu1 %v2505_v13  ;;  %5936 = vmatpush1.bf16.msra.mxu1 %v8507_v43  ;;  %v8536_v43 = vld [vmem:[%s8814_s22 + $0x7f4] ss:$8 sps:$4 sm:$0xff]   ;;  %v2518_v13 = vrot.slane %v10165_v59, 4 }
 0x233   : > { %5937 = vmatprep.subr.bf16.mxu1 %v8512_v6  ;;  %v8534_v6 = vld [vmem:[%s8814_s22 + $0x7f0] ss:$8 sps:$4 sm:$0xff]  }
 0x234   : > { %v2519_v61 = vsel %vm1795_vm5, %v2514_v12, %v2518_v13  ;;  %v2523_v59 = vsel %vm1795_vm5, %v2518_v13, %v2522_v49  ;;  %v11167_v12 = vld [vmem:[#allocation35_spill] sm:$0xff] }
 0x235   : > { %v8551_v13 = vld [vmem:[%s8814_s22 + $0x844] ss:$8 sps:$4 sm:$0xff]  }
 0x236   : > { %5938 = vmatpush1.bf16.msra.mxu1 %v8510_v35  ;;  %v2524_v35 = vrot.slane %v10178_v18, 4 }
 0x237   : > { %5939 = vmatprep.subr.bf16.mxu1 %v8515_v52  ;;  %v2459_v52 = vld [vmem:[#allocation2 + $0xc8] sm:$0xf] }
 0x238   : > { %v2525_v3 = vsel %vm1795_vm5, %v2520_v55, %v2524_v35  ;;  %v8545_v55 = vld [vmem:[%s8814_s22 + $0x824] ss:$8 sps:$4 sm:$0xff]  }
 0x239   : > { %5853 = vmatmul.mubr.bf16.gmra.mrb[4].mxu1 %v2503_v50  ;;  %v2528_v50 = vrot.slane %v2459_v52, 4  ;;  %v8552_v52 = vld [vmem:[%s8814_s22 + $0x850] ss:$8 sps:$4 sm:$0xff]  }
 0x23a   : > { %5862 = vmatprep.mubr.bf16.mxu1 %v2509_v33  ;;  %5940 = vmatpush1.bf16.msra.mxu1 %v8513_v8  ;;  %v2575_v8 = vld [vmem:[#allocation2 + $0x18] sm:$0xf0] }
 0x23b   : > { %5941 = vmatprep.subr.bf16.mxu1 %v8518_v36  ;;  %v2617_v36 = vshrl.u32 %v2575_v8, 16  ;;  %v2620_v33 = vshll.u32 %v2575_v8, 16  ;;  %v2529_v18 = vsel %vm1795_vm5, %v2524_v35, %v2528_v50  ;;  %v8554_v35 = vld [vmem:[%s8814_s22 + $0x854] ss:$8 sps:$4 sm:$0xff]   ;;  %v8555_v8 = vld [vmem:[%s8814_s22 + $0x860] ss:$8 sps:$4 sm:$0xff]  }
 0x23c   : > { %v8560_v50 = vld [vmem:[%s8814_s22 + $0x874] ss:$8 sps:$4 sm:$0xff]  }
 0x23d   : > { %v2619_v56 = vrot.slane %v2617_v36, 4  ;;  %v11172_v36 = vld [vmem:[#allocation40_spill] sm:$0xff] }
 0x23e   : > { %5942 = vmatpush1.bf16.msra.mxu1 %v8516_v24  ;;  %v2458_v24 = vld [vmem:[#allocation2 + $0xc0] sm:$0xf] }
 0x23f   : > { %5943 = vmatprep.subr.bf16.mxu1 %v8521_v5  ;;  %v2622_v5 = vrot.slane %v2620_v33, 5  ;;  %v11173_v33 = vld [vmem:[#allocation41_spill] sm:$0xff] }
 0x241   : > { %5863 = vmatmul.mubr.bf16.gmra.mrb[8].mxu1 %v2507_v26  ;;  %v2600_v26 = vshrl.u32 %v2574_v17, 16  ;;  %v11175_v17 = vld [vmem:[#allocation43_spill] sm:$0xff] }
 0x242   : > { %5872 = vmatprep.mubr.bf16.mxu1 %v2513_v30  ;;  %5944 = vmatpush1.bf16.msra.mxu1 %v8519_v45  ;;  %v2526_v45 = vrot.slane %v2458_v24, 4  ;;  %v8561_v24 = vld [vmem:[%s8814_s22 + $0x880] ss:$8 sps:$4 sm:$0xff]  }
 0x243   : > { %5945 = vmatprep.subr.bf16.mxu1 %v8524_v4  ;;  %v2623_v4 = vor.u32 %v2622_v5, %v2619_v56  ;;  %v8566_v56 = vld [vmem:[%s8814_s22 + $0x894] ss:$8 sps:$4 sm:$0xff]   ;;  %v11174_v5 = vld [vmem:[#allocation42_spill] sm:$0xff] }
 0x244   : > { %v2527_v30 = vsel %vm1795_vm5, %v2522_v49, %v2526_v45  ;;  %v8557_v49 = vld [vmem:[%s8814_s22 + $0x864] ss:$8 sps:$4 sm:$0xff]   ;;  %v8564_v45 = vld [vmem:[%s8814_s22 + $0x890] ss:$8 sps:$4 sm:$0xff]  }
 0x246   : > { %5946 = vmatpush1.bf16.msra.mxu1 %v8522_v1  ;;  %v11165_v1 = vld [vmem:[#allocation33_spill] sm:$0xff] }
 0x247   : > { %5947 = vmatprep.subr.bf16.mxu1 %v8527_v0  ;;  %v2632_v29 = vsel %vm2598_vm6, %v2623_v4, %v11165_v1  ;;  %v2602_v0 = vrot.slane %v2600_v26, 4  ;;  %v8569_v26 = vld [vmem:[%s8814_s22 + $0x8a4] ss:$8 sps:$4 sm:$0xff]   ;;  %v8572_v4 = vld [vmem:[%s8814_s22 + $0x8b4] ss:$8 sps:$4 sm:$0xff]  }
 0x248   : > { %v8585_v1 = vld [vmem:[%s8980_s26] ss:$8 sps:$4 sm:$0xff]  }
 0x249   : > { %5873 = vmatmul.mubr.bf16.gmra.mrb[12].mxu1 %v2511_v34  ;;  %v8537_v34 = vld [vmem:[%s8814_s22 + $0x800] ss:$8 sps:$4 sm:$0xff]  }
 0x24a   : > { %5882 = vmatprep.mubr.bf16.mxu1 %v2517_v51  ;;  %5948 = vmatpush1.bf16.msra.mxu1 %v8525_v53  ;;  %v2606_v53 = vor.u32 %v2605_v28, %v2602_v0  ;;  %v11166_v51 = vld [vmem:[#allocation34_spill] sm:$0xff]  ;;  %v11177_v0 = vld [vmem:[#allocation45_spill] sm:$0xff] }
 0x24b   : > { %5949 = vmatprep.subr.bf16.mxu1 %v8530_v41  ;;  %v8542_v41 = vld [vmem:[%s8814_s22 + $0x814] ss:$8 sps:$4 sm:$0xff]   ;;  %v8570_v28 = vld [vmem:[%s8814_s22 + $0x8b0] ss:$8 sps:$4 sm:$0xff]  }
 0x24e   : > { %5950 = vmatpush1.bf16.msra.mxu1 %v8528_v2  ;;  %v2615_v2 = vsel %vm2598_vm6, %v2606_v53, %v11166_v51  ;;  %v8590_v53 = vld [vmem:[%s8980_s26 + $0x14] ss:$8 sps:$4 sm:$0xff]   ;;  %v8593_v51 = vld [vmem:[%s8980_s26 + $0x24] ss:$8 sps:$4 sm:$0xff]  }
 0x24f   : > { %5951 = vmatprep.subr.bf16.mxu1 %v8533_v37  ;;  %v8540_v37 = vld [vmem:[%s8814_s22 + $0x810] ss:$8 sps:$4 sm:$0xff]  }
 0x251   : > { %5883 = vmatmul.mubr.bf16.gmra.mrb[16].mxu1 %v2515_v7  ;;  %v8548_v7 = vld [vmem:[%s8814_s22 + $0x834] ss:$8 sps:$4 sm:$0xff]  }
 0x252   : > { %5892 = vmatprep.mubr.bf16.mxu1 %v2521_v57  ;;  %5952 = vmatpush1.bf16.msra.mxu1 %v8531_v27  ;;  %v8543_v27 = vld [vmem:[%s8814_s22 + $0x820] ss:$8 sps:$4 sm:$0xff]   ;;  %v11169_v57 = vld [vmem:[#allocation37_spill] sm:$0xff] }
 0x253   : > { %5953 = vmatprep.subr.bf16.mxu1 %v8536_v43  ;;  %v11168_v43 = vld [vmem:[#allocation36_spill] sm:$0xff] }
 0x256   : > { %5954 = vmatpush1.bf16.msra.mxu1 %v8534_v6  ;;  %v8546_v6 = vld [vmem:[%s8814_s22 + $0x830] ss:$8 sps:$4 sm:$0xff]  }
 0x257   : > { %6066 = vmatprep.subr.bf16.mxu1 %v8539_v11  ;;  %v8549_v11 = vld [vmem:[%s8814_s22 + $0x840] ss:$8 sps:$4 sm:$0xff]  }
 0x259   : > { %5893 = vmatmul.mubr.bf16.gmra.mrb[20].mxu1 %v2519_v61  ;;  %v11170_v61 = vld [vmem:[#allocation38_spill] sm:$0xff] }
 0x25a   : > { %5902 = vmatprep.mubr.bf16.mxu1 %v2525_v3  ;;  %v11171_v3 = vld [vmem:[#allocation39_spill] sm:$0xff] }
 0x261   : > { %5903 = vmatmul.mubr.bf16.gmra.mrb[24].mxu1 %v2523_v59  ;;  %v8558_v59 = vld [vmem:[%s8814_s22 + $0x870] ss:$8 sps:$4 sm:$0xff]  }
 0x262   : > { %5912 = vmatprep.mubr.bf16.mxu1 %v2529_v18  ;;  %v8563_v18 = vld [vmem:[%s8814_s22 + $0x884] ss:$8 sps:$4 sm:$0xff]  }
 0x269   : > { %5913 = vmatmul.mubr.bf16.gmra.mrb[28].mxu1 %v2527_v30  ;;  %v11176_v30 = vld [vmem:[#allocation44_spill] sm:$0xff] }
 0x26a   : > { %5955 = vmatprep.mubr.bf16.mxu1 %v2632_v29  ;;  %v8587_v29 = vld [vmem:[%s8980_s26 + $0x4] ss:$8 sps:$4 sm:$0xff]  }
 0x26b   : > { %6579 = vmatprep.subr.bf16.mxu0 %v8587_v29  ;;  %v8617_v29 = vld [vmem:[%s8980_s26 + $0xa4] ss:$8 sps:$4 sm:$0xff]  }
 0x26c   : > { %6580 = vmatpush1.bf16.msra.mxu0 %v8585_v1 }
 0x26d   : > { %6581 = vmatprep.subr.bf16.mxu0 %v8590_v53 }
 0x271   : > { %5956 = vmatmul.mubr.bf16.vlgmr.msra.gmra.mrb[32].mxu1 %v2615_v2  ;;  %v8573_v2 = vld [vmem:[%s8814_s22 + $0x8c0] ss:$8 sps:$4 sm:$0xff]  }
 0x272   : > { %5965 = vmatprep.mubr.bf16.mxu1 %v11167_v12  ;;  %6067 = vmatpush1.bf16.msra.mxu1 %v8537_v34  ;;  %v8575_v34 = vld [vmem:[%s8814_s22 + $0x8c4] ss:$8 sps:$4 sm:$0xff]   ;;  %v8578_v12 = vld [vmem:[%s8814_s22 + $0x8d4] ss:$8 sps:$4 sm:$0xff]  }
 0x273   : > { %6068 = vmatprep.subr.bf16.mxu1 %v8542_v41  ;;  %v8588_v41 = vld [vmem:[%s8980_s26 + $0x10] ss:$8 sps:$4 sm:$0xff]  }
 0x274   : > { %6582 = vmatpush1.bf16.msra.mxu0 %v8588_v41  ;;  %v8620_v41 = vld [vmem:[%s8980_s26 + $0xb4] ss:$8 sps:$4 sm:$0xff]  }
 0x275   : > { %6583 = vmatprep.subr.bf16.mxu0 %v8593_v51  ;;  %v2857_v51 = vld [vmem:[#allocation2 + $0x10] sm:$0xe0] }
 0x276   : > { %6069 = vmatpush1.bf16.msra.mxu1 %v8540_v37  ;;  %v8591_v37 = vld [vmem:[%s8980_s26 + $0x20] ss:$8 sps:$4 sm:$0xff]  }
 0x277   : > { %6070 = vmatprep.subr.bf16.mxu1 %v8545_v55  ;;  %v11178_v55 = vld [vmem:[#allocation46_spill] sm:$0xff] }
 0x278   : > { %6584 = vmatpush1.bf16.msra.mxu0 %v8591_v37  ;;  %v8623_v37 = vld [vmem:[%s8980_s26 + $0xc4] ss:$8 sps:$4 sm:$0xff]  }
 0x279   : > { %5966 = vmatmul.mubr.bf16.gmra.mrb[36].mxu1 %v11168_v43  ;;  %v8576_v43 = vld [vmem:[%s8814_s22 + $0x8d0] ss:$8 sps:$4 sm:$0xff]  }
 0x27a   : > { %5975 = vmatprep.mubr.bf16.mxu1 %v11169_v57  ;;  %6071 = vmatpush1.bf16.msra.mxu1 %v8543_v27  ;;  %v8596_v27 = vld [vmem:[%s8980_s26 + $0x34] ss:$8 sps:$4 sm:$0xff]   ;;  %v8581_v57 = vld [vmem:[%s8814_s22 + $0x8e4] ss:$8 sps:$4 sm:$0xff]  }
 0x27b   : > { %6072 = vmatprep.subr.bf16.mxu1 %v8548_v7  ;;  %v11179_v7 = vld [vmem:[#allocation47_spill] sm:$0xff]  ;;  %6585 = vmatprep.subr.bf16.mxu0 %v8596_v27  ;;  %v2906_v27 = vrot.slane %v2857_v51, 5  ;;  %v11186_v51 = vld [vmem:[#allocation5_spill] sm:$0xff] }
 0x27e   : > { %6073 = vmatpush1.bf16.msra.mxu1 %v8546_v6  ;;  %v8594_v6 = vld [vmem:[%s8980_s26 + $0x30] ss:$8 sps:$4 sm:$0xff]  }
 0x27f   : > { %6074 = vmatprep.subr.bf16.mxu1 %v8551_v13  ;;  %v8599_v13 = vld [vmem:[%s8980_s26 + $0x44] ss:$8 sps:$4 sm:$0xff]   ;;  %6586 = vmatpush1.bf16.msra.mxu0 %v8594_v6  ;;  %v8621_v6 = vld [vmem:[%s8980_s26 + $0xc0] ss:$8 sps:$4 sm:$0xff]  }
 0x280   : > { %6587 = vmatprep.subr.bf16.mxu0 %v8599_v13  ;;  %v11181_v13 = vrot.slane %v10021_v22, 5 }
 0x281   : > { %5976 = vmatmul.mubr.bf16.gmra.mrb[40].mxu1 %v11170_v61  ;;  %v8597_v61 = vld [vmem:[%s8980_s26 + $0x40] ss:$8 sps:$4 sm:$0xff]  }
 0x282   : > { %5985 = vmatprep.mubr.bf16.mxu1 %v11171_v3  ;;  %6075 = vmatpush1.bf16.msra.mxu1 %v8549_v11  ;;  %v8579_v11 = vld [vmem:[%s8814_s22 + $0x8e0] ss:$8 sps:$4 sm:$0xff]   ;;  %v8602_v3 = vld [vmem:[%s8980_s26 + $0x54] ss:$8 sps:$4 sm:$0xff]  }
 0x283   : > { %6076 = vmatprep.subr.bf16.mxu1 %v8554_v35  ;;  %v8584_v35 = vld [vmem:[%s8814_s22 + $0x8f4] ss:$8 sps:$4 sm:$0xff]   ;;  %6588 = vmatpush1.bf16.msra.mxu0 %v8597_v61 }
 0x284   : > { %6589 = vmatprep.subr.bf16.mxu0 %v8602_v3 }
 0x286   : > { %6077 = vmatpush1.bf16.msra.mxu1 %v8552_v52  ;;  %v8582_v52 = vld [vmem:[%s8814_s22 + $0x8f0] ss:$8 sps:$4 sm:$0xff]  }
 0x287   : > { %6078 = vmatprep.subr.bf16.mxu1 %v8557_v49  ;;  %v8600_v49 = vld [vmem:[%s8980_s26 + $0x50] ss:$8 sps:$4 sm:$0xff]  }
 0x288   : > { %6590 = vmatpush1.bf16.msra.mxu0 %v8600_v49 }
 0x289   : > { %5986 = vmatmul.mubr.bf16.gmra.mrb[0].mxu1 %v11172_v36 }
 0x28a   : > { %5995 = vmatprep.mubr.bf16.mxu1 %v11173_v33  ;;  %6079 = vmatpush1.bf16.msra.mxu1 %v8555_v8 }
 0x28b   : > { %6080 = vmatprep.subr.bf16.mxu1 %v8560_v50  ;;  %v8605_v50 = vld [vmem:[%s8980_s26 + $0x64] ss:$8 sps:$4 sm:$0xff]  }
 0x28c   : > { %6591 = vmatprep.subr.bf16.mxu0 %v8605_v50 }
 0x28e   : > { %6081 = vmatpush1.bf16.msra.mxu1 %v8558_v59  ;;  %v8608_v59 = vld [vmem:[%s8980_s26 + $0x74] ss:$8 sps:$4 sm:$0xff]  }
 0x28f   : > { %6082 = vmatprep.subr.bf16.mxu1 %v8563_v18  ;;  %v8606_v18 = vld [vmem:[%s8980_s26 + $0x70] ss:$8 sps:$4 sm:$0xff]  }
 0x291   : > { %5996 = vmatmul.mubr.bf16.gmra.mrb[4].mxu1 %v11174_v5 }
 0x292   : > { %6005 = vmatprep.mubr.bf16.mxu1 %v11175_v17  ;;  %6083 = vmatpush1.bf16.msra.mxu1 %v8561_v24 }
 0x293   : > { %6084 = vmatprep.subr.bf16.mxu1 %v8566_v56  ;;  %v8611_v56 = vld [vmem:[%s8980_s26 + $0x84] ss:$8 sps:$4 sm:$0xff]  }
 0x296   : > { %6085 = vmatpush1.bf16.msra.mxu1 %v8564_v45 }
 0x297   : > { %6086 = vmatprep.subr.bf16.mxu1 %v8569_v26  ;;  %v2860_v26 = vld [vmem:[#allocation2 + $0x28] sm:$0xff] }
 0x298   : > { %v2910_v1 = vrot.slane %v2860_v26, 5 }
 0x299   : > { %6006 = vmatmul.mubr.bf16.gmra.mrb[8].mxu1 %v11176_v30 }
 0x29a   : > { %6015 = vmatprep.mubr.bf16.mxu1 %v11177_v0  ;;  %6087 = vmatpush1.bf16.msra.mxu1 %v8567_v63  ;;  %v2858_v63 = vld [vmem:[#allocation2 + $0x18] sm:$0xe0] }
 0x29b   : > { %6088 = vmatprep.subr.bf16.mxu1 %v8572_v4  ;;  %v8612_v4 = vld [vmem:[%s8980_s26 + $0x90] ss:$8 sps:$4 sm:$0xff]  }
 0x29e   : > { %6089 = vmatpush1.bf16.msra.mxu1 %v8570_v28  ;;  %v2909_v28 = vrot.slane %v2858_v63, 5 }
 0x29f   : > { %6090 = vmatprep.subr.bf16.mxu1 %v8575_v34 }
 0x2a0   : > { %v2911_v34 = vsel %vm2905_vm7, %v2909_v28, %v2910_v1  ;;  %v8624_v28 = vld [vmem:[%s8980_s26 + $0xd0] ss:$8 sps:$4 sm:$0xff]  }
 0x2a1   : > { %6016 = vmatmul.mubr.bf16.gmra.mrb[12].mxu1 %v11178_v55 }
 0x2a2   : > { %6025 = vmatprep.mubr.bf16.mxu1 %v11179_v7  ;;  %6091 = vmatpush1.bf16.msra.mxu1 %v8573_v2  ;;  %v8618_v2 = vld [vmem:[%s8980_s26 + $0xb0] ss:$8 sps:$4 sm:$0xff]  }
 0x2a3   : > { %6092 = vmatprep.subr.bf16.mxu1 %v8578_v12 }
 0x2a6   : > { %6093 = vmatpush1.bf16.msra.mxu1 %v8576_v43 }
 0x2a7   : > { %6094 = vmatprep.subr.bf16.mxu1 %v8581_v57 }
 0x2a9   : > { %6026 = vmatmul.mubr.bf16.gmra.mrb[16].mxu1 %v10207_v46 }
 0x2aa   : > { %6035 = vmatprep.mubr.bf16.mxu1 %v10211_v21  ;;  %6095 = vmatpush1.bf16.msra.mxu1 %v8579_v11  ;;  %v8603_v21 = vld [vmem:[%s8980_s26 + $0x60] ss:$8 sps:$4 sm:$0xff]   ;;  %v2915_v11 = vsel %vm2905_vm7, %v2910_v1, %v11181_v13 }
 0x2ab   : > { %6096 = vmatprep.subr.bf16.mxu1 %v8584_v35  ;;  %6592 = vmatpush1.bf16.msra.mxu0 %v8603_v21 }
 0x2ac   : > { %6593 = vmatprep.subr.bf16.mxu0 %v8608_v59 }
 0x2ae   : > { %v10568_v8 = vpop.f32.mrb[56].mxu0  ;;  %6097 = vmatpush1.bf16.msra.mxu1 %v8582_v52 }
 0x2af   : > { %v10571_v36 = vpop.f32.mrb[57].mxu0  ;;  %6594 = vmatpush1.bf16.msra.mxu0 %v8606_v18 }
 0x2b0   : > { %v10573_v46 = vpop.f32.mrb[58].mxu0  ;;  %6595 = vmatprep.subr.bf16.mxu0 %v8611_v56 }
 0x2b1   : > { %v10575_v33 = vpop.f32.mrb[59].mxu0  ;;  %6036 = vmatmul.mubr.bf16.gmra.mrb[20].mxu1 %v10217_v62  ;;  %v8609_v62 = vld [vmem:[%s8980_s26 + $0x80] ss:$8 sps:$4 sm:$0xff]  }
 0x2b2   : > { %6045 = vmatprep.mubr.bf16.mxu1 %v10220_v9  ;;  %v8614_v9 = vld [vmem:[%s8980_s26 + $0x94] ss:$8 sps:$4 sm:$0xff]  }
 0x2b3   : > { %6596 = vmatpush1.bf16.msra.mxu0 %v8609_v62 }
 0x2b4   : > { %6597 = vmatprep.subr.bf16.mxu0 %v8614_v9 }
 0x2b6   : > { %v10582_v24 = vpop.f32.mrb[60].mxu0 }
 0x2b7   : > { %v10585_v5 = vpop.f32.mrb[61].mxu0  ;;  %6598 = vmatpush1.bf16.msra.mxu0 %v8612_v4 }
 0x2b8   : > { %v10587_v17 = vpop.f32.mrb[62].mxu0  ;;  %6599 = vmatprep.subr.bf16.mxu0 %v8617_v29  ;;  %v11185_v29 = vld [vmem:[#allocation50_spill] sm:$0xff] }
 0x2b9   : > { %v10589_v45 = vpop.f32.mrb[63].mxu0  ;;  %6046 = vmatmul.mubr.bf16.gmra.mrb[24].mxu1 %v10224_v20 }
 0x2ba   : > { %6055 = vmatprep.mubr.bf16.mxu1 %v10246_v54  ;;  %v8615_v54 = vld [vmem:[%s8980_s26 + $0xa0] ss:$8 sps:$4 sm:$0xff]  }
 0x2bb   : > { %6600 = vmatpush1.bf16.msra.mxu0 %v8615_v54  ;;  %v8626_v54 = vld [vmem:[%s8980_s26 + $0xd4] ss:$8 sps:$4 sm:$0xff]  }
 0x2bc   : > { %6601 = vmatprep.subr.bf16.mxu0 %v8620_v41  ;;  %v6265_v41 = vld [vmem:[%s616_s18] sm:$0x3] }
 0x2be   : > { %v10596_v30 = vpop.f32.mrb[64].mxu0 }
 0x2bf   : > { %v10599_v0 = vpop.f32.mrb[65].mxu0  ;;  %6602 = vmatpush1.bf16.msra.mxu0 %v8618_v2 }
 0x2c0   : > { %v10601_v20 = vpop.f32.mrb[66].mxu0  ;;  %6603 = vmatprep.subr.bf16.mxu0 %v8623_v37  ;;  %v11187_v37 = vld [vmem:[#allocation6_spill] sm:$0xff] }
 0x2c1   : > { %v10603_v53 = vpop.f32.mrb[67].mxu0  ;;  %6056 = vmatmul.mubr.bf16.gmra.mrb[28].mxu1 %v10251_v44  ;;  %v11180_v44 = vrot.slane %v9995_v14, 5 }
 0x2c2   : > { %6098 = vmatprep.mubr.bf16.mxu1 %v2911_v34  ;;  %v8629_v34 = vld [vmem:[%s8980_s26 + $0xe4] ss:$8 sps:$4 sm:$0xff]  }
 0x2c3   : > { %v2908_v57 = vsel %vm2905_vm7, %v2906_v27, %v11180_v44  ;;  %6604 = vmatpush1.bf16.msra.mxu0 %v8621_v6 }
 0x2c4   : > { %6605 = vmatprep.subr.bf16.mxu0 %v8626_v54 }
 0x2c6   : > { %v10610_v12 = vpop.f32.mrb[68].mxu0 }
 0x2c7   : > { %v10613_v55 = vpop.f32.mrb[69].mxu0  ;;  %6606 = vmatpush1.bf16.msra.mxu0 %v8624_v28 }
 0x2c8   : > { %v10615_v7 = vpop.f32.mrb[70].mxu0  ;;  %6607 = vmatprep.subr.bf16.mxu0 %v8629_v34 }
 0x2c9   : > { %v10617_v43 = vpop.f32.mrb[71].mxu0  ;;  %6099 = vmatmul.mubr.bf16.vlgmr.msra.gmra.mrb[32].mxu1 %v2908_v57  ;;  %v10708_v57 = vrot.slane %v6265_v41, %v11186_v51 }
 0x2ca   : > { %6108 = vmatprep.mubr.bf16.mxu1 %v2915_v11  ;;  %v10711_v11 = vrot.slane %v6265_v41, %v11187_v37 }
 0x2ce   : > { %v10626_v35 = vpop.f32.mrb[72].mxu0 }
 0x2cf   : > { %v10628_v61 = vpop.f32.mrb[73].mxu0 }
 0x2d0   : > { %v10630_v3 = vpop.f32.mrb[74].mxu0 }
 0x2d1   : > { %v10632_v52 = vpop.f32.mrb[75].mxu0  ;;  %6109 = vmatmul.mubr.bf16.gmra.mrb[36].mxu1 %v10256_v48 }
 0x2d2   : > { %6118 = vmatprep.mubr.bf16.mxu1 %v10261_v40 }
 0x2d6   : > { %v10636_v14 = vpop.f32.mrb[76].mxu0 }
 0x2d7   : > { %v10638_v22 = vpop.f32.mrb[77].mxu0 }
 0x2d8   : > { %v10640_v49 = vpop.f32.mrb[78].mxu0 }
 0x2d9   : > { %v10642_v50 = vpop.f32.mrb[79].mxu0  ;;  %6119 = vmatmul.mubr.bf16.gmra.mrb[40].mxu1 %v10267_v16 }
 0x2da   : > { %6128 = vmatprep.mubr.bf16.mxu1 %v10274_v47 }
 0x2de   : > { %v10646_v21 = vpop.f32.mrb[80].mxu0 }
 0x2df   : > { %v10648_v59 = vpop.f32.mrb[81].mxu0 }
 0x2e0   : > { %v10650_v18 = vpop.f32.mrb[82].mxu0 }
 0x2e1   : > { %v10652_v48 = vpop.f32.mrb[83].mxu0  ;;  %6129 = vmatmul.mubr.bf16.gmra.mrb[0].mxu1 %v10280_v32 }
 0x2e2   : > { %6138 = vmatprep.mubr.bf16.mxu1 %v10283_v10 }
 0x2e6   : > { %v10656_v40 = vpop.f32.mrb[84].mxu0 }
 0x2e7   : > { %v10658_v56 = vpop.f32.mrb[85].mxu0 }
 0x2e8   : > { %v10660_v62 = vpop.f32.mrb[86].mxu0 }
 0x2e9   : > { %v10662_v16 = vpop.f32.mrb[87].mxu0  ;;  %6139 = vmatmul.mubr.bf16.gmra.mrb[4].mxu1 %v10286_v19 }
 0x2ea   : > { %11182 = vst [vmem:[#allocation10_spill] sm:$0xff] %v10662_v16  ;;  %6148 = vmatprep.mubr.bf16.mxu1 %v10291_v39 }
 0x2ee   : > { %v5385_v47 = vpop.f32.mrb[44].mxu0 }
 0x2ef   : > { %v5387_v9 = vpop.f32.mrb[45].mxu0 }
 0x2f0   : > { %v5389_v26 = vpop.f32.mrb[46].mxu0 }
 0x2f1   : > { %v5391_v63 = vpop.f32.mrb[47].mxu0  ;;  %6149 = vmatmul.mubr.bf16.gmra.mrb[8].mxu1 %v10294_v31 }
 0x2f2   : > { %6158 = vmatprep.mubr.bf16.mxu1 %v10297_v38 }
 0x2f6   : > { %v5395_v32 = vpop.f32.mrb[48].mxu0 }
 0x2f7   : > { %v5397_v10 = vpop.f32.mrb[49].mxu0 }
 0x2f8   : > { %v5399_v4 = vpop.f32.mrb[50].mxu0 }
 0x2f9   : > { %v10668_v1 = vpop.f32.mrb[51].mxu0  ;;  %6159 = vmatmul.mubr.bf16.gmra.mrb[12].mxu1 %v10303_v60  ;;  %v11184_v60 = vld [vmem:[#allocation49_spill] sm:$0xff] }
 0x2fa   : > { %6168 = vmatprep.mubr.bf16.mxu1 %v10311_v25  ;;  %v11183_v25 = vld [vmem:[#allocation48_spill] sm:$0xff] }
 0x2fe   : > { %v10672_v19 = vpop.f32.mrb[52].mxu0 }
 0x2ff   : > { %v10674_v39 = vpop.f32.mrb[53].mxu0 }
 0x300   : > { %v10676_v31 = vpop.f32.mrb[54].mxu0 }
 0x301   : > { %v10678_v38 = vpop.f32.mrb[55].mxu0  ;;  %6169 = vmatmul.mubr.bf16.gmra.mrb[16].mxu1 %v10318_v42  ;;  %v8627_v42 = vld [vmem:[%s8980_s26 + $0xe0] ss:$8 sps:$4 sm:$0xff]  }
 0x302   : > { %6178 = vmatprep.mubr.bf16.mxu1 %v10321_v58  ;;  %6608 = vmatpush1.bf16.msra.mxu0 %v8627_v42  ;;  %v8630_v58 = vld [vmem:[%s8980_s26 + $0xf0] ss:$8 sps:$4 sm:$0xff]  }
 0x309   : > { %6179 = vmatmul.mubr.bf16.gmra.mrb[20].mxu1 %v10324_v23  ;;  %v8632_v23 = vld [vmem:[%s8980_s26 + $0xf4] ss:$8 sps:$4 sm:$0xff]   ;;  %s641_s26 = scalar_lea.vmem %s11003_s14, %s9020_s17 }
 0x30a   : > { %6188 = vmatprep.mubr.bf16.mxu1 %v10329_v15  ;;  %6609 = vmatprep.subr.bf16.mxu0 %v8632_v23  ;;  %v6209_v15 = vld [vmem:[%s612_s27] sm:$0x3] }
 0x30b   : > { %6610 = vmatpush1.bf16.msra.mxu0 %v8630_v58  ;;  %v10702_v2 = vrot.slane %v6209_v15, %v11186_v51  ;;  %v10705_v27 = vrot.slane %v6209_v15, %v11187_v37 }
 0x311   : > { %6189 = vmatmul.mubr.bf16.gmra.mrb[24].mxu1 %v11183_v25 }
 0x312   : > { %6198 = vmatprep.mubr.bf16.mxu1 %v11184_v60 }
 0x319   : > { %6199 = vmatmul.mubr.bf16.gmra.mrb[28].mxu1 %v11185_v29 }
 0x39c   : > { %v6100_v44 = vpop.f32.mrb[32].mxu1 }
 0x39d   : > { %v7765_v6 = vadd.f32 %v6100_v44, %v5385_v47  ;;  %v6102_v13 = vpop.f32.mrb[33].mxu1 }
 0x39e   : > { %v7766_v25 = vadd.f32 %v6102_v13, %v5387_v9  ;;  %v6104_v60 = vpop.f32.mrb[34].mxu1 }
 0x39f   : > { %v6221_v29 = vmul.f32 %v7765_v6, %v10702_v2  ;;  %v7767_v28 = vadd.f32 %v6104_v60, %v5389_v26  ;;  %v6106_v54 = vpop.f32.mrb[35].mxu1 }
 0x3a0   : > { %v6222_v34 = vmul.f32 %v7766_v25, %v10705_v27  ;;  %v7768_v42 = vadd.f32 %v6106_v54, %v5391_v63 }
 0x3a1   : > { %v6277_v58 = vadd.f32 %v10708_v57, %v6221_v29  ;;  %v6223_v23 = vmul.f32 %v7767_v28, %v10702_v2 }
 0x3a2   : > { %v6278_v15 = vadd.f32 %v10711_v11, %v6222_v34  ;;  %v6224_v47 = vmul.f32 %v7768_v42, %v10705_v27 }
 0x3a3   : > { %v6279_v41 = vadd.f32 %v10708_v57, %v6223_v23  ;;  %v6321_v13 = vmax.f32 %v6277_v58, 0.0 }
 0x3a4   : > { %v6280_v9 = vadd.f32 %v10711_v11, %v6224_v47  ;;  %v6110_v44 = vpop.f32.mrb[36].mxu1  ;;  %v6322_v37 = vmax.f32 %v6278_v15, 0.0 }
 0x3a5   : > { %v6323_v6 = vmax.f32 %v6279_v41, 0.0  ;;  %v7769_v26 = vadd.f32 %v6110_v44, %v5395_v32  ;;  %v6112_v60 = vpop.f32.mrb[37].mxu1 }
 0x3a6   : > { %v6324_v25 = vmax.f32 %v6280_v9, 0.0  ;;  %v7770_v63 = vadd.f32 %v6112_v60, %v5397_v10  ;;  %v6114_v54 = vpop.f32.mrb[38].mxu1 }
 0x3a7   : > { %v6365_v29 = vpack.c.bf16 %v6323_v6, %v6321_v13  ;;  %v6225_v28 = vmul.f32 %v7769_v26, %v10702_v2  ;;  %v7771_v51 = vadd.f32 %v6114_v54, %v5399_v4  ;;  %v6116_v34 = vpop.f32.mrb[39].mxu1 }
 0x3a8   : > { %v6226_v42 = vmul.f32 %v7770_v63, %v10705_v27  ;;  %v7772_v23 = vadd.f32 %v6116_v34, %v10668_v1  ;;  %v6366_v16 = vpack.c.bf16 %v6324_v25, %v6322_v37 }
 0x3a9   : > { %v6281_v47 = vadd.f32 %v10708_v57, %v6225_v28  ;;  %v6227_v58 = vmul.f32 %v7771_v51, %v10702_v2 }
 0x3aa   : > { %v6282_v32 = vadd.f32 %v10711_v11, %v6226_v42  ;;  %v6228_v15 = vmul.f32 %v7772_v23, %v10705_v27  ;;  %6611 = vmatprep.mubr.bf16.mxu0 %v6366_v16 }
 0x3ab   : > { %v6283_v10 = vadd.f32 %v10708_v57, %v6227_v58  ;;  %6612 = vmatmul.mubr.bf16.vlgmr.msra.gmra.mrb[88].mxu0 %v6365_v29  ;;  %v6325_v9 = vmax.f32 %v6281_v47, 0.0 }
 0x3ac   : > { %v6284_v4 = vadd.f32 %v10711_v11, %v6228_v15  ;;  %v6120_v41 = vpop.f32.mrb[40].mxu1  ;;  %v6326_v13 = vmax.f32 %v6282_v32, 0.0 }
 0x3ad   : > { %v6327_v44 = vmax.f32 %v6283_v10, 0.0  ;;  %v7773_v1 = vadd.f32 %v6120_v41, %v10672_v19  ;;  %v6122_v37 = vpop.f32.mrb[41].mxu1 }
 0x3ae   : > { %v6328_v6 = vmax.f32 %v6284_v4, 0.0  ;;  %v7774_v51 = vadd.f32 %v6122_v37, %v10674_v39  ;;  %v6124_v26 = vpop.f32.mrb[42].mxu1 }
 0x3af   : > { %v6229_v60 = vmul.f32 %v7773_v1, %v10702_v2  ;;  %v7775_v16 = vadd.f32 %v6124_v26, %v10676_v31  ;;  %v6126_v25 = vpop.f32.mrb[43].mxu1  ;;  %v6367_v63 = vpack.c.bf16 %v6327_v44, %v6325_v9 }
 0x3b0   : > { %v6230_v54 = vmul.f32 %v7774_v51, %v10705_v27  ;;  %v7776_v29 = vadd.f32 %v6126_v25, %v10678_v38  ;;  %v6368_v28 = vpack.c.bf16 %v6328_v6, %v6326_v13 }
 0x3b1   : > { %v6285_v34 = vadd.f32 %v10708_v57, %v6229_v60  ;;  %v6231_v19 = vmul.f32 %v7775_v16, %v10702_v2 }
 0x3b2   : > { %v6286_v42 = vadd.f32 %v10711_v11, %v6230_v54  ;;  %v6232_v39 = vmul.f32 %v7776_v29, %v10705_v27  ;;  %6621 = vmatprep.mubr.bf16.mxu0 %v6368_v28 }
 0x3b3   : > { %v6287_v23 = vadd.f32 %v10708_v57, %v6231_v19  ;;  %6622 = vmatmul.mubr.bf16.gmra.mrb[92].mxu0 %v6367_v63  ;;  %v6329_v58 = vmax.f32 %v6285_v34, 0.0 }
 0x3b4   : > { %v6288_v31 = vadd.f32 %v10711_v11, %v6232_v39  ;;  %v6130_v47 = vpop.f32.mrb[0].mxu1  ;;  %v6330_v10 = vmax.f32 %v6286_v42, 0.0 }
 0x3b5   : > { %v6331_v32 = vmax.f32 %v6287_v23, 0.0  ;;  %v7777_v38 = vadd.f32 %v6130_v47, %v10568_v8  ;;  %v6132_v15 = vpop.f32.mrb[1].mxu1 }
 0x3b6   : > { %v6332_v4 = vmax.f32 %v6288_v31, 0.0  ;;  %v7778_v41 = vadd.f32 %v6132_v15, %v10571_v36  ;;  %v6134_v9 = vpop.f32.mrb[2].mxu1 }
 0x3b7   : > { %v6233_v44 = vmul.f32 %v7777_v38, %v10702_v2  ;;  %v7779_v1 = vadd.f32 %v6134_v9, %v10573_v46  ;;  %v6136_v37 = vpop.f32.mrb[3].mxu1  ;;  %v6369_v13 = vpack.c.bf16 %v6331_v32, %v6329_v58 }
 0x3b8   : > { %v6234_v6 = vmul.f32 %v7778_v41, %v10705_v27  ;;  %v7780_v51 = vadd.f32 %v6136_v37, %v10575_v33  ;;  %v6370_v26 = vpack.c.bf16 %v6332_v4, %v6330_v10 }
 0x3b9   : > { %v6289_v60 = vadd.f32 %v10708_v57, %v6233_v44  ;;  %v6235_v8 = vmul.f32 %v7779_v1, %v10702_v2 }
 0x3ba   : > { %v6290_v16 = vadd.f32 %v10711_v11, %v6234_v6  ;;  %v6236_v36 = vmul.f32 %v7780_v51, %v10705_v27  ;;  %6631 = vmatprep.mubr.bf16.mxu0 %v6370_v26 }
 0x3bb   : > { %v6291_v25 = vadd.f32 %v10708_v57, %v6235_v8  ;;  %6632 = vmatmul.mubr.bf16.gmra.mrb[96].mxu0 %v6369_v13  ;;  %v6333_v54 = vmax.f32 %v6289_v60, 0.0 }
 0x3bc   : > { %v6292_v46 = vadd.f32 %v10711_v11, %v6236_v36  ;;  %v6140_v63 = vpop.f32.mrb[4].mxu1  ;;  %v6334_v34 = vmax.f32 %v6290_v16, 0.0 }
 0x3bd   : > { %v6335_v29 = vmax.f32 %v6291_v25, 0.0  ;;  %v7781_v33 = vadd.f32 %v6140_v63, %v10582_v24  ;;  %v6142_v28 = vpop.f32.mrb[5].mxu1 }
 0x3be   : > { %v6336_v19 = vmax.f32 %v6292_v46, 0.0  ;;  %v7782_v42 = vadd.f32 %v6142_v28, %v10585_v5  ;;  %v6144_v39 = vpop.f32.mrb[6].mxu1 }
 0x3bf   : > { %v6237_v23 = vmul.f32 %v7781_v33, %v10702_v2  ;;  %v7783_v31 = vadd.f32 %v6144_v39, %v10587_v17  ;;  %v6146_v47 = vpop.f32.mrb[7].mxu1  ;;  %v6371_v58 = vpack.c.bf16 %v6335_v29, %v6333_v54 }
 0x3c0   : > { %v6238_v32 = vmul.f32 %v7782_v42, %v10705_v27  ;;  %v7784_v38 = vadd.f32 %v6146_v47, %v10589_v45  ;;  %v6372_v15 = vpack.c.bf16 %v6336_v19, %v6334_v34 }
 0x3c1   : > { %v6293_v10 = vadd.f32 %v10708_v57, %v6237_v23  ;;  %v6239_v24 = vmul.f32 %v7783_v31, %v10702_v2 }
 0x3c2   : > { %v6294_v4 = vadd.f32 %v10711_v11, %v6238_v32  ;;  %v6240_v5 = vmul.f32 %v7784_v38, %v10705_v27  ;;  %6641 = vmatprep.mubr.bf16.mxu0 %v6372_v15 }
 0x3c3   : > { %v6295_v41 = vadd.f32 %v10708_v57, %v6239_v24  ;;  %6642 = vmatmul.mubr.bf16.gmra.mrb[100].mxu0 %v6371_v58  ;;  %v6337_v44 = vmax.f32 %v6293_v10, 0.0 }
 0x3c4   : > { %v6296_v17 = vadd.f32 %v10711_v11, %v6240_v5  ;;  %v6150_v9 = vpop.f32.mrb[8].mxu1  ;;  %v6338_v13 = vmax.f32 %v6294_v4, 0.0 }
 0x3c5   : > { %v6339_v1 = vmax.f32 %v6295_v41, 0.0  ;;  %v7785_v45 = vadd.f32 %v6150_v9, %v10596_v30  ;;  %v6152_v37 = vpop.f32.mrb[9].mxu1 }
 0x3c6   : > { %v6340_v6 = vmax.f32 %v6296_v17, 0.0  ;;  %v7786_v51 = vadd.f32 %v6152_v37, %v10599_v0  ;;  %v6154_v26 = vpop.f32.mrb[10].mxu1 }
 0x3c7   : > { %v6241_v60 = vmul.f32 %v7785_v45, %v10702_v2  ;;  %v7787_v8 = vadd.f32 %v6154_v26, %v10601_v20  ;;  %v6156_v16 = vpop.f32.mrb[11].mxu1  ;;  %v6373_v36 = vpack.c.bf16 %v6339_v1, %v6337_v44 }
 0x3c8   : > { %v6242_v25 = vmul.f32 %v7786_v51, %v10705_v27  ;;  %v7788_v46 = vadd.f32 %v6156_v16, %v10603_v53  ;;  %v6374_v63 = vpack.c.bf16 %v6340_v6, %v6338_v13 }
 0x3c9   : > { %v6297_v54 = vadd.f32 %v10708_v57, %v6241_v60  ;;  %v6243_v30 = vmul.f32 %v7787_v8, %v10702_v2 }
 0x3ca   : > { %v6298_v29 = vadd.f32 %v10711_v11, %v6242_v25  ;;  %v6244_v0 = vmul.f32 %v7788_v46, %v10705_v27  ;;  %6651 = vmatprep.mubr.bf16.mxu0 %v6374_v63 }
 0x3cb   : > { %v6299_v33 = vadd.f32 %v10708_v57, %v6243_v30  ;;  %6652 = vmatmul.mubr.bf16.gmra.mrb[104].mxu0 %v6373_v36  ;;  %v6341_v34 = vmax.f32 %v6297_v54, 0.0 }
 0x3cc   : > { %v6300_v20 = vadd.f32 %v10711_v11, %v6244_v0  ;;  %v6160_v28 = vpop.f32.mrb[12].mxu1  ;;  %v6342_v39 = vmax.f32 %v6298_v29, 0.0 }
 0x3cd   : > { %v6343_v19 = vmax.f32 %v6299_v33, 0.0  ;;  %v7789_v53 = vadd.f32 %v6160_v28, %v10610_v12  ;;  %v6162_v42 = vpop.f32.mrb[13].mxu1 }
 0x3ce   : > { %v6344_v23 = vmax.f32 %v6300_v20, 0.0  ;;  %v7790_v31 = vadd.f32 %v6162_v42, %v10613_v55  ;;  %v6164_v47 = vpop.f32.mrb[14].mxu1 }
 0x3cf   : > { %v6245_v58 = vmul.f32 %v7789_v53, %v10702_v2  ;;  %v7791_v32 = vadd.f32 %v6164_v47, %v10615_v7  ;;  %v6166_v38 = vpop.f32.mrb[15].mxu1  ;;  %v6375_v15 = vpack.c.bf16 %v6343_v19, %v6341_v34 }
 0x3d0   : > { %v6246_v10 = vmul.f32 %v7790_v31, %v10705_v27  ;;  %v7792_v24 = vadd.f32 %v6166_v38, %v10617_v43  ;;  %v6376_v4 = vpack.c.bf16 %v6344_v23, %v6342_v39 }
 0x3d1   : > { %v6301_v5 = vadd.f32 %v10708_v57, %v6245_v58  ;;  %v6247_v12 = vmul.f32 %v7791_v32, %v10702_v2 }
 0x3d2   : > { %v6302_v41 = vadd.f32 %v10711_v11, %v6246_v10  ;;  %v6248_v55 = vmul.f32 %v7792_v24, %v10705_v27  ;;  %6661 = vmatprep.mubr.bf16.mxu0 %v6376_v4 }
 0x3d3   : > { %v6303_v17 = vadd.f32 %v10708_v57, %v6247_v12  ;;  %6662 = vmatmul.mubr.bf16.gmra.mrb[108].mxu0 %v6375_v15  ;;  %v6345_v44 = vmax.f32 %v6301_v5, 0.0 }
 0x3d4   : > { %v6304_v7 = vadd.f32 %v10711_v11, %v6248_v55  ;;  %v6170_v9 = vpop.f32.mrb[16].mxu1  ;;  %v6346_v37 = vmax.f32 %v6302_v41, 0.0 }
 0x3d5   : > { %v6347_v1 = vmax.f32 %v6303_v17, 0.0  ;;  %v7793_v43 = vadd.f32 %v6170_v9, %v10626_v35  ;;  %v6172_v45 = vpop.f32.mrb[17].mxu1 }
 0x3d6   : > { %v6348_v13 = vmax.f32 %v6304_v7, 0.0  ;;  %v7794_v6 = vadd.f32 %v6172_v45, %v10628_v61  ;;  %v6174_v51 = vpop.f32.mrb[18].mxu1 }
 0x3d7   : > { %v6249_v26 = vmul.f32 %v7793_v43, %v10702_v2  ;;  %v7795_v60 = vadd.f32 %v6174_v51, %v10630_v3  ;;  %v6176_v8 = vpop.f32.mrb[19].mxu1  ;;  %v6377_v16 = vpack.c.bf16 %v6347_v1, %v6345_v44 }
 0x3d8   : > { %v6250_v36 = vmul.f32 %v7794_v6, %v10705_v27  ;;  %v7796_v25 = vadd.f32 %v6176_v8, %v10632_v52  ;;  %v6378_v46 = vpack.c.bf16 %v6348_v13, %v6346_v37 }
 0x3d9   : > { %v6305_v63 = vadd.f32 %v10708_v57, %v6249_v26  ;;  %v6251_v35 = vmul.f32 %v7795_v60, %v10702_v2 }
 0x3da   : > { %v6306_v54 = vadd.f32 %v10711_v11, %v6250_v36  ;;  %v6252_v61 = vmul.f32 %v7796_v25, %v10705_v27  ;;  %6671 = vmatprep.mubr.bf16.mxu0 %v6378_v46 }
 0x3db   : > { %v6307_v30 = vadd.f32 %v10708_v57, %v6251_v35  ;;  %6672 = vmatmul.mubr.bf16.gmra.mrb[112].mxu0 %v6377_v16  ;;  %v6349_v0 = vmax.f32 %v6305_v63, 0.0 }
 0x3dc   : > { %v6308_v3 = vadd.f32 %v10711_v11, %v6252_v61  ;;  %v6180_v29 = vpop.f32.mrb[20].mxu1  ;;  %v6350_v28 = vmax.f32 %v6306_v54, 0.0 }
 0x3dd   : > { %v6351_v33 = vmax.f32 %v6307_v30, 0.0  ;;  %v7797_v52 = vadd.f32 %v6180_v29, %v10636_v14  ;;  %v6182_v20 = vpop.f32.mrb[21].mxu1 }
 0x3de   : > { %v6352_v34 = vmax.f32 %v6308_v3, 0.0  ;;  %v7798_v19 = vadd.f32 %v6182_v20, %v10638_v22  ;;  %v6184_v53 = vpop.f32.mrb[22].mxu1 }
 0x3df   : > { %v6253_v42 = vmul.f32 %v7797_v52, %v10702_v2  ;;  %v7799_v39 = vadd.f32 %v6184_v53, %v10640_v49  ;;  %v6186_v23 = vpop.f32.mrb[23].mxu1  ;;  %v6379_v31 = vpack.c.bf16 %v6351_v33, %v6349_v0  ;;  %v11188_v0 = vld [vmem:[#allocation10_spill] sm:$0xff] }
 0x3e0   : > { %v6254_v47 = vmul.f32 %v7798_v19, %v10705_v27  ;;  %v7800_v58 = vadd.f32 %v6186_v23, %v10642_v50  ;;  %v6380_v32 = vpack.c.bf16 %v6352_v34, %v6350_v28 }
 0x3e1   : > { %v6309_v38 = vadd.f32 %v10708_v57, %v6253_v42  ;;  %v6255_v14 = vmul.f32 %v7799_v39, %v10702_v2 }
 0x3e2   : > { %v6310_v15 = vadd.f32 %v10711_v11, %v6254_v47  ;;  %v6256_v22 = vmul.f32 %v7800_v58, %v10705_v27  ;;  %6681 = vmatprep.mubr.bf16.mxu0 %v6380_v32  ;;  %v11189_v58 = vld [vmem:[#allocation4_spill] sm:$0xff] }
 0x3e3   : > { %v6311_v10 = vadd.f32 %v10708_v57, %v6255_v14  ;;  %6682 = vmatmul.mubr.bf16.gmra.mrb[116].mxu0 %v6379_v31  ;;  %v6353_v4 = vmax.f32 %v6309_v38, 0.0 }
 0x3e4   : > { %v6312_v49 = vadd.f32 %v10711_v11, %v6256_v22  ;;  %v6190_v24 = vpop.f32.mrb[24].mxu1  ;;  %v6354_v41 = vmax.f32 %v6310_v15, 0.0  ;;  %v6722_v15 = vld [vmem:[%s625_s23] sm:$0x3] }
 0x3e5   : > { %v6355_v5 = vmax.f32 %v6311_v10, 0.0  ;;  %v7801_v50 = vadd.f32 %v6190_v24, %v10646_v21  ;;  %v6192_v12 = vpop.f32.mrb[25].mxu1  ;;  %v6778_v22 = vld [vmem:[%s629_s25] sm:$0x3]  ;;  %v11190_v10 = vld [vmem:[#allocation5_spill] sm:$0xff] }
 0x3e6   : > { %v6356_v55 = vmax.f32 %v6312_v49, 0.0  ;;  %v7802_v17 = vadd.f32 %v6192_v12, %v10648_v59  ;;  %v6194_v7 = vpop.f32.mrb[26].mxu1  ;;  %v10860_v49 = vrot.slane %v6722_v15, %v11190_v10  ;;  %v11191_v24 = vld [vmem:[#allocation6_spill] sm:$0xff] }
 0x3e7   : > { %v6257_v9 = vmul.f32 %v7801_v50, %v10702_v2  ;;  %v7803_v44 = vadd.f32 %v6194_v7, %v10650_v18  ;;  %v6196_v1 = vpop.f32.mrb[27].mxu1  ;;  %v6381_v43 = vpack.c.bf16 %v6355_v5, %v6353_v4  ;;  %v10863_v4 = vrot.slane %v6722_v15, %v11191_v24 }
 0x3e8   : > { %v6258_v45 = vmul.f32 %v7802_v17, %v10705_v27  ;;  %v7804_v37 = vadd.f32 %v6196_v1, %v10652_v48  ;;  %v6382_v13 = vpack.c.bf16 %v6356_v55, %v6354_v41  ;;  %v10866_v5 = vrot.slane %v6778_v22, %v11190_v10 }
 0x3e9   : > { %v6313_v6 = vadd.f32 %v10708_v57, %v6257_v9  ;;  %v6259_v21 = vmul.f32 %v7803_v44, %v10702_v2  ;;  %v10869_v50 = vrot.slane %v6778_v22, %v11191_v24 }
 0x3ea   : > { %v6314_v51 = vadd.f32 %v10711_v11, %v6258_v45  ;;  %v6260_v59 = vmul.f32 %v7804_v37, %v10705_v27  ;;  %6691 = vmatprep.mubr.bf16.mxu0 %v6382_v13 }
 0x3eb   : > { %v6315_v26 = vadd.f32 %v10708_v57, %v6259_v21  ;;  %6692 = vmatmul.mubr.bf16.gmra.mrb[120].mxu0 %v6381_v43  ;;  %v6357_v8 = vmax.f32 %v6313_v6, 0.0 }
 0x3ec   : > { %v6316_v18 = vadd.f32 %v10711_v11, %v6260_v59  ;;  %v6200_v60 = vpop.f32.mrb[28].mxu1  ;;  %v6358_v25 = vmax.f32 %v6314_v51, 0.0 }
 0x3ed   : > { %v6359_v16 = vmax.f32 %v6315_v26, 0.0  ;;  %v7805_v48 = vadd.f32 %v6200_v60, %v10656_v40  ;;  %v6202_v36 = vpop.f32.mrb[29].mxu1 }
 0x3ee   : > { %v6360_v46 = vmax.f32 %v6316_v18, 0.0  ;;  %v7806_v63 = vadd.f32 %v6202_v36, %v10658_v56  ;;  %v6204_v35 = vpop.f32.mrb[30].mxu1 }
 0x3ef   : > { %v6261_v54 = vmul.f32 %v7805_v48, %v10702_v2  ;;  %v7807_v61 = vadd.f32 %v6204_v35, %v10660_v62  ;;  %v6206_v30 = vpop.f32.mrb[31].mxu1  ;;  %v6383_v3 = vpack.c.bf16 %v6359_v16, %v6357_v8 }
 0x3f0   : > { %v6262_v29 = vmul.f32 %v7806_v63, %v10705_v27  ;;  %v7808_v33 = vadd.f32 %v6206_v30, %v11188_v0  ;;  %v6384_v52 = vpack.c.bf16 %v6360_v46, %v6358_v25 }
 0x3f1   : > { %v6317_v20 = vadd.f32 %v10708_v57, %v6261_v54  ;;  %v6263_v40 = vmul.f32 %v7807_v61, %v10702_v2  ;;  %v10841_v2 = vld.sshfl [vmem:[%s10990_s1] sm:$0x11 pattern:$0x75316420] }
 0x3f2   : > { %v6318_v28 = vadd.f32 %v10711_v11, %v6262_v29  ;;  %v6264_v56 = vmul.f32 %v7808_v33, %v10705_v27  ;;  %6701 = vmatprep.mubr.bf16.mxu0 %v6384_v52  ;;  %v8692_v27 = vmov 1966171168  }
 0x3f3   : > { %v6319_v34 = vadd.f32 %v10708_v57, %v6263_v40  ;;  %6702 = vmatmul.mubr.bf16.gmra.mrb[124].mxu0 %v6383_v3  ;;  %v6361_v19 = vmax.f32 %v6317_v20, 0.0  ;;  %v6911_v57 = vunpack.c.l.s4 %v8692_v27 }
 0x3f4   : > { %v6320_v62 = vadd.f32 %v10711_v11, %v6264_v56  ;;  %v6362_v42 = vmax.f32 %v6318_v28, 0.0  ;;  %v6909_v11 = vcombine.high %v10841_v2, %v10841_v2 }
 0x3f5   : > { %v6363_v53 = vmax.f32 %v6319_v34, 0.0  ;;  %v6912_v47 = vunpack.c.0.s8 %v6911_v57 }
 0x3f6   : > { %v6364_v39 = vmax.f32 %v6320_v62, 0.0 }
 0x3f7   : > { %v6385_v23 = vpack.c.bf16 %v6363_v53, %v6361_v19  ;;  %v10846_v32 = vsub.s32 %v6912_v47, %v11189_v58 }
 0x3f8   : > { %v6386_v31 = vpack.c.bf16 %v6364_v39, %v6362_v42 }
 0x3f9   : > { %v6916_v38 = vrot.slane %v10841_v2, %v10846_v32  ;;  %v6923_v14 = vrot.slane %v6909_v11, %v10846_v32  ;;  %v8642_v2 = vld [vmem:[%s8991_s16 + $0x20] sm:$0xff]   ;;  %v8643_v32 = vld [vmem:[%s8991_s16 + $0x68] sm:$0xff]  }
 0x3fa   : > { %6711 = vmatprep.mubr.bf16.mxu0 %v6386_v31 }
 0x3fb   : > { %6712 = vmatmul.mubr.bf16.gmra.mrb[128].mxu0 %v6385_v23 }
 0x3fc   : > { %7688 = vmatprep.mubr.msk.bf16.mxu0 %vm6925_vm8, %v6923_v14 }
 0x47e   : > { %v6613_v12 = vpop.f32.mrb[88].mxu0 }
 0x47f   : > { %v6734_v41 = vmul.f32 %v10860_v49, %v6613_v12  ;;  %v6615_v55 = vpop.f32.mrb[89].mxu0 }
 0x480   : > { %v6735_v17 = vmul.f32 %v10863_v4, %v6615_v55  ;;  %v6617_v7 = vpop.f32.mrb[90].mxu0 }
 0x481   : > { %v6790_v9 = vadd.f32 %v10866_v5, %v6734_v41  ;;  %v6736_v44 = vmul.f32 %v10860_v49, %v6617_v7  ;;  %v6619_v1 = vpop.f32.mrb[91].mxu0 }
 0x482   : > { %v6791_v43 = vadd.f32 %v10869_v50, %v6735_v17  ;;  %v6737_v45 = vmul.f32 %v10863_v4, %v6619_v1 }
 0x483   : > { %v6792_v37 = vadd.f32 %v10866_v5, %v6736_v44  ;;  %v6834_v6 = vmax.f32 %v6790_v9, 0.0 }
 0x484   : > { %v6793_v13 = vadd.f32 %v10869_v50, %v6737_v45  ;;  %v6835_v51 = vmax.f32 %v6791_v43, 0.0 }
 0x485   : > { %v6836_v21 = vmax.f32 %v6792_v37, 0.0 }
 0x486   : > { %v6837_v59 = vmax.f32 %v6793_v13, 0.0  ;;  %v6623_v26 = vpop.f32.mrb[92].mxu0 }
 0x487   : > { %v6879_v18 = vpack.c.bf16 %v6836_v21, %v6834_v6  ;;  %v6738_v60 = vmul.f32 %v10860_v49, %v6623_v26  ;;  %v6625_v8 = vpop.f32.mrb[93].mxu0 }
 0x488   : > { %v6739_v16 = vmul.f32 %v10863_v4, %v6625_v8  ;;  %v6627_v48 = vpop.f32.mrb[94].mxu0  ;;  %v6880_v36 = vpack.c.bf16 %v6837_v59, %v6835_v51 }
 0x489   : > { %v6794_v25 = vadd.f32 %v10866_v5, %v6738_v60  ;;  %v6740_v46 = vmul.f32 %v10860_v49, %v6627_v48  ;;  %v6629_v63 = vpop.f32.mrb[95].mxu0 }
 0x48a   : > { %v6795_v35 = vadd.f32 %v10869_v50, %v6739_v16  ;;  %v6741_v54 = vmul.f32 %v10863_v4, %v6629_v63  ;;  %6929 = vmatprep.subr.bf16.mxu0 %v6880_v36 }
 0x48b   : > { %v6796_v61 = vadd.f32 %v10866_v5, %v6740_v46  ;;  %6930 = vmatpush1.bf16.msra.mxu0 %v6879_v18  ;;  %v6838_v3 = vmax.f32 %v6794_v25, 0.0 }
 0x48c   : > { %v6797_v30 = vadd.f32 %v10869_v50, %v6741_v54  ;;  %v6839_v0 = vmax.f32 %v6795_v35, 0.0 }
 0x48d   : > { %v6840_v29 = vmax.f32 %v6796_v61, 0.0 }
 0x48e   : > { %v6841_v33 = vmax.f32 %v6797_v30, 0.0  ;;  %v6633_v52 = vpop.f32.mrb[96].mxu0 }
 0x48f   : > { %v6881_v20 = vpack.c.bf16 %v6840_v29, %v6838_v3  ;;  %v6742_v40 = vmul.f32 %v10860_v49, %v6633_v52  ;;  %v6635_v28 = vpop.f32.mrb[97].mxu0 }
 0x490   : > { %v6743_v56 = vmul.f32 %v10863_v4, %v6635_v28  ;;  %v6637_v34 = vpop.f32.mrb[98].mxu0  ;;  %v6882_v62 = vpack.c.bf16 %v6841_v33, %v6839_v0 }
 0x491   : > { %v6798_v19 = vadd.f32 %v10866_v5, %v6742_v40  ;;  %v6744_v53 = vmul.f32 %v10860_v49, %v6637_v34  ;;  %v6639_v42 = vpop.f32.mrb[99].mxu0 }
 0x492   : > { %v6799_v39 = vadd.f32 %v10869_v50, %v6743_v56  ;;  %v6745_v23 = vmul.f32 %v10863_v4, %v6639_v42  ;;  %6931 = vmatprep.subr.bf16.mxu0 %v6882_v62 }
 0x493   : > { %v6800_v31 = vadd.f32 %v10866_v5, %v6744_v53  ;;  %6932 = vmatpush1.bf16.msra.mxu0 %v6881_v20  ;;  %v6842_v57 = vmax.f32 %v6798_v19, 0.0 }
 0x494   : > { %v6801_v27 = vadd.f32 %v10869_v50, %v6745_v23  ;;  %v6843_v47 = vmax.f32 %v6799_v39, 0.0 }
 0x495   : > { %v6844_v11 = vmax.f32 %v6800_v31, 0.0 }
 0x496   : > { %v6845_v58 = vmax.f32 %v6801_v27, 0.0  ;;  %v6643_v14 = vpop.f32.mrb[100].mxu0 }
 0x497   : > { %v6883_v15 = vpack.c.bf16 %v6844_v11, %v6842_v57  ;;  %v6746_v22 = vmul.f32 %v10860_v49, %v6643_v14  ;;  %v6645_v10 = vpop.f32.mrb[101].mxu0 }
 0x498   : > { %v6747_v24 = vmul.f32 %v10863_v4, %v6645_v10  ;;  %v6647_v12 = vpop.f32.mrb[102].mxu0  ;;  %v6884_v41 = vpack.c.bf16 %v6845_v58, %v6843_v47 }
 0x499   : > { %v6802_v55 = vadd.f32 %v10866_v5, %v6746_v22  ;;  %v6748_v17 = vmul.f32 %v10860_v49, %v6647_v12  ;;  %v6649_v7 = vpop.f32.mrb[103].mxu0 }
 0x49a   : > { %v6803_v9 = vadd.f32 %v10869_v50, %v6747_v24  ;;  %v6749_v44 = vmul.f32 %v10863_v4, %v6649_v7  ;;  %6933 = vmatprep.subr.bf16.mxu0 %v6884_v41 }
 0x49b   : > { %v6804_v1 = vadd.f32 %v10866_v5, %v6748_v17  ;;  %6934 = vmatpush1.bf16.msra.mxu0 %v6883_v15  ;;  %v6846_v45 = vmax.f32 %v6802_v55, 0.0 }
 0x49c   : > { %v6805_v43 = vadd.f32 %v10869_v50, %v6749_v44  ;;  %v6847_v13 = vmax.f32 %v6803_v9, 0.0 }
 0x49d   : > { %v6848_v37 = vmax.f32 %v6804_v1, 0.0 }
 0x49e   : > { %v6849_v6 = vmax.f32 %v6805_v43, 0.0  ;;  %v6653_v21 = vpop.f32.mrb[104].mxu0 }
 0x49f   : > { %v6885_v51 = vpack.c.bf16 %v6848_v37, %v6846_v45  ;;  %v6750_v59 = vmul.f32 %v10860_v49, %v6653_v21  ;;  %v6655_v26 = vpop.f32.mrb[105].mxu0 }
 0x4a0   : > { %v6751_v18 = vmul.f32 %v10863_v4, %v6655_v26  ;;  %v6657_v60 = vpop.f32.mrb[106].mxu0  ;;  %v6886_v8 = vpack.c.bf16 %v6849_v6, %v6847_v13 }
 0x4a1   : > { %v6806_v16 = vadd.f32 %v10866_v5, %v6750_v59  ;;  %v6752_v48 = vmul.f32 %v10860_v49, %v6657_v60  ;;  %v6659_v36 = vpop.f32.mrb[107].mxu0 }
 0x4a2   : > { %v6807_v25 = vadd.f32 %v10869_v50, %v6751_v18  ;;  %v6753_v46 = vmul.f32 %v10863_v4, %v6659_v36  ;;  %6935 = vmatprep.subr.bf16.mxu0 %v6886_v8 }
 0x4a3   : > { %v6808_v63 = vadd.f32 %v10866_v5, %v6752_v48  ;;  %6936 = vmatpush1.bf16.msra.mxu0 %v6885_v51  ;;  %v6850_v54 = vmax.f32 %v6806_v16, 0.0 }
 0x4a4   : > { %v6809_v35 = vadd.f32 %v10869_v50, %v6753_v46  ;;  %v6851_v30 = vmax.f32 %v6807_v25, 0.0 }
 0x4a5   : > { %v6852_v61 = vmax.f32 %v6808_v63, 0.0 }
 0x4a6   : > { %v6853_v3 = vmax.f32 %v6809_v35, 0.0  ;;  %v6663_v29 = vpop.f32.mrb[108].mxu0 }
 0x4a7   : > { %v6887_v0 = vpack.c.bf16 %v6852_v61, %v6850_v54  ;;  %v6754_v33 = vmul.f32 %v10860_v49, %v6663_v29  ;;  %v6665_v52 = vpop.f32.mrb[109].mxu0 }
 0x4a8   : > { %v6755_v20 = vmul.f32 %v10863_v4, %v6665_v52  ;;  %v6667_v40 = vpop.f32.mrb[110].mxu0  ;;  %v6888_v28 = vpack.c.bf16 %v6853_v3, %v6851_v30 }
 0x4a9   : > { %v6810_v56 = vadd.f32 %v10866_v5, %v6754_v33  ;;  %v6756_v34 = vmul.f32 %v10860_v49, %v6667_v40  ;;  %v6669_v62 = vpop.f32.mrb[111].mxu0 }
 0x4aa   : > { %v6811_v19 = vadd.f32 %v10869_v50, %v6755_v20  ;;  %v6757_v53 = vmul.f32 %v10863_v4, %v6669_v62  ;;  %6937 = vmatprep.subr.bf16.mxu0 %v6888_v28 }
 0x4ab   : > { %v6812_v42 = vadd.f32 %v10866_v5, %v6756_v34  ;;  %6938 = vmatpush1.bf16.msra.mxu0 %v6887_v0  ;;  %v6854_v23 = vmax.f32 %v6810_v56, 0.0 }
 0x4ac   : > { %v6813_v39 = vadd.f32 %v10869_v50, %v6757_v53  ;;  %v6855_v27 = vmax.f32 %v6811_v19, 0.0 }
 0x4ad   : > { %v6856_v31 = vmax.f32 %v6812_v42, 0.0 }
 0x4ae   : > { %v6857_v57 = vmax.f32 %v6813_v39, 0.0  ;;  %v6673_v11 = vpop.f32.mrb[112].mxu0 }
 0x4af   : > { %v6889_v47 = vpack.c.bf16 %v6856_v31, %v6854_v23  ;;  %v6758_v58 = vmul.f32 %v10860_v49, %v6673_v11  ;;  %v6675_v14 = vpop.f32.mrb[113].mxu0 }
 0x4b0   : > { %v6759_v15 = vmul.f32 %v10863_v4, %v6675_v14  ;;  %v6677_v22 = vpop.f32.mrb[114].mxu0  ;;  %v6890_v10 = vpack.c.bf16 %v6857_v57, %v6855_v27 }
 0x4b1   : > { %v6814_v24 = vadd.f32 %v10866_v5, %v6758_v58  ;;  %v6760_v12 = vmul.f32 %v10860_v49, %v6677_v22  ;;  %v6679_v41 = vpop.f32.mrb[115].mxu0 }
 0x4b2   : > { %v6815_v55 = vadd.f32 %v10869_v50, %v6759_v15  ;;  %v6761_v17 = vmul.f32 %v10863_v4, %v6679_v41  ;;  %6939 = vmatprep.subr.bf16.mxu0 %v6890_v10 }
 0x4b3   : > { %v6816_v7 = vadd.f32 %v10866_v5, %v6760_v12  ;;  %6940 = vmatpush1.bf16.msra.mxu0 %v6889_v47  ;;  %v6858_v44 = vmax.f32 %v6814_v24, 0.0 }
 0x4b4   : > { %v6817_v9 = vadd.f32 %v10869_v50, %v6761_v17  ;;  %v6859_v43 = vmax.f32 %v6815_v55, 0.0 }
 0x4b5   : > { %v6860_v1 = vmax.f32 %v6816_v7, 0.0 }
 0x4b6   : > { %v6861_v45 = vmax.f32 %v6817_v9, 0.0  ;;  %v6683_v37 = vpop.f32.mrb[116].mxu0 }
 0x4b7   : > { %v6891_v13 = vpack.c.bf16 %v6860_v1, %v6858_v44  ;;  %v6762_v6 = vmul.f32 %v10860_v49, %v6683_v37  ;;  %v6685_v21 = vpop.f32.mrb[117].mxu0 }
 0x4b8   : > { %v6763_v51 = vmul.f32 %v10863_v4, %v6685_v21  ;;  %v6687_v59 = vpop.f32.mrb[118].mxu0  ;;  %v6892_v26 = vpack.c.bf16 %v6861_v45, %v6859_v43 }
 0x4b9   : > { %v6818_v18 = vadd.f32 %v10866_v5, %v6762_v6  ;;  %v6764_v60 = vmul.f32 %v10860_v49, %v6687_v59  ;;  %v6689_v8 = vpop.f32.mrb[119].mxu0 }
 0x4ba   : > { %v6819_v16 = vadd.f32 %v10869_v50, %v6763_v51  ;;  %v6765_v48 = vmul.f32 %v10863_v4, %v6689_v8  ;;  %6941 = vmatprep.subr.bf16.mxu0 %v6892_v26 }
 0x4bb   : > { %v6820_v36 = vadd.f32 %v10866_v5, %v6764_v60  ;;  %6942 = vmatpush1.bf16.msra.mxu0 %v6891_v13  ;;  %v6862_v46 = vmax.f32 %v6818_v18, 0.0 }
 0x4bc   : > { %v6821_v25 = vadd.f32 %v10869_v50, %v6765_v48  ;;  %v6863_v35 = vmax.f32 %v6819_v16, 0.0 }
 0x4bd   : > { %v6864_v63 = vmax.f32 %v6820_v36, 0.0 }
 0x4be   : > { %v6865_v54 = vmax.f32 %v6821_v25, 0.0  ;;  %v6693_v61 = vpop.f32.mrb[120].mxu0 }
 0x4bf   : > { %v6893_v30 = vpack.c.bf16 %v6864_v63, %v6862_v46  ;;  %v6766_v3 = vmul.f32 %v10860_v49, %v6693_v61  ;;  %v6695_v29 = vpop.f32.mrb[121].mxu0  ;;  %v8638_v61 = vld [vmem:[%s8991_s16 + $0x10] sm:$0xff]  }
 0x4c0   : > { %v6767_v0 = vmul.f32 %v10863_v4, %v6695_v29  ;;  %v6697_v33 = vpop.f32.mrb[122].mxu0  ;;  %v6894_v52 = vpack.c.bf16 %v6865_v54, %v6863_v35  ;;  %v8633_v35 = vld [vmem:[%s8991_s16 + $0x40] sm:$0xff]   ;;  %v8637_v54 = vld [vmem:[%s8991_s16 + $0x50] sm:$0xff]  }
 0x4c1   : > { %v6822_v20 = vadd.f32 %v10866_v5, %v6766_v3  ;;  %v6768_v40 = vmul.f32 %v10860_v49, %v6697_v33  ;;  %v6699_v28 = vpop.f32.mrb[123].mxu0  ;;  %v8640_v3 = vld [vmem:[%s8991_s16 + $0x18] sm:$0xff]   ;;  %v8641_v29 = vld [vmem:[%s8991_s16 + $0x60] sm:$0xff]   ;;  %v8646_v33 = vld [vmem:[%s8991_s16 + $0x30] sm:$0xff]  }
 0x4c2   : > { %v6823_v56 = vadd.f32 %v10869_v50, %v6767_v0  ;;  %v6769_v34 = vmul.f32 %v10863_v4, %v6699_v28  ;;  %6943 = vmatprep.subr.bf16.mxu0 %v6894_v52  ;;  %v8645_v0 = vld [vmem:[%s8991_s16 + $0x70] sm:$0xff]   ;;  %v8647_v52 = vld [vmem:[%s8991_s16 + $0x78] sm:$0xff]  }
 0x4c3   : > { %v6824_v62 = vadd.f32 %v10866_v5, %v6768_v40  ;;  %6944 = vmatpush1.bf16.msra.mxu0 %v6893_v30  ;;  %v6866_v53 = vmax.f32 %v6822_v20, 0.0  ;;  %v8639_v30 = vld [vmem:[%s8991_s16 + $0x58] sm:$0xff]  }
 0x4c4   : > { %v6825_v19 = vadd.f32 %v10869_v50, %v6769_v34  ;;  %v6867_v39 = vmax.f32 %v6823_v56, 0.0  ;;  %v8648_v20 = vld [vmem:[%s8991_s16 + $0x38] sm:$0xff]  }
 0x4c5   : > { %v6868_v42 = vmax.f32 %v6824_v62, 0.0 }
 0x4c6   : > { %v6869_v23 = vmax.f32 %v6825_v19, 0.0  ;;  %v6703_v31 = vpop.f32.mrb[124].mxu0 }
 0x4c7   : > { %v6895_v27 = vpack.c.bf16 %v6868_v42, %v6866_v53  ;;  %v6770_v57 = vmul.f32 %v10860_v49, %v6703_v31  ;;  %v6705_v11 = vpop.f32.mrb[125].mxu0  ;;  %v7689_v42 = vld [vmem:[%s637_s15] ss:$0 sm:$0xff] }
 0x4c8   : > { %v6771_v47 = vmul.f32 %v10863_v4, %v6705_v11  ;;  %v6707_v58 = vpop.f32.mrb[126].mxu0  ;;  %v6896_v14 = vpack.c.bf16 %v6869_v23, %v6867_v39 }
 0x4c9   : > { %v6826_v15 = vadd.f32 %v10866_v5, %v6770_v57  ;;  %v6772_v22 = vmul.f32 %v10860_v49, %v6707_v58  ;;  %v6709_v10 = vpop.f32.mrb[127].mxu0 }
 0x4ca   : > { %v6827_v24 = vadd.f32 %v10869_v50, %v6771_v47  ;;  %v6773_v12 = vmul.f32 %v10863_v4, %v6709_v10  ;;  %6945 = vmatprep.subr.bf16.mxu0 %v6896_v14 }
 0x4cb   : > { %v6828_v41 = vadd.f32 %v10866_v5, %v6772_v22  ;;  %6946 = vmatpush1.bf16.msra.mxu0 %v6895_v27  ;;  %v6870_v17 = vmax.f32 %v6826_v15, 0.0 }
 0x4cc   : > { %v6829_v55 = vadd.f32 %v10869_v50, %v6773_v12  ;;  %v6871_v9 = vmax.f32 %v6827_v24, 0.0 }
 0x4cd   : > { %v6872_v7 = vmax.f32 %v6828_v41, 0.0 }
 0x4ce   : > { %v6873_v44 = vmax.f32 %v6829_v55, 0.0  ;;  %v6713_v1 = vpop.f32.mrb[128].mxu0 }
 0x4cf   : > { %v6897_v43 = vpack.c.bf16 %v6872_v7, %v6870_v17  ;;  %v6774_v45 = vmul.f32 %v10860_v49, %v6713_v1  ;;  %v6715_v37 = vpop.f32.mrb[129].mxu0 }
 0x4d0   : > { %v6775_v13 = vmul.f32 %v10863_v4, %v6715_v37  ;;  %v6717_v6 = vpop.f32.mrb[130].mxu0  ;;  %v6898_v21 = vpack.c.bf16 %v6873_v44, %v6871_v9 }
 0x4d1   : > { %v6830_v51 = vadd.f32 %v10866_v5, %v6774_v45  ;;  %v6776_v59 = vmul.f32 %v10860_v49, %v6717_v6  ;;  %v6719_v26 = vpop.f32.mrb[131].mxu0 }
 0x4d2   : > { %v6831_v18 = vadd.f32 %v10869_v50, %v6775_v13  ;;  %v6777_v60 = vmul.f32 %v10863_v4, %v6719_v26  ;;  %6947 = vmatprep.subr.bf16.mxu0 %v6898_v21  ;;  %v8634_v4 = vld [vmem:[%s8991_s16] sm:$0xff]  }
 0x4d3   : > { %v6832_v8 = vadd.f32 %v10866_v5, %v6776_v59  ;;  %6948 = vmatpush1.bf16.msra.mxu0 %v6897_v43  ;;  %v6874_v48 = vmax.f32 %v6830_v51, 0.0  ;;  %v8635_v5 = vld [vmem:[%s8991_s16 + $0x48] sm:$0xff]  }
 0x4d4   : > { %v6833_v16 = vadd.f32 %v10869_v50, %v6777_v60  ;;  %v6875_v25 = vmax.f32 %v6831_v18, 0.0  ;;  %v8636_v50 = vld [vmem:[%s8991_s16 + $0x8] sm:$0xff]  }
 0x4d5   : > { %v6876_v36 = vmax.f32 %v6832_v8, 0.0 }
 0x4d6   : > { %v6877_v49 = vmax.f32 %v6833_v16, 0.0 }
 0x4d7   : > { %v6899_v46 = vpack.c.bf16 %v6876_v36, %v6874_v48 }
 0x4d8   : > { %v6900_v63 = vpack.c.bf16 %v6877_v49, %v6875_v25 }
 0x4da   : > { %6949 = vmatprep.subr.bf16.mxu0 %v6900_v63 }
 0x4db   : > { %6950 = vmatpush1.bf16.msra.mxu0 %v6899_v46 }
 0x4dc   : > { %7711 = vmatprep.subr.bf16.mxu0 %v8633_v35 }
 0x4de   : > { %6962 = vmatmul.mubr.bf16.vlgmr.msra.gmra.mrb[132].mxu0 %v6916_v38  ;;  %v8644_v38 = vld [vmem:[%s8991_s16 + $0x28] sm:$0xff]  }
 0x4df   : > { %7712 = vmatpush3.bf16.msra.mxu0 %v8634_v4 }
 0x4e0   : > { %7713 = vmatprep.subr.bf16.mxu0 %v8635_v5 }
 0x4e3   : > { %7714 = vmatpush3.bf16.msra.mxu0 %v8636_v50 }
 0x4e4   : > { %7715 = vmatprep.subr.bf16.mxu0 %v8637_v54 }
 0x4e7   : > { %7716 = vmatpush3.bf16.msra.mxu0 %v8638_v61 }
 0x4e8   : > { %7717 = vmatprep.subr.bf16.mxu0 %v8639_v30 }
 0x4eb   : > { %7718 = vmatpush3.bf16.msra.mxu0 %v8640_v3 }
 0x4ec   : > { %7719 = vmatprep.subr.bf16.mxu0 %v8641_v29 }
 0x4ef   : > { %7720 = vmatpush3.bf16.msra.mxu0 %v8642_v2 }
 0x4f0   : > { %7721 = vmatprep.subr.bf16.mxu0 %v8643_v32 }
 0x4f3   : > { %7722 = vmatpush3.bf16.msra.mxu0 %v8644_v38 }
 0x4f4   : > { %7723 = vmatprep.subr.bf16.mxu0 %v8645_v0 }
 0x4f7   : > { %7724 = vmatpush3.bf16.msra.mxu0 %v8646_v33 }
 0x4f8   : > { %7725 = vmatprep.subr.bf16.mxu0 %v8647_v52 }
 0x4fb   : > { %7726 = vmatpush3.bf16.msra.mxu0 %v8648_v20 }
 0x5b1   : > { %v6963_v40 = vpop.f32.mrb[132].mxu0 }
 0x5b2   : > { %v6965_v28 = vpop.f32.mrb[133].mxu0  ;;  %v6970_v62 = vpack.c.bf16 %v6963_v40, %v6963_v40 }
 0x5b3   : > { %v6971_v56 = vpack.c.bf16 %v6965_v28, %v6965_v28  ;;  %v6967_v34 = vpop.f32.mrb[134].mxu0 }
 0x5b4   : > { %v6968_v19 = vpop.f32.mrb[135].mxu0 }
 0x5b5   : > { %7139 = vmatprep.mubr.bf16.mxu0 %v6971_v56 }
 0x5b6   : > { %7140 = vmatmul.mubr.bf16.vlgmr.msra.gmra.mrb[136].mxu0 %v6970_v62 }
 0x689   : > { %v7727_v53 = vpop.f32.mrb[136].mxu0 }
 0x68a   : > { %v7728_v39 = vpop.f32.mrb[137].mxu0 }
 0x68b   : > { %v7729_v23 = vadd.f32 %v7728_v39, %v7727_v53  ;;  %v7730_v31 = vpop.f32.mrb[138].mxu0 }
 0x68c   : > { %v7731_v27 = vpop.f32.mrb[139].mxu0 }
 0x68d   : > { %v7142_v57 = vadd.f32 %v7729_v23, %v7689_v42 }
 0x68f   : > { %7147 = vst [vmem:[%s641_s26] sm:$0x3] %v7142_v57 }
 0x690 PF: > { %s24_s29 = sadd.s32 1, %s8689_s29  }
 0x691   : > { %p21_p4 = scmp.ge.s32.totalorder %s24_s29, 4  }
 0x693   :  { %23 = sbr.rel (!%p21_p4) target bundleno = 1 (0x1), region = 136 }

</bundles_post_ra>
